<compile_context>
chip_gen: v6e
topology: v6e:2x2x1
jax: 0.10.0
libtpu: 0.0.40
codegen_flags: <defaults>
</compile_context>

<pallas_src>
import inspect

import jax
import jax.numpy as jnp
from jax.experimental import pallas as pl
from jax.experimental.pallas import tpu as pltpu

# Small, self-consistent sizes implied by the module:
#   input_size = C*H*W, hidden sizes 1024 / 512 as in Encoder, latent_dim = 32.
C, H, W = 4, 16, 16
INPUT_SIZE = C * H * W          # 1024
HID1, HID2 = 1024, 512
LATENT = 32                     # opt.latent_dim
LATENT_PAD = 128                # lane-dense padded latent (zero columns, sliced off later)
MAX_TM = 256                    # max batch tile: fills the 256-row v6e/v7x MXU


def encoder_kernel(x_ref,
                   w1_ref, b1_ref, w2_ref, b2_ref, w3_ref, b3_ref,
                   o_ref):
    """Whole encoder forward for one batch tile: 3 MXU matmuls + VPU/EUP activations."""
    # Cast the f32 activation tile to bf16 in-kernel (VPU); keeps HBM-side x in f32
    # and avoids a separate whole-tensor cast pass before the kernel.
    h = x_ref[...].astype(jnp.bfloat16)                               # (TM, 1024)
    # Linear(input_size, 1024) + ReLU
    h = jnp.dot(h, w1_ref[...], preferred_element_type=jnp.float32) + b1_ref[...]
    h = jnp.maximum(h, 0.0).astype(jnp.bfloat16)
    # Linear(1024, 512) + ReLU
    h = jnp.dot(h, w2_ref[...], preferred_element_type=jnp.float32) + b2_ref[...]
    h = jnp.maximum(h, 0.0).astype(jnp.bfloat16)
    # Linear(512, latent) + Tanh   (latent padded to 128 lanes; padded cols -> tanh(0)=0)
    h = jnp.dot(h, w3_ref[...], preferred_element_type=jnp.float32) + b3_ref[...]
    o_ref[...] = jnp.tanh(h).astype(jnp.bfloat16)                     # EUP, bf16 out


# Single-buffer resident blocks when the installed Pallas supports pipeline_mode.
_HAS_PIPELINE_MODE = (
    hasattr(pl, "Buffered")
    and "pipeline_mode" in inspect.signature(pl.BlockSpec).parameters
)


def _resident_spec(shape):
    """Full-array block whose block index never changes -> stays VMEM-resident.
    Constant index_map means it is fetched once; single-buffer it (Buffered(1)) so the
    ~3 MiB of weights are not duplicated in VMEM."""
    nd = len(shape)
    idx = lambda i, _nd=nd: (0,) * _nd
    if _HAS_PIPELINE_MODE:
        return pl.BlockSpec(shape, idx, pipeline_mode=pl.Buffered(1))
    return pl.BlockSpec(shape, idx)


def _round_up(n, m):
    return ((n + m - 1) // m) * m


def _pick_batch_tile(B):
    """Batch tile (rows/grid-step), 16-row aligned (bf16 sublane pack).
    - tiny batches: minimal tile, no wasted MXU work
    - mid batches: >=2 tiles so both v7x TensorCores get work (megacore)
    - large batches: 256-row tiles fill the v6e/v7x 256x256 MXU and amortize
      the ~0.35 us per-grid-step overhead."""
    if B <= 32:
        return _round_up(max(B, 1), 16)
    return min(MAX_TM, _round_up(-(-B // 2), 16))


def prepare_params(params):
    """One-time weight preparation (do NOT call per forward step):
    bf16 weights (halves weight DMA, bf16 MXU path), f32 biases, and the narrow
    latent layer zero-padded 32 -> 128 lanes so the last matmul/output are lane-dense."""
    (w1, b1), (w2, b2), (w3, b3) = params
    w1b = w1.astype(jnp.bfloat16)
    w2b = w2.astype(jnp.bfloat16)
    w3b = jnp.zeros((HID2, LATENT_PAD), jnp.bfloat16).at[:, :LATENT].set(
        w3.astype(jnp.bfloat16))
    b1f = b1.astype(jnp.float32)
    b2f = b2.astype(jnp.float32)
    b3p = jnp.zeros((1, LATENT_PAD), jnp.float32).at[:, :LATENT].set(
        b3.astype(jnp.float32))
    return (w1b, b1f, w2b, b2f, w3b, b3p)


def encoder_forward(x_nchw, prepared):
    """prepared = prepare_params(params); reuse it across calls."""
    B = x_nchw.shape[0]
    w1b, b1, w2b, b2, w3b, b3p = prepared

    # Flatten NCHW -> (B, input_size), like `inputdata.view(B, input_size)`.
    # Stays f32 here; the bf16 cast happens inside the kernel.
    x = x_nchw.reshape(B, INPUT_SIZE)

    # Pad the batch up to a multiple of the (adaptive) batch tile.
    tm = _pick_batch_tile(B)
    nb = pl.cdiv(B, tm)
    b_pad = nb * tm
    if b_pad != B:
        x = jnp.pad(x, ((0, b_pad - B), (0, 0)))

    flat = (w1b, b1, w2b, b2, w3b, b3p)

    out = pl.pallas_call(
        encoder_kernel,
        out_shape=jax.ShapeDtypeStruct((b_pad, LATENT_PAD), jnp.bfloat16),
        grid=(nb,),
        in_specs=[pl.BlockSpec((tm, INPUT_SIZE), lambda i: (i, 0))]   # batch-tiled input
                 + [_resident_spec(a.shape) for a in flat],            # resident weights
        out_specs=pl.BlockSpec((tm, LATENT_PAD), lambda i: (i, 0)),
        compiler_params=pltpu.CompilerParams(
            dimension_semantics=("parallel",),        # v7x: shard batch tiles over 2 TCs
            vmem_limit_bytes=32 * 1024 * 1024,        # headroom over v5e's 16 MiB default
        ),
    )(x, *flat)

    # Drop batch/latent padding and reshape to the module's (B, 1, latent_dim).
    return out[:B, :LATENT].reshape(B, 1, LATENT)


def init_params(key):
    """Deterministic init mimicking PyTorch Linear default: U(-1/sqrt(in), 1/sqrt(in)).
    Weights are stored as (in_features, out_features)."""
    dims = [
        (INPUT_SIZE, HID1),   # Linear(input_size, 1024)
        (HID1, HID2),         # Linear(1024, 512)
        (HID2, LATENT),       # Linear(512, latent_dim)
    ]
    params = []
    for i, (din, dout) in enumerate(dims):
        kw, kb = jax.random.split(jax.random.fold_in(key, i))
        bound = 1.0 / (din ** 0.5)
        w = jax.random.uniform(kw, (din, dout), jnp.float32, -bound, bound)
        b = jax.random.uniform(kb, (1, dout), jnp.float32, -bound, bound)
        params.append((w, b))
    return params


def encoder_reference(x_nchw, params):
    """Pure-JAX reference with the same bf16-weight / f32-accumulate numerics."""
    B = x_nchw.shape[0]
    h = x_nchw.reshape(B, INPUT_SIZE).astype(jnp.bfloat16)
    for i, (w, b) in enumerate(params):
        h = jnp.dot(h, w.astype(jnp.bfloat16),
                    preferred_element_type=jnp.float32) + b.astype(jnp.float32)
        if i < 2:
            h = jnp.maximum(h, 0.0).astype(jnp.bfloat16)
        else:
            h = jnp.tanh(h).astype(jnp.bfloat16)
    return h.reshape(B, 1, LATENT)


if __name__ == "__main__":
    key = jax.random.PRNGKey(0)
    kx, kp = jax.random.split(key)

    x = jax.random.uniform(kx, (2, C, H, W), jnp.float32)   # [B, C, H, W], like NCHW
    params = init_params(kp)
    prepared = prepare_params(params)   # one-time prep; reuse across forward calls

    out = encoder_forward(x, prepared)
    jax.block_until_ready(out)

    ref = encoder_reference(x, params)
    assert out.shape == (2, 1, LATENT), out.shape
    assert jnp.allclose(out.astype(jnp.float32), ref.astype(jnp.float32),
                        atol=2e-2, rtol=2e-2), "mismatch vs reference"

    print("KERNEL_OK")
</pallas_src>

<mosaic_0001>
module attributes {stable_mosaic.version = 11 : i64} {
  func.func @encoder_kernel(%arg0: i32, %arg1: memref<16x1024xf32, #tpu.memory_space<vmem>>, %arg2: memref<1024x1024xbf16, #tpu.memory_space<vmem>>, %arg3: memref<1x1024xf32, #tpu.memory_space<vmem>>, %arg4: memref<1024x512xbf16, #tpu.memory_space<vmem>>, %arg5: memref<1x512xf32, #tpu.memory_space<vmem>>, %arg6: memref<512x128xbf16, #tpu.memory_space<vmem>>, %arg7: memref<1x128xf32, #tpu.memory_space<vmem>>, %arg8: memref<16x128xbf16, #tpu.memory_space<vmem>>) attributes {dimension_semantics = [#tpu.dimension_semantics<parallel>], iteration_bounds = array<i64: 1>, scalar_prefetch = 0 : i64, scratch_operands = 0 : i64, tpu.core_type = #tpu.core_type<tc>, window_params = [{transform_indices = @transform_0, window_bounds = array<i64: 16, 1024>}, {pipeline_mode = #tpu.pipeline_mode<synchronous>, transform_indices = @transform_1, window_bounds = array<i64: 1024, 1024>}, {pipeline_mode = #tpu.pipeline_mode<synchronous>, transform_indices = @transform_2, window_bounds = array<i64: 1, 1024>}, {pipeline_mode = #tpu.pipeline_mode<synchronous>, transform_indices = @transform_3, window_bounds = array<i64: 1024, 512>}, {pipeline_mode = #tpu.pipeline_mode<synchronous>, transform_indices = @transform_4, window_bounds = array<i64: 1, 512>}, {pipeline_mode = #tpu.pipeline_mode<synchronous>, transform_indices = @transform_5, window_bounds = array<i64: 512, 128>}, {pipeline_mode = #tpu.pipeline_mode<synchronous>, transform_indices = @transform_6, window_bounds = array<i64: 1, 128>}, {transform_indices = @transform_7, window_bounds = array<i64: 16, 128>}]} {
    %c0 = arith.constant 0 : index
    %c0_0 = arith.constant 0 : index
    %0 = vector.load %arg1[%c0, %c0_0] : memref<16x1024xf32, #tpu.memory_space<vmem>>, vector<16x1024xf32>
    %1 = arith.truncf %0 : vector<16x1024xf32> to vector<16x1024xbf16>
    %c0_1 = arith.constant 0 : index
    %c0_2 = arith.constant 0 : index
    %2 = vector.load %arg2[%c0_1, %c0_2] : memref<1024x1024xbf16, #tpu.memory_space<vmem>>, vector<1024x1024xbf16>
    %cst = arith.constant dense<0.000000e+00> : vector<16x1024xf32>
    %3 = tpu.matmul %1, %2, %cst {dimension_numbers = #tpu.dot_dimension_numbers<[1], [0], [0], [1], [0, 0, 1, 1], [], []>} : vector<16x1024xbf16>, vector<1024x1024xbf16>, vector<16x1024xf32> -> vector<16x1024xf32>
    %c0_3 = arith.constant 0 : index
    %c0_4 = arith.constant 0 : index
    %4 = vector.load %arg3[%c0_3, %c0_4] : memref<1x1024xf32, #tpu.memory_space<vmem>>, vector<1x1024xf32>
    %5 = vector.broadcast %4 : vector<1x1024xf32> to vector<16x1024xf32>
    %6 = arith.addf %3, %5 : vector<16x1024xf32>
    %cst_5 = arith.constant 0.000000e+00 : f32
    %7 = vector.broadcast %cst_5 : f32 to vector<16x1024xf32>
    %8 = arith.maximumf %6, %7 : vector<16x1024xf32>
    %9 = arith.truncf %8 : vector<16x1024xf32> to vector<16x1024xbf16>
    %c0_6 = arith.constant 0 : index
    %c0_7 = arith.constant 0 : index
    %10 = vector.load %arg4[%c0_6, %c0_7] : memref<1024x512xbf16, #tpu.memory_space<vmem>>, vector<1024x512xbf16>
    %cst_8 = arith.constant dense<0.000000e+00> : vector<16x512xf32>
    %11 = tpu.matmul %9, %10, %cst_8 {dimension_numbers = #tpu.dot_dimension_numbers<[1], [0], [0], [1], [0, 0, 1, 1], [], []>} : vector<16x1024xbf16>, vector<1024x512xbf16>, vector<16x512xf32> -> vector<16x512xf32>
    %c0_9 = arith.constant 0 : index
    %c0_10 = arith.constant 0 : index
    %12 = vector.load %arg5[%c0_9, %c0_10] : memref<1x512xf32, #tpu.memory_space<vmem>>, vector<1x512xf32>
    %13 = vector.broadcast %12 : vector<1x512xf32> to vector<16x512xf32>
    %14 = arith.addf %11, %13 : vector<16x512xf32>
    %cst_11 = arith.constant 0.000000e+00 : f32
    %15 = vector.broadcast %cst_11 : f32 to vector<16x512xf32>
    %16 = arith.maximumf %14, %15 : vector<16x512xf32>
    %17 = arith.truncf %16 : vector<16x512xf32> to vector<16x512xbf16>
    %c0_12 = arith.constant 0 : index
    %c0_13 = arith.constant 0 : index
    %18 = vector.load %arg6[%c0_12, %c0_13] : memref<512x128xbf16, #tpu.memory_space<vmem>>, vector<512x128xbf16>
    %cst_14 = arith.constant dense<0.000000e+00> : vector<16x128xf32>
    %19 = tpu.matmul %17, %18, %cst_14 {dimension_numbers = #tpu.dot_dimension_numbers<[1], [0], [0], [1], [0, 0, 1, 1], [], []>} : vector<16x512xbf16>, vector<512x128xbf16>, vector<16x128xf32> -> vector<16x128xf32>
    %c0_15 = arith.constant 0 : index
    %c0_16 = arith.constant 0 : index
    %20 = vector.load %arg7[%c0_15, %c0_16] : memref<1x128xf32, #tpu.memory_space<vmem>>, vector<1x128xf32>
    %21 = vector.broadcast %20 : vector<1x128xf32> to vector<16x128xf32>
    %22 = arith.addf %19, %21 : vector<16x128xf32>
    %23 = math.tanh %22 : vector<16x128xf32>
    %24 = arith.truncf %23 : vector<16x128xf32> to vector<16x128xbf16>
    %c0_17 = arith.constant 0 : index
    %c0_18 = arith.constant 0 : index
    %25 = vector.load %arg8[%c0_17, %c0_18] : memref<16x128xbf16, #tpu.memory_space<vmem>>, vector<16x128xbf16>
    tpu.vector_store %arg8[%c0_17, %c0_18], %24 {strides = array<i32>} : memref<16x128xbf16, #tpu.memory_space<vmem>>, vector<16x128xbf16>,
    return
  }
  func.func @transform_0(%arg0: i32) -> (i32, i32) {
    %c0_i32 = arith.constant 0 : i32
    %c0_i32_0 = arith.constant 0 : i32
    return %arg0, %c0_i32 : i32, i32
  }
  func.func @transform_1(%arg0: i32) -> (i32, i32) {
    %c0_i32 = arith.constant 0 : i32
    %c0_i32_0 = arith.constant 0 : i32
    %c0_i32_1 = arith.constant 0 : i32
    return %c0_i32, %c0_i32_0 : i32, i32
  }
  func.func @transform_2(%arg0: i32) -> (i32, i32) {
    %c0_i32 = arith.constant 0 : i32
    %c0_i32_0 = arith.constant 0 : i32
    %c0_i32_1 = arith.constant 0 : i32
    return %c0_i32, %c0_i32_0 : i32, i32
  }
  func.func @transform_3(%arg0: i32) -> (i32, i32) {
    %c0_i32 = arith.constant 0 : i32
    %c0_i32_0 = arith.constant 0 : i32
    %c0_i32_1 = arith.constant 0 : i32
    return %c0_i32, %c0_i32_0 : i32, i32
  }
  func.func @transform_4(%arg0: i32) -> (i32, i32) {
    %c0_i32 = arith.constant 0 : i32
    %c0_i32_0 = arith.constant 0 : i32
    %c0_i32_1 = arith.constant 0 : i32
    return %c0_i32, %c0_i32_0 : i32, i32
  }
  func.func @transform_5(%arg0: i32) -> (i32, i32) {
    %c0_i32 = arith.constant 0 : i32
    %c0_i32_0 = arith.constant 0 : i32
    %c0_i32_1 = arith.constant 0 : i32
    return %c0_i32, %c0_i32_0 : i32, i32
  }
  func.func @transform_6(%arg0: i32) -> (i32, i32) {
    %c0_i32 = arith.constant 0 : i32
    %c0_i32_0 = arith.constant 0 : i32
    %c0_i32_1 = arith.constant 0 : i32
    return %c0_i32, %c0_i32_0 : i32, i32
  }
  func.func @transform_7(%arg0: i32) -> (i32, i32) {
    %c0_i32 = arith.constant 0 : i32
    %c0_i32_0 = arith.constant 0 : i32
    return %arg0, %c0_i32 : i32, i32
  }
}

</mosaic_0001>

<bundles_post_ra>
// kernel: tpu_custom_call.1
= control target key start
LH: loop header
LB: loop body
LE: loop exit
PB: predicated region body
PF: predicated region fallthrough
CT: control target
= control target key end

     0   :  { %12 = vsyncpa [#allocation3], 0  ;;  %s8000_s0 = inlined_call_operand.hbm [shape: f32[16,1024], index: 0, kind: input, shape index: {}]   ;;  %s8001_s1 = inlined_call_operand.hbm [shape: bf16[1024,1024], index: 1, kind: input, shape index: {}]   ;;  %s8002_s2 = inlined_call_operand.hbm [shape: f32[1,1024], index: 2, kind: input, shape index: {}]   ;;  %s8003_s3 = inlined_call_operand.hbm [shape: bf16[1024,512], index: 3, kind: input, shape index: {}]   ;;  %s8004_s4 = inlined_call_operand.hbm [shape: f32[1,512], index: 4, kind: input, shape index: {}]   ;;  %s8005_s5 = inlined_call_operand.hbm [shape: bf16[512,128], index: 5, kind: input, shape index: {}]   ;;  %s8006_s6 = inlined_call_operand.hbm [shape: f32[1,128], index: 6, kind: input, shape index: {}]   ;;  %s8007_s7 = inlined_call_operand.hbm [shape: bf16[16,128], index: 7, kind: output, shape index: {}]  }
   0x1   :  { %13 = vsyncpa [#allocation6], 0 }
   0x2   :  { %14 = vsyncpa [#allocation9], 0 }
   0x3   :  { %15 = vsyncpa [#allocation12], 0 }
   0x4   :  { %16 = vsyncpa [#allocation4], 0  ;;  %s7718_s24 = smov [#allocation5]  }
   0x5   :  { %s34_s25 = sshll.u32 %s7718_s24, 4  ;;  %s35_s25 = int_to_ptr.vmem [resolvable:$true] %s34_s25 }
   0x6   :  { %s7556_s26 = scalar_lea.vmem %s35_s25, 65536  ;;  %p7561_p1 = scmp.lt.s32.totalorder %s35_s25, %s35_s25 }
   0x7   :  { %p7557_p0 = scmp.ne.s32.totalorder %s35_s25, %s7556_s26  ;;  %p7562_p2 = scmp.lt.s32.totalorder %s7556_s26, %s7556_s26 }
   0x9   :  { %p7563_p3 = por %p7562_p2, %p7561_p1 }
   0xb   :  { %p7564_p4 = pnand %p7563_p3, %p7557_p0 }
   0xd   :  { %7567 = shalt.err (!%p7564_p4)
}
   0xe   :  { %s7719_s27 = smov 512   ;;  %s7720_s28 = smov 32  }
   0xf   :  { %40 = dma.hbm_to_vmem [thread:$0]  %s8001_s1, 65536, %s35_s25, [#allocation6], %s7719_s27, %s7719_s27, %s7720_s28  }
  0x10   :  { %s7721_s8 = smov [#allocation8]  }
  0x11   :  { %s56_s9 = sshll.u32 %s7721_s8, 4  ;;  %s57_s9 = int_to_ptr.vmem [resolvable:$true] %s56_s9 }
  0x12   :  { %s7576_s10 = scalar_lea.vmem %s57_s9, 32768  ;;  %p7581_p6 = scmp.lt.s32.totalorder %s57_s9, %s57_s9 }
  0x13   :  { %p7577_p5 = scmp.ne.s32.totalorder %s57_s9, %s7576_s10  ;;  %p7582_p7 = scmp.lt.s32.totalorder %s7576_s10, %s7576_s10 }
  0x15   :  { %p7583_p8 = por %p7582_p7, %p7581_p6 }
  0x17   :  { %p7584_p9 = pnand %p7583_p8, %p7577_p5 }
  0x19   :  { %7587 = shalt.err (!%p7584_p9)
}
  0x1a   :  { %s7722_s11 = smov 256   ;;  %s7723_s12 = smov 16  }
  0x1b   :  { %62 = dma.hbm_to_vmem [thread:$0]  %s8003_s3, 32768, %s57_s9, [#allocation9], %s7722_s11, %s7722_s11, %s7723_s12  }
  0x1c   :  { %s7724_s15 = smov [#allocation11]  }
  0x1d   :  { %s78_s16 = sshll.u32 %s7724_s15, 4  ;;  %s79_s16 = int_to_ptr.vmem [resolvable:$true] %s78_s16 }
  0x1e   :  { %s7596_s1 = scalar_lea.vmem %s79_s16, 4096  ;;  %p7601_p11 = scmp.lt.s32.totalorder %s79_s16, %s79_s16 }
  0x1f   :  { %p7597_p10 = scmp.ne.s32.totalorder %s79_s16, %s7596_s1  ;;  %p7602_p12 = scmp.lt.s32.totalorder %s7596_s1, %s7596_s1 }
  0x21   :  { %p7603_p13 = por %p7602_p12, %p7601_p11 }
  0x23   :  { %p7604_p0 = pnand %p7603_p13, %p7597_p10 }
  0x25   :  { %7607 = shalt.err (!%p7604_p0)
}
  0x26   :  { %s7725_s17 = smov 64   ;;  %s7726_s18 = smov 4  }
  0x27   :  { %84 = dma.hbm_to_vmem [thread:$0]  %s8005_s5, 4096, %s79_s16, [#allocation12], %s7725_s17, %s7725_s17, %s7726_s18  }
  0x28   :  { %s7727_s3 = smov [#allocation2]  }
  0x29   :  { %s22_s21 = sshll.u32 %s7727_s3, 4  ;;  %s23_s21 = int_to_ptr.vmem [resolvable:$true] %s22_s21 }
  0x2a   :  { %s7616_s22 = scalar_lea.vmem %s23_s21, 2048  ;;  %p7621_p2 = scmp.lt.s32.totalorder %s23_s21, %s23_s21 }
  0x2b   :  { %p7617_p1 = scmp.ne.s32.totalorder %s23_s21, %s7616_s22  ;;  %p7622_p3 = scmp.lt.s32.totalorder %s7616_s22, %s7616_s22 }
  0x2d   :  { %p7623_p4 = por %p7622_p3, %p7621_p2 }
  0x2f   :  { %p7624_p5 = pnand %p7623_p4, %p7617_p1 }
  0x31   :  { %7627 = shalt.err (!%p7624_p5)
}
  0x32   :  { %s7728_s23 = smov 1024   ;;  %s7729_s26 = smov [#allocation7]  }
  0x33   :  { %28 = dma.hbm_to_vmem [thread:$0]  %s8000_s0, 2048, %s23_s21, [#allocation3], %s7728_s23, %s7728_s23, %s7725_s17  }
  0x34   :  { %s47_s27 = sshll.u32 %s7729_s26, 4  ;;  %s7730_s5 = smov [#allocation10]   ;;  %s48_s27 = int_to_ptr.vmem [resolvable:$true] %s47_s27 }
  0x35   :  { %s69_s28 = sshll.u32 %s7730_s5, 4  ;;  %s7636_s29 = scalar_lea.vmem %s48_s27, 128  ;;  %s70_s28 = int_to_ptr.vmem [resolvable:$true] %s69_s28 }
  0x36   :  { %p7637_p6 = scmp.ne.s32.totalorder %s48_s27, %s7636_s29  ;;  %p7641_p7 = scmp.lt.s32.totalorder %s48_s27, %s48_s27 }
  0x37   :  { %p7642_p8 = scmp.lt.s32.totalorder %s7636_s29, %s7636_s29 }
  0x39   :  { %p7643_p9 = por %p7642_p8, %p7641_p7 }
  0x3b   :  { %p7644_p10 = pnand %p7643_p9, %p7637_p6 }
  0x3d   :  { %7647 = shalt.err (!%p7644_p10)
}
  0x3e   :  { %50 = dma.hbm_to_vmem [thread:$0]  %s8002_s2, 128, %s48_s27, [#allocation6]  }
  0x3f   :  { %s7656_s9 = scalar_lea.vmem %s70_s28, 64  ;;  %p7661_p12 = scmp.lt.s32.totalorder %s70_s28, %s70_s28 }
  0x40   :  { %p7657_p11 = scmp.ne.s32.totalorder %s70_s28, %s7656_s9  ;;  %p7662_p13 = scmp.lt.s32.totalorder %s7656_s9, %s7656_s9 }
  0x42   :  { %p7663_p0 = por %p7662_p13, %p7661_p12 }
  0x44   :  { %p7664_p1 = pnand %p7663_p0, %p7657_p11 }
  0x46   :  { %7667 = shalt.err (!%p7664_p1)
}
  0x47   :  { %72 = dma.hbm_to_vmem [thread:$0]  %s8004_s4, 64, %s70_s28, [#allocation9]  }
  0x48   :  { %s7731_s11 = smov [#allocation13]  }
  0x49   :  { %s91_s12 = sshll.u32 %s7731_s11, 4  ;;  %s92_s12 = int_to_ptr.vmem [resolvable:$true] %s91_s12 }
  0x4a   :  { %s7676_s13 = scalar_lea.vmem %s92_s12, 16  ;;  %s7680_s14 = scalar_lea.vmem %s92_s12, 32 }
  0x4b   :  { %p7677_p2 = scmp.ne.s32.totalorder %s92_s12, %s7676_s13  ;;  %p7681_p3 = scmp.lt.s32.totalorder %s92_s12, %s92_s12 }
  0x4c   :  { %p7682_p4 = scmp.lt.s32.totalorder %s7680_s14, %s7676_s13 }
  0x4e   :  { %p7683_p5 = por %p7682_p4, %p7681_p3 }
  0x50   :  { %p7684_p6 = pnand %p7683_p5, %p7677_p2 }
  0x52   :  { %7687 = shalt.err (!%p7684_p6)
}
  0x53   :  { %94 = dma.hbm_to_vmem [thread:$0]  %s8006_s6, 16, %s92_s12, [#allocation12]  }
  0x54   :  { %7708 = dma.done.wait [#allocation3], 2048  }
  0x55   :  { %7709 = vsyncadd [#allocation3], 4294965248 }
  0x56   :  { %7710 = dma.done.wait [#allocation6], 65664  }
  0x57   :  { %7711 = vsyncadd [#allocation6], 4294901632 }
  0x58   :  { %7712 = dma.done.wait [#allocation9], 32832  }
  0x59   :  { %7713 = vsyncadd [#allocation9], 4294934464 }
  0x5a   :  { %7714 = dma.done.wait [#allocation12], 4112  }
  0x5b   :  { %7715 = vsyncadd [#allocation12], 4294963184  ;;  %v197_v0 = vld [vmem:[#allocation5 + $0x1c0] sm:$0xff]  ;;  %v118_v54 = vld [vmem:[#allocation2 + $0x8] sm:$0xff]  ;;  %s7732_s4 = smov [#allocation14]  }
  0x5c   :  { %v201_v1 = vld [vmem:[#allocation5 + $0x1e0] sm:$0xff]  ;;  %v126_v55 = vld [vmem:[#allocation2 + $0x48] sm:$0xff]  ;;  %v120_v59 = vld [vmem:[#allocation2 + $0x18] sm:$0xff]  ;;  %s6243_s6 = sshll.u32 %s7732_s4, 4  ;;  %s6244_s6 = int_to_ptr.vmem [resolvable:$true] %s6243_s6 }
  0x5d   :  { %v325_v2 = vld [vmem:[#allocation5 + $0x5c0] sm:$0xff]  ;;  %v6315_v3 = vcombine.high %v197_v0, %v201_v1  ;;  %v6314_v5 = vcombine.low %v197_v0, %v201_v1  ;;  %v7798_v58 = vpack.c.bf16 %v126_v55, %v118_v54  ;;  %v128_v60 = vld [vmem:[#allocation2 + $0x58] sm:$0xff]  ;;  %s7688_s16 = scalar_lea.vmem %s6244_s6, 128  ;;  %p7693_p8 = scmp.lt.s32.totalorder %s6244_s6, %s6244_s6 }
  0x5e   :  { %v329_v4 = vld [vmem:[#allocation5 + $0x5e0] sm:$0xff]  ;;  %v7800_v63 = vpack.c.bf16 %v128_v60, %v120_v59  ;;  %p7689_p7 = scmp.ne.s32.totalorder %s6244_s6, %s7688_s16  ;;  %p7694_p9 = scmp.lt.s32.totalorder %s7688_s16, %s7688_s16 }
  0x5f   :  { %v189_v6 = vld [vmem:[#allocation5 + $0x180] sm:$0xff]  ;;  %v6443_v8 = vcombine.high %v325_v2, %v329_v4  ;;  %v6442_v9 = vcombine.low %v325_v2, %v329_v4  ;;  %3255 = vmatprep.subr.bf16.mxu0 %v6315_v3  ;;  %3287 = vmatprep.mubr.bf16.mxu0 %v7798_v58 }
  0x60   :  { %v193_v7 = vld [vmem:[#allocation5 + $0x1a0] sm:$0xff]  ;;  %3256 = vmatpush1.bf16.msra.mxu0 %v6314_v5  ;;  %3330 = vmatprep.mubr.bf16.mxu1 %v7800_v63  ;;  %p7695_p10 = por %p7694_p9, %p7693_p8 }
  0x61   :  { %v6307_v10 = vcombine.high %v189_v6, %v193_v7  ;;  %v317_v11 = vld [vmem:[#allocation5 + $0x580] sm:$0xff]  ;;  %3298 = vmatprep.subr.bf16.mxu1 %v6443_v8  ;;  %v6306_v18 = vcombine.low %v189_v6, %v193_v7 }
  0x62   :  { %v321_v12 = vld [vmem:[#allocation5 + $0x5a0] sm:$0xff]  ;;  %3299 = vmatpush1.bf16.msra.mxu1 %v6442_v9  ;;  %p7696_p11 = pnand %p7695_p10, %p7689_p7 }
  0x63   :  { %v181_v13 = vld [vmem:[#allocation5 + $0x140] sm:$0xff]  ;;  %v6435_v14 = vcombine.high %v317_v11, %v321_v12  ;;  %3257 = vmatprep.subr.bf16.mxu0 %v6307_v10  ;;  %v6434_v19 = vcombine.low %v317_v11, %v321_v12 }
  0x64   :  { %v185_v15 = vld [vmem:[#allocation5 + $0x160] sm:$0xff]  ;;  %3258 = vmatpush1.bf16.msra.mxu0 %v6306_v18 }
  0x65   :  { %v309_v16 = vld [vmem:[#allocation5 + $0x540] sm:$0xff]  ;;  %v6299_v20 = vcombine.high %v181_v13, %v185_v15  ;;  %3300 = vmatprep.subr.bf16.mxu1 %v6435_v14  ;;  %v6298_v26 = vcombine.low %v181_v13, %v185_v15 }
  0x66   :  { %v313_v17 = vld [vmem:[#allocation5 + $0x560] sm:$0xff]  ;;  %3301 = vmatpush1.bf16.msra.mxu1 %v6434_v19 }
  0x67   :  { %v6427_v21 = vcombine.high %v309_v16, %v313_v17  ;;  %v173_v22 = vld [vmem:[#allocation5 + $0x100] sm:$0xff]  ;;  %3259 = vmatprep.subr.bf16.mxu0 %v6299_v20  ;;  %v6426_v27 = vcombine.low %v309_v16, %v313_v17 }
  0x68   :  { %v177_v23 = vld [vmem:[#allocation5 + $0x120] sm:$0xff]  ;;  %3260 = vmatpush1.bf16.msra.mxu0 %v6298_v26 }
  0x69   :  { %v301_v24 = vld [vmem:[#allocation5 + $0x500] sm:$0xff]  ;;  %v6291_v28 = vcombine.high %v173_v22, %v177_v23  ;;  %3302 = vmatprep.subr.bf16.mxu1 %v6427_v21  ;;  %v6290_v34 = vcombine.low %v173_v22, %v177_v23 }
  0x6a   :  { %v305_v25 = vld [vmem:[#allocation5 + $0x520] sm:$0xff]  ;;  %3303 = vmatpush1.bf16.msra.mxu1 %v6426_v27 }
  0x6b   :  { %v6419_v29 = vcombine.high %v301_v24, %v305_v25  ;;  %v165_v30 = vld [vmem:[#allocation5 + $0xc0] sm:$0xff]  ;;  %3261 = vmatprep.subr.bf16.mxu0 %v6291_v28  ;;  %v6418_v35 = vcombine.low %v301_v24, %v305_v25 }
  0x6c   :  { %v169_v31 = vld [vmem:[#allocation5 + $0xe0] sm:$0xff]  ;;  %3262 = vmatpush1.bf16.msra.mxu0 %v6290_v34 }
  0x6d   :  { %v293_v32 = vld [vmem:[#allocation5 + $0x4c0] sm:$0xff]  ;;  %v6283_v36 = vcombine.high %v165_v30, %v169_v31  ;;  %3304 = vmatprep.subr.bf16.mxu1 %v6419_v29  ;;  %v6282_v42 = vcombine.low %v165_v30, %v169_v31 }
  0x6e   :  { %v297_v33 = vld [vmem:[#allocation5 + $0x4e0] sm:$0xff]  ;;  %3305 = vmatpush1.bf16.msra.mxu1 %v6418_v35 }
  0x6f   :  { %v6411_v37 = vcombine.high %v293_v32, %v297_v33  ;;  %v157_v38 = vld [vmem:[#allocation5 + $0x80] sm:$0xff]  ;;  %3263 = vmatprep.subr.bf16.mxu0 %v6283_v36  ;;  %v6410_v43 = vcombine.low %v293_v32, %v297_v33 }
  0x70   :  { %v161_v39 = vld [vmem:[#allocation5 + $0xa0] sm:$0xff]  ;;  %3264 = vmatpush1.bf16.msra.mxu0 %v6282_v42 }
  0x71   :  { %v285_v40 = vld [vmem:[#allocation5 + $0x480] sm:$0xff]  ;;  %v6275_v44 = vcombine.high %v157_v38, %v161_v39  ;;  %3306 = vmatprep.subr.bf16.mxu1 %v6411_v37  ;;  %v6274_v50 = vcombine.low %v157_v38, %v161_v39 }
  0x72   :  { %v289_v41 = vld [vmem:[#allocation5 + $0x4a0] sm:$0xff]  ;;  %3307 = vmatpush1.bf16.msra.mxu1 %v6410_v43 }
  0x73   :  { %v6403_v45 = vcombine.high %v285_v40, %v289_v41  ;;  %v149_v46 = vld [vmem:[#allocation5 + $0x40] sm:$0xff]  ;;  %3265 = vmatprep.subr.bf16.mxu0 %v6275_v44  ;;  %v6402_v51 = vcombine.low %v285_v40, %v289_v41 }
  0x74   :  { %v153_v47 = vld [vmem:[#allocation5 + $0x60] sm:$0xff]  ;;  %3266 = vmatpush1.bf16.msra.mxu0 %v6274_v50 }
  0x75   :  { %v277_v48 = vld [vmem:[#allocation5 + $0x440] sm:$0xff]  ;;  %v6267_v52 = vcombine.high %v149_v46, %v153_v47  ;;  %3308 = vmatprep.subr.bf16.mxu1 %v6403_v45  ;;  %v6266_v0 = vcombine.low %v149_v46, %v153_v47 }
  0x76   :  { %v281_v49 = vld [vmem:[#allocation5 + $0x460] sm:$0xff]  ;;  %3309 = vmatpush1.bf16.msra.mxu1 %v6402_v51 }
  0x77   :  { %v141_v53 = vld [vmem:[#allocation5] sm:$0xff]  ;;  %v6395_v56 = vcombine.high %v277_v48, %v281_v49  ;;  %3267 = vmatprep.subr.bf16.mxu0 %v6267_v52  ;;  %v6394_v1 = vcombine.low %v277_v48, %v281_v49 }
  0x78   :  { %v145_v57 = vld [vmem:[#allocation5 + $0x20] sm:$0xff]  ;;  %3268 = vmatpush1.bf16.msra.mxu0 %v6266_v0 }
  0x79   :  { %v269_v61 = vld [vmem:[#allocation5 + $0x400] sm:$0xff]  ;;  %v6259_v2 = vcombine.high %v141_v53, %v145_v57  ;;  %3310 = vmatprep.subr.bf16.mxu1 %v6395_v56  ;;  %v6258_v8 = vcombine.low %v141_v53, %v145_v57 }
  0x7a   :  { %v273_v62 = vld [vmem:[#allocation5 + $0x420] sm:$0xff]  ;;  %3311 = vmatpush1.bf16.msra.mxu1 %v6394_v1 }
  0x7b   :  { %v6387_v3 = vcombine.high %v269_v61, %v273_v62  ;;  %v261_v4 = vld [vmem:[#allocation5 + $0x3c0] sm:$0xff]  ;;  %3269 = vmatprep.subr.bf16.mxu0 %v6259_v2  ;;  %v6386_v9 = vcombine.low %v269_v61, %v273_v62 }
  0x7c   :  { %v265_v5 = vld [vmem:[#allocation5 + $0x3e0] sm:$0xff]  ;;  %3270 = vmatpush1.bf16.msra.mxu0 %v6258_v8 }
  0x7d   :  { %v389_v6 = vld [vmem:[#allocation5 + $0x7c0] sm:$0xff]  ;;  %v6379_v10 = vcombine.high %v261_v4, %v265_v5  ;;  %3312 = vmatprep.subr.bf16.mxu1 %v6387_v3  ;;  %v6378_v16 = vcombine.low %v261_v4, %v265_v5 }
  0x7e   :  { %v393_v7 = vld [vmem:[#allocation5 + $0x7e0] sm:$0xff]  ;;  %3313 = vmatpush1.bf16.msra.mxu1 %v6386_v9 }
  0x7f   :  { %v6507_v11 = vcombine.high %v389_v6, %v393_v7  ;;  %v253_v12 = vld [vmem:[#allocation5 + $0x380] sm:$0xff]  ;;  %3271 = vmatprep.subr.bf16.mxu0 %v6379_v10  ;;  %v6506_v17 = vcombine.low %v389_v6, %v393_v7 }
  0x80   :  { %v257_v13 = vld [vmem:[#allocation5 + $0x3a0] sm:$0xff]  ;;  %3272 = vmatpush2.bf16.msra.mxu0 %v6378_v16 }
  0x81   :  { %v381_v14 = vld [vmem:[#allocation5 + $0x780] sm:$0xff]  ;;  %v6371_v18 = vcombine.high %v253_v12, %v257_v13  ;;  %3314 = vmatprep.subr.bf16.mxu1 %v6507_v11  ;;  %v6370_v24 = vcombine.low %v253_v12, %v257_v13 }
  0x82   :  { %v385_v15 = vld [vmem:[#allocation5 + $0x7a0] sm:$0xff]  ;;  %3315 = vmatpush2.bf16.msra.mxu1 %v6506_v17 }
  0x83   :  { %v6499_v19 = vcombine.high %v381_v14, %v385_v15  ;;  %v245_v20 = vld [vmem:[#allocation5 + $0x340] sm:$0xff]  ;;  %3273 = vmatprep.subr.bf16.mxu0 %v6371_v18  ;;  %v6498_v25 = vcombine.low %v381_v14, %v385_v15  ;;  %v119_v14 = vld [vmem:[#allocation2 + $0x10] sm:$0xff] }
  0x84   :  { %v249_v21 = vld [vmem:[#allocation5 + $0x360] sm:$0xff]  ;;  %3274 = vmatpush2.bf16.msra.mxu0 %v6370_v24  ;;  %v127_v15 = vld [vmem:[#allocation2 + $0x50] sm:$0xff]  ;;  %v130_v24 = vld [vmem:[#allocation2 + $0x68] sm:$0xff] }
  0x85   :  { %v373_v22 = vld [vmem:[#allocation5 + $0x740] sm:$0xff]  ;;  %v6363_v26 = vcombine.high %v245_v20, %v249_v21  ;;  %3316 = vmatprep.subr.bf16.mxu1 %v6499_v19  ;;  %v6362_v32 = vcombine.low %v245_v20, %v249_v21 }
  0x86   :  { %v377_v23 = vld [vmem:[#allocation5 + $0x760] sm:$0xff]  ;;  %3317 = vmatpush2.bf16.msra.mxu1 %v6498_v25  ;;  %v7806_v25 = vpack.c.bf16 %v127_v15, %v119_v14 }
  0x87   :  { %v6491_v27 = vcombine.high %v373_v22, %v377_v23  ;;  %v237_v28 = vld [vmem:[#allocation5 + $0x300] sm:$0xff]  ;;  %3275 = vmatprep.subr.bf16.mxu0 %v6363_v26  ;;  %v6490_v33 = vcombine.low %v373_v22, %v377_v23  ;;  %v122_v23 = vld [vmem:[#allocation2 + $0x28] sm:$0xff] }
  0x88   :  { %v241_v29 = vld [vmem:[#allocation5 + $0x320] sm:$0xff]  ;;  %3276 = vmatpush2.bf16.msra.mxu0 %v6362_v32 }
  0x89   :  { %v365_v30 = vld [vmem:[#allocation5 + $0x700] sm:$0xff]  ;;  %v6355_v34 = vcombine.high %v237_v28, %v241_v29  ;;  %3318 = vmatprep.subr.bf16.mxu1 %v6491_v27  ;;  %v6354_v40 = vcombine.low %v237_v28, %v241_v29  ;;  %v124_v27 = vld [vmem:[#allocation2 + $0x38] sm:$0xff] }
  0x8a   :  { %v369_v31 = vld [vmem:[#allocation5 + $0x720] sm:$0xff]  ;;  %3319 = vmatpush2.bf16.msra.mxu1 %v6490_v33  ;;  %v132_v28 = vld [vmem:[#allocation2 + $0x78] sm:$0xff] }
  0x8b   :  { %v6483_v35 = vcombine.high %v365_v30, %v369_v31  ;;  %v229_v36 = vld [vmem:[#allocation5 + $0x2c0] sm:$0xff]  ;;  %3277 = vmatprep.subr.bf16.mxu0 %v6355_v34  ;;  %v6482_v41 = vcombine.low %v365_v30, %v369_v31  ;;  %v7808_v34 = vpack.c.bf16 %v130_v24, %v122_v23 }
  0x8c   :  { %v233_v37 = vld [vmem:[#allocation5 + $0x2e0] sm:$0xff]  ;;  %3278 = vmatpush2.bf16.msra.mxu0 %v6354_v40 }
  0x8d   :  { %v357_v38 = vld [vmem:[#allocation5 + $0x6c0] sm:$0xff]  ;;  %v6347_v42 = vcombine.high %v229_v36, %v233_v37  ;;  %3320 = vmatprep.subr.bf16.mxu1 %v6483_v35  ;;  %v6346_v48 = vcombine.low %v229_v36, %v233_v37  ;;  %v7811_v37 = vpack.c.bf16 %v132_v28, %v124_v27 }
  0x8e   :  { %v361_v39 = vld [vmem:[#allocation5 + $0x6e0] sm:$0xff]  ;;  %3321 = vmatpush2.bf16.msra.mxu1 %v6482_v41 }
  0x8f   :  { %v6475_v43 = vcombine.high %v357_v38, %v361_v39  ;;  %v221_v44 = vld [vmem:[#allocation5 + $0x280] sm:$0xff]  ;;  %3279 = vmatprep.subr.bf16.mxu0 %v6347_v42  ;;  %v6474_v49 = vcombine.low %v357_v38, %v361_v39 }
  0x90   :  { %v225_v45 = vld [vmem:[#allocation5 + $0x2a0] sm:$0xff]  ;;  %3280 = vmatpush2.bf16.msra.mxu0 %v6346_v48 }
  0x91   :  { %v349_v46 = vld [vmem:[#allocation5 + $0x680] sm:$0xff]  ;;  %v6339_v50 = vcombine.high %v221_v44, %v225_v45  ;;  %3322 = vmatprep.subr.bf16.mxu1 %v6475_v43  ;;  %v6338_v56 = vcombine.low %v221_v44, %v225_v45 }
  0x92   :  { %v353_v47 = vld [vmem:[#allocation5 + $0x6a0] sm:$0xff]  ;;  %3323 = vmatpush2.bf16.msra.mxu1 %v6474_v49 }
  0x93   :  { %v6467_v51 = vcombine.high %v349_v46, %v353_v47  ;;  %v213_v52 = vld [vmem:[#allocation5 + $0x240] sm:$0xff]  ;;  %3281 = vmatprep.subr.bf16.mxu0 %v6339_v50  ;;  %v6466_v57 = vcombine.low %v349_v46, %v353_v47 }
  0x94   :  { %v217_v53 = vld [vmem:[#allocation5 + $0x260] sm:$0xff]  ;;  %3282 = vmatpush2.bf16.msra.mxu0 %v6338_v56 }
  0x95   :  { %v341_v54 = vld [vmem:[#allocation5 + $0x640] sm:$0xff]  ;;  %v6331_v59 = vcombine.high %v213_v52, %v217_v53  ;;  %3324 = vmatprep.subr.bf16.mxu1 %v6467_v51  ;;  %v6330_v2 = vcombine.low %v213_v52, %v217_v53 }
  0x96   :  { %v345_v55 = vld [vmem:[#allocation5 + $0x660] sm:$0xff]  ;;  %3325 = vmatpush2.bf16.msra.mxu1 %v6466_v57 }
  0x97   :  { %v6459_v60 = vcombine.high %v341_v54, %v345_v55  ;;  %v205_v61 = vld [vmem:[#allocation5 + $0x200] sm:$0xff]  ;;  %3283 = vmatprep.subr.bf16.mxu0 %v6331_v59  ;;  %v6458_v3 = vcombine.low %v341_v54, %v345_v55 }
  0x98   :  { %v209_v62 = vld [vmem:[#allocation5 + $0x220] sm:$0xff]  ;;  %3284 = vmatpush2.bf16.msra.mxu0 %v6330_v2 }
  0x99   :  { %v333_v0 = vld [vmem:[#allocation5 + $0x600] sm:$0xff]  ;;  %v6323_v4 = vcombine.high %v205_v61, %v209_v62  ;;  %3326 = vmatprep.subr.bf16.mxu1 %v6459_v60  ;;  %v6322_v10 = vcombine.low %v205_v61, %v209_v62 }
  0x9a   :  { %v337_v1 = vld [vmem:[#allocation5 + $0x620] sm:$0xff]  ;;  %3327 = vmatpush2.bf16.msra.mxu1 %v6458_v3 }
  0x9b   :  { %v6451_v5 = vcombine.high %v333_v0, %v337_v1  ;;  %v453_v6 = vld [vmem:[#allocation5 + $0x9c0] sm:$0xff]  ;;  %3285 = vmatprep.subr.bf16.mxu0 %v6323_v4  ;;  %v6450_v13 = vcombine.low %v333_v0, %v337_v1 }
  0x9c   :  { %v457_v7 = vld [vmem:[#allocation5 + $0x9e0] sm:$0xff]  ;;  %3286 = vmatpush2.bf16.msra.mxu0 %v6322_v10 }
  0x9d   :  { %v581_v8 = vld [vmem:[#allocation5 + $0xdc0] sm:$0xff]  ;;  %v6571_v16 = vcombine.high %v453_v6, %v457_v7  ;;  %3328 = vmatprep.subr.bf16.mxu1 %v6451_v5  ;;  %v6570_v26 = vcombine.low %v453_v6, %v457_v7 }
  0x9e   :  { %v585_v9 = vld [vmem:[#allocation5 + $0xde0] sm:$0xff]  ;;  %3329 = vmatpush2.bf16.msra.mxu1 %v6450_v13 }
  0x9f   :  { %v117_v11 = vld [vmem:[#allocation2] sm:$0xff]  ;;  %v6699_v17 = vcombine.high %v581_v8, %v585_v9  ;;  %3341 = vmatprep.subr.bf16.mxu0 %v6571_v16  ;;  %v6698_v29 = vcombine.low %v581_v8, %v585_v9 }
  0xa0   :  { %v125_v12 = vld [vmem:[#allocation2 + $0x40] sm:$0xff] }
  0xa1   :  { %v445_v18 = vld [vmem:[#allocation5 + $0x980] sm:$0xff]  ;;  %v7804_v21 = vpack.c.bf16 %v125_v12, %v117_v11  ;;  %3384 = vmatprep.subr.bf16.mxu1 %v6699_v17  ;;  %3331 = vmatmul.mubr.bf16.vlgmr.msra.gmra.mxu1 %v7806_v25 }
  0xa2   :  { %v449_v19 = vld [vmem:[#allocation5 + $0x9a0] sm:$0xff]  ;;  %3385 = vmatpush1.bf16.msra.mxu1 %v6698_v29  ;;  %3416 = vmatprep.mubr.bf16.mxu1 %v7811_v37 }
  0xa3   :  { %v573_v20 = vld [vmem:[#allocation5 + $0xd80] sm:$0xff]  ;;  %v6563_v30 = vcombine.high %v445_v18, %v449_v19  ;;  %3288 = vmatmul.mubr.bf16.vlgmr.msra.gmra.mxu0 %v7804_v21  ;;  %v6562_v38 = vcombine.low %v445_v18, %v449_v19 }
  0xa4   :  { %v577_v22 = vld [vmem:[#allocation5 + $0xda0] sm:$0xff]  ;;  %3342 = vmatpush1.bf16.msra.mxu0 %v6570_v26  ;;  %3373 = vmatprep.mubr.bf16.mxu0 %v7808_v34 }
  0xa5   :  { %v6691_v31 = vcombine.high %v573_v20, %v577_v22  ;;  %v437_v32 = vld [vmem:[#allocation5 + $0x940] sm:$0xff]  ;;  %3343 = vmatprep.subr.bf16.mxu0 %v6563_v30  ;;  %v6690_v39 = vcombine.low %v573_v20, %v577_v22 }
  0xa6   :  { %v441_v33 = vld [vmem:[#allocation5 + $0x960] sm:$0xff] }
  0xa7   :  { %v565_v35 = vld [vmem:[#allocation5 + $0xd40] sm:$0xff]  ;;  %v6555_v40 = vcombine.high %v437_v32, %v441_v33  ;;  %3386 = vmatprep.subr.bf16.mxu1 %v6691_v31  ;;  %v6554_v46 = vcombine.low %v437_v32, %v441_v33 }
  0xa8   :  { %v569_v36 = vld [vmem:[#allocation5 + $0xd60] sm:$0xff]  ;;  %3344 = vmatpush1.bf16.msra.mxu0 %v6562_v38  ;;  %3387 = vmatpush1.bf16.msra.mxu1 %v6690_v39 }
  0xa9   :  { %v6683_v41 = vcombine.high %v565_v35, %v569_v36  ;;  %v429_v42 = vld [vmem:[#allocation5 + $0x900] sm:$0xff]  ;;  %3345 = vmatprep.subr.bf16.mxu0 %v6555_v40  ;;  %v6682_v47 = vcombine.low %v565_v35, %v569_v36 }
  0xaa   :  { %v433_v43 = vld [vmem:[#allocation5 + $0x920] sm:$0xff] }
  0xab   :  { %v557_v44 = vld [vmem:[#allocation5 + $0xd00] sm:$0xff]  ;;  %v6547_v48 = vcombine.high %v429_v42, %v433_v43  ;;  %3388 = vmatprep.subr.bf16.mxu1 %v6683_v41  ;;  %v6546_v54 = vcombine.low %v429_v42, %v433_v43 }
  0xac   :  { %v561_v45 = vld [vmem:[#allocation5 + $0xd20] sm:$0xff]  ;;  %3346 = vmatpush1.bf16.msra.mxu0 %v6554_v46  ;;  %3389 = vmatpush1.bf16.msra.mxu1 %v6682_v47 }
  0xad   :  { %v421_v49 = vld [vmem:[#allocation5 + $0x8c0] sm:$0xff]  ;;  %v6675_v52 = vcombine.high %v557_v44, %v561_v45  ;;  %3347 = vmatprep.subr.bf16.mxu0 %v6547_v48  ;;  %v6674_v55 = vcombine.low %v557_v44, %v561_v45 }
  0xae   :  { %v425_v50 = vld [vmem:[#allocation5 + $0x8e0] sm:$0xff] }
  0xaf   :  { %v549_v51 = vld [vmem:[#allocation5 + $0xcc0] sm:$0xff]  ;;  %v6539_v56 = vcombine.high %v421_v49, %v425_v50  ;;  %3390 = vmatprep.subr.bf16.mxu1 %v6675_v52  ;;  %v6538_v0 = vcombine.low %v421_v49, %v425_v50 }
  0xb0   :  { %v553_v53 = vld [vmem:[#allocation5 + $0xce0] sm:$0xff]  ;;  %3348 = vmatpush1.bf16.msra.mxu0 %v6546_v54  ;;  %3391 = vmatpush1.bf16.msra.mxu1 %v6674_v55 }
  0xb1   :  { %v413_v57 = vld [vmem:[#allocation5 + $0x880] sm:$0xff]  ;;  %v6667_v61 = vcombine.high %v549_v51, %v553_v53  ;;  %3349 = vmatprep.subr.bf16.mxu0 %v6539_v56  ;;  %v6666_v1 = vcombine.low %v549_v51, %v553_v53 }
  0xb2   :  { %v417_v59 = vld [vmem:[#allocation5 + $0x8a0] sm:$0xff] }
  0xb3   :  { %v541_v60 = vld [vmem:[#allocation5 + $0xc80] sm:$0xff]  ;;  %v6531_v2 = vcombine.high %v413_v57, %v417_v59  ;;  %3392 = vmatprep.subr.bf16.mxu1 %v6667_v61  ;;  %v6530_v8 = vcombine.low %v413_v57, %v417_v59 }
  0xb4   :  { %v545_v62 = vld [vmem:[#allocation5 + $0xca0] sm:$0xff]  ;;  %3350 = vmatpush1.bf16.msra.mxu0 %v6538_v0  ;;  %3393 = vmatpush1.bf16.msra.mxu1 %v6666_v1 }
  0xb5   :  { %v405_v3 = vld [vmem:[#allocation5 + $0x840] sm:$0xff]  ;;  %v6659_v6 = vcombine.high %v541_v60, %v545_v62  ;;  %3351 = vmatprep.subr.bf16.mxu0 %v6531_v2  ;;  %v6658_v9 = vcombine.low %v541_v60, %v545_v62 }
  0xb6   :  { %v409_v4 = vld [vmem:[#allocation5 + $0x860] sm:$0xff] }
  0xb7   :  { %v533_v5 = vld [vmem:[#allocation5 + $0xc40] sm:$0xff]  ;;  %v6523_v10 = vcombine.high %v405_v3, %v409_v4  ;;  %3394 = vmatprep.subr.bf16.mxu1 %v6659_v6  ;;  %v6522_v16 = vcombine.low %v405_v3, %v409_v4 }
  0xb8   :  { %v537_v7 = vld [vmem:[#allocation5 + $0xc60] sm:$0xff]  ;;  %3352 = vmatpush1.bf16.msra.mxu0 %v6530_v8  ;;  %3395 = vmatpush1.bf16.msra.mxu1 %v6658_v9 }
  0xb9   :  { %v397_v11 = vld [vmem:[#allocation5 + $0x800] sm:$0xff]  ;;  %v6651_v14 = vcombine.high %v533_v5, %v537_v7  ;;  %3353 = vmatprep.subr.bf16.mxu0 %v6523_v10  ;;  %v6650_v17 = vcombine.low %v533_v5, %v537_v7 }
  0xba   :  { %v401_v12 = vld [vmem:[#allocation5 + $0x820] sm:$0xff] }
  0xbb   :  { %v525_v13 = vld [vmem:[#allocation5 + $0xc00] sm:$0xff]  ;;  %v6515_v18 = vcombine.high %v397_v11, %v401_v12  ;;  %3396 = vmatprep.subr.bf16.mxu1 %v6651_v14  ;;  %v6514_v26 = vcombine.low %v397_v11, %v401_v12 }
  0xbc   :  { %v529_v15 = vld [vmem:[#allocation5 + $0xc20] sm:$0xff]  ;;  %3354 = vmatpush1.bf16.msra.mxu0 %v6522_v16  ;;  %3397 = vmatpush1.bf16.msra.mxu1 %v6650_v17 }
  0xbd   :  { %v517_v19 = vld [vmem:[#allocation5 + $0xbc0] sm:$0xff]  ;;  %v6643_v23 = vcombine.high %v525_v13, %v529_v15  ;;  %3355 = vmatprep.subr.bf16.mxu0 %v6515_v18  ;;  %v6642_v27 = vcombine.low %v525_v13, %v529_v15 }
  0xbe   :  { %v521_v20 = vld [vmem:[#allocation5 + $0xbe0] sm:$0xff] }
  0xbf   :  { %v645_v22 = vld [vmem:[#allocation5 + $0xfc0] sm:$0xff]  ;;  %v6635_v28 = vcombine.high %v517_v19, %v521_v20  ;;  %3398 = vmatprep.subr.bf16.mxu1 %v6643_v23  ;;  %v6634_v35 = vcombine.low %v517_v19, %v521_v20 }
  0xc0   :  { %v649_v24 = vld [vmem:[#allocation5 + $0xfe0] sm:$0xff]  ;;  %3356 = vmatpush1.bf16.msra.mxu0 %v6514_v26  ;;  %3399 = vmatpush1.bf16.msra.mxu1 %v6642_v27  ;;  %v198_v27 = vld [vmem:[#allocation5 + $0x1c8] sm:$0xff] }
  0xc1   :  { %v509_v29 = vld [vmem:[#allocation5 + $0xb80] sm:$0xff]  ;;  %v6763_v32 = vcombine.high %v645_v22, %v649_v24  ;;  %3357 = vmatprep.subr.bf16.mxu0 %v6635_v28  ;;  %v6762_v36 = vcombine.low %v645_v22, %v649_v24  ;;  %v202_v28 = vld [vmem:[#allocation5 + $0x1e8] sm:$0xff] }
  0xc2   :  { %v513_v30 = vld [vmem:[#allocation5 + $0xba0] sm:$0xff] }
  0xc3   :  { %v637_v31 = vld [vmem:[#allocation5 + $0xf80] sm:$0xff]  ;;  %v6627_v38 = vcombine.high %v509_v29, %v513_v30  ;;  %3400 = vmatprep.subr.bf16.mxu1 %v6763_v32  ;;  %v6626_v44 = vcombine.low %v509_v29, %v513_v30  ;;  %v326_v29 = vld [vmem:[#allocation5 + $0x5c8] sm:$0xff] }
  0xc4   :  { %v641_v33 = vld [vmem:[#allocation5 + $0xfa0] sm:$0xff]  ;;  %3358 = vmatpush2.bf16.msra.mxu0 %v6634_v35  ;;  %3401 = vmatpush2.bf16.msra.mxu1 %v6762_v36  ;;  %v123_v35 = vld [vmem:[#allocation2 + $0x30] sm:$0xff] }
  0xc5   :  { %v501_v39 = vld [vmem:[#allocation5 + $0xb40] sm:$0xff]  ;;  %v6755_v42 = vcombine.high %v637_v31, %v641_v33  ;;  %3359 = vmatprep.subr.bf16.mxu0 %v6627_v38  ;;  %v6754_v45 = vcombine.low %v637_v31, %v641_v33  ;;  %v330_v33 = vld [vmem:[#allocation5 + $0x5e8] sm:$0xff]  ;;  %v131_v36 = vld [vmem:[#allocation2 + $0x70] sm:$0xff] }
  0xc6   :  { %v505_v40 = vld [vmem:[#allocation5 + $0xb60] sm:$0xff] }
  0xc7   :  { %v629_v41 = vld [vmem:[#allocation5 + $0xf40] sm:$0xff]  ;;  %v6619_v46 = vcombine.high %v501_v39, %v505_v40  ;;  %3402 = vmatprep.subr.bf16.mxu1 %v6755_v42  ;;  %v6618_v52 = vcombine.low %v501_v39, %v505_v40  ;;  %v6317_v40 = vcombine.high %v198_v27, %v202_v28  ;;  %v194_v42 = vld [vmem:[#allocation5 + $0x1a8] sm:$0xff] }
  0xc8   :  { %v633_v43 = vld [vmem:[#allocation5 + $0xf60] sm:$0xff]  ;;  %3360 = vmatpush2.bf16.msra.mxu0 %v6626_v44  ;;  %3403 = vmatpush2.bf16.msra.mxu1 %v6754_v45  ;;  %v6445_v44 = vcombine.high %v326_v29, %v330_v33  ;;  %v322_v45 = vld [vmem:[#allocation5 + $0x5a8] sm:$0xff] }
  0xc9   :  { %v493_v47 = vld [vmem:[#allocation5 + $0xb00] sm:$0xff]  ;;  %v6747_v50 = vcombine.high %v629_v41, %v633_v43  ;;  %3361 = vmatprep.subr.bf16.mxu0 %v6619_v46  ;;  %v6746_v53 = vcombine.low %v629_v41, %v633_v43  ;;  %v190_v41 = vld [vmem:[#allocation5 + $0x188] sm:$0xff] }
  0xca   :  { %v497_v48 = vld [vmem:[#allocation5 + $0xb20] sm:$0xff]  ;;  %v318_v43 = vld [vmem:[#allocation5 + $0x588] sm:$0xff] }
  0xcb   :  { %v621_v49 = vld [vmem:[#allocation5 + $0xf00] sm:$0xff]  ;;  %v6611_v54 = vcombine.high %v493_v47, %v497_v48  ;;  %3404 = vmatprep.subr.bf16.mxu1 %v6747_v50  ;;  %v6610_v61 = vcombine.low %v493_v47, %v497_v48  ;;  %v7818_v47 = vpack.c.bf16 %v131_v36, %v123_v35  ;;  %v6316_v48 = vcombine.low %v198_v27, %v202_v28  ;;  %v282_v27 = vld [vmem:[#allocation5 + $0x468] sm:$0xff] }
  0xcc   :  { %v625_v51 = vld [vmem:[#allocation5 + $0xf20] sm:$0xff]  ;;  %3362 = vmatpush2.bf16.msra.mxu0 %v6618_v52  ;;  %3405 = vmatpush2.bf16.msra.mxu1 %v6746_v53  ;;  %v6309_v50 = vcombine.high %v190_v41, %v194_v42  ;;  %v186_v52 = vld [vmem:[#allocation5 + $0x168] sm:$0xff]  ;;  %v6437_v53 = vcombine.high %v318_v43, %v322_v45 }
  0xcd   :  { %v485_v55 = vld [vmem:[#allocation5 + $0xac0] sm:$0xff]  ;;  %v6739_v59 = vcombine.high %v621_v49, %v625_v51  ;;  %3363 = vmatprep.subr.bf16.mxu0 %v6611_v54  ;;  %v6738_v62 = vcombine.low %v621_v49, %v625_v51  ;;  %v6444_v49 = vcombine.low %v326_v29, %v330_v33  ;;  %v182_v51 = vld [vmem:[#allocation5 + $0x148] sm:$0xff] }
  0xce   :  { %v489_v56 = vld [vmem:[#allocation5 + $0xae0] sm:$0xff]  ;;  %v310_v54 = vld [vmem:[#allocation5 + $0x548] sm:$0xff] }
  0xcf   :  { %v613_v57 = vld [vmem:[#allocation5 + $0xec0] sm:$0xff]  ;;  %v6603_v0 = vcombine.high %v485_v55, %v489_v56  ;;  %3406 = vmatprep.subr.bf16.mxu1 %v6739_v59  ;;  %v6602_v6 = vcombine.low %v485_v55, %v489_v56  ;;  %v314_v55 = vld [vmem:[#allocation5 + $0x568] sm:$0xff]  ;;  %v6308_v56 = vcombine.low %v190_v41, %v194_v42  ;;  %v6301_v59 = vcombine.high %v182_v51, %v186_v52 }
  0xd0   :  { %v617_v60 = vld [vmem:[#allocation5 + $0xee0] sm:$0xff]  ;;  %3364 = vmatpush2.bf16.msra.mxu0 %v6610_v61  ;;  %3407 = vmatpush2.bf16.msra.mxu1 %v6738_v62  ;;  %v178_v61 = vld [vmem:[#allocation5 + $0x128] sm:$0xff] }
  0xd1   :  { %v477_v1 = vld [vmem:[#allocation5 + $0xa80] sm:$0xff]  ;;  %v6731_v4 = vcombine.high %v613_v57, %v617_v60  ;;  %3365 = vmatprep.subr.bf16.mxu0 %v6603_v0  ;;  %v6730_v7 = vcombine.low %v613_v57, %v617_v60  ;;  %v6436_v57 = vcombine.low %v318_v43, %v322_v45  ;;  %v174_v60 = vld [vmem:[#allocation5 + $0x108] sm:$0xff]  ;;  %v6429_v0 = vcombine.high %v310_v54, %v314_v55 }
  0xd2   :  { %v481_v2 = vld [vmem:[#allocation5 + $0xaa0] sm:$0xff]  ;;  %v302_v62 = vld [vmem:[#allocation5 + $0x508] sm:$0xff] }
  0xd3   :  { %v605_v3 = vld [vmem:[#allocation5 + $0xe80] sm:$0xff]  ;;  %v6595_v8 = vcombine.high %v477_v1, %v481_v2  ;;  %3408 = vmatprep.subr.bf16.mxu1 %v6731_v4  ;;  %v6594_v14 = vcombine.low %v477_v1, %v481_v2  ;;  %v306_v1 = vld [vmem:[#allocation5 + $0x528] sm:$0xff]  ;;  %v6300_v2 = vcombine.low %v182_v51, %v186_v52  ;;  %v6293_v4 = vcombine.high %v174_v60, %v178_v61 }
  0xd4   :  { %v609_v5 = vld [vmem:[#allocation5 + $0xea0] sm:$0xff]  ;;  %3366 = vmatpush2.bf16.msra.mxu0 %v6602_v6  ;;  %3409 = vmatpush2.bf16.msra.mxu1 %v6730_v7  ;;  %v170_v6 = vld [vmem:[#allocation5 + $0xe8] sm:$0xff] }
  0xd5   :  { %v469_v9 = vld [vmem:[#allocation5 + $0xa40] sm:$0xff]  ;;  %v6723_v12 = vcombine.high %v605_v3, %v609_v5  ;;  %3367 = vmatprep.subr.bf16.mxu0 %v6595_v8  ;;  %v6722_v15 = vcombine.low %v605_v3, %v609_v5  ;;  %v6428_v3 = vcombine.low %v310_v54, %v314_v55  ;;  %v166_v5 = vld [vmem:[#allocation5 + $0xc8] sm:$0xff]  ;;  %v6421_v8 = vcombine.high %v302_v62, %v306_v1 }
  0xd6   :  { %v473_v10 = vld [vmem:[#allocation5 + $0xa60] sm:$0xff]  ;;  %v294_v7 = vld [vmem:[#allocation5 + $0x4c8] sm:$0xff] }
  0xd7   :  { %v597_v11 = vld [vmem:[#allocation5 + $0xe40] sm:$0xff]  ;;  %v6587_v16 = vcombine.high %v469_v9, %v473_v10  ;;  %3410 = vmatprep.subr.bf16.mxu1 %v6723_v12  ;;  %v6586_v23 = vcombine.low %v469_v9, %v473_v10  ;;  %v298_v9 = vld [vmem:[#allocation5 + $0x4e8] sm:$0xff]  ;;  %v6292_v10 = vcombine.low %v174_v60, %v178_v61  ;;  %v6285_v12 = vcombine.high %v166_v5, %v170_v6 }
  0xd8   :  { %v601_v13 = vld [vmem:[#allocation5 + $0xe60] sm:$0xff]  ;;  %3368 = vmatpush2.bf16.msra.mxu0 %v6594_v14  ;;  %3411 = vmatpush2.bf16.msra.mxu1 %v6722_v15  ;;  %v162_v14 = vld [vmem:[#allocation5 + $0xa8] sm:$0xff] }
  0xd9   :  { %v461_v17 = vld [vmem:[#allocation5 + $0xa00] sm:$0xff]  ;;  %v6715_v20 = vcombine.high %v597_v11, %v601_v13  ;;  %3369 = vmatprep.subr.bf16.mxu0 %v6587_v16  ;;  %v6714_v24 = vcombine.low %v597_v11, %v601_v13  ;;  %v6420_v11 = vcombine.low %v302_v62, %v306_v1  ;;  %v158_v13 = vld [vmem:[#allocation5 + $0x88] sm:$0xff]  ;;  %v6413_v16 = vcombine.high %v294_v7, %v298_v9 }
  0xda   :  { %v465_v18 = vld [vmem:[#allocation5 + $0xa20] sm:$0xff]  ;;  %v286_v15 = vld [vmem:[#allocation5 + $0x488] sm:$0xff]  ;;  %v6276_v28 = vcombine.low %v158_v13, %v162_v14 }
  0xdb   :  { %v589_v19 = vld [vmem:[#allocation5 + $0xe00] sm:$0xff]  ;;  %v6579_v26 = vcombine.high %v461_v17, %v465_v18  ;;  %3412 = vmatprep.subr.bf16.mxu1 %v6715_v20  ;;  %v6578_v38 = vcombine.low %v461_v17, %v465_v18  ;;  %v290_v17 = vld [vmem:[#allocation5 + $0x4a8] sm:$0xff]  ;;  %v6284_v18 = vcombine.low %v166_v5, %v170_v6  ;;  %v6277_v20 = vcombine.high %v158_v13, %v162_v14 }
  0xdc   :  { %v593_v22 = vld [vmem:[#allocation5 + $0xe20] sm:$0xff]  ;;  %3370 = vmatpush2.bf16.msra.mxu0 %v6586_v23  ;;  %3413 = vmatpush2.bf16.msra.mxu1 %v6714_v24  ;;  %v154_v23 = vld [vmem:[#allocation5 + $0x68] sm:$0xff]  ;;  %v6404_v29 = vcombine.low %v286_v15, %v290_v17 }
  0xdd   :  { %v6707_v30 = vcombine.high %v589_v19, %v593_v22  ;;  %v121_v31 = vld [vmem:[#allocation2 + $0x20] sm:$0xff]  ;;  %3371 = vmatprep.subr.bf16.mxu0 %v6579_v26  ;;  %v6706_v39 = vcombine.low %v589_v19, %v593_v22  ;;  %v6412_v19 = vcombine.low %v294_v7, %v298_v9  ;;  %v150_v22 = vld [vmem:[#allocation5 + $0x48] sm:$0xff]  ;;  %v6405_v26 = vcombine.high %v286_v15, %v290_v17 }
  0xde   :  { %v129_v32 = vld [vmem:[#allocation2 + $0x60] sm:$0xff]  ;;  %v278_v24 = vld [vmem:[#allocation5 + $0x448] sm:$0xff] }
  0xdf   :  { %3414 = vmatprep.subr.bf16.mxu1 %v6707_v30  ;;  %v7816_v46 = vpack.c.bf16 %v129_v32, %v121_v31  ;;  %v6269_v30 = vcombine.high %v150_v22, %v154_v23  ;;  %v142_v31 = vld [vmem:[#allocation5 + $0x8] sm:$0xff]  ;;  %v6397_v35 = vcombine.high %v278_v24, %v282_v27 }
  0xe0   :  { %3372 = vmatpush2.bf16.msra.mxu0 %v6578_v38  ;;  %3415 = vmatpush2.bf16.msra.mxu1 %v6706_v39  ;;  %v146_v32 = vld [vmem:[#allocation5 + $0x28] sm:$0xff]  ;;  %v6268_v38 = vcombine.low %v150_v22, %v154_v23  ;;  %v6396_v39 = vcombine.low %v278_v24, %v282_v27 }
  0xe1   :  { %3427 = vmatprep.subr.bf16.mxu0 %v6317_v40  ;;  %3470 = vmatprep.subr.bf16.mxu1 %v6445_v44  ;;  %v270_v33 = vld [vmem:[#allocation5 + $0x408] sm:$0xff]  ;;  %v6261_v40 = vcombine.high %v142_v31, %v146_v32 }
  0xe2   :  { %v274_v36 = vld [vmem:[#allocation5 + $0x428] sm:$0xff] }
  0xe3   :  { %3374 = vmatmul.mubr.bf16.vlgmr.msra.gmra.mxu0 %v7816_v46  ;;  %3417 = vmatmul.mubr.bf16.vlgmr.msra.gmra.mxu1 %v7818_v47  ;;  %v262_v41 = vld [vmem:[#allocation5 + $0x3c8] sm:$0xff]  ;;  %v6389_v44 = vcombine.high %v270_v33, %v274_v36 }
  0xe4   :  { %3428 = vmatpush1.bf16.msra.mxu0 %v6316_v48  ;;  %3471 = vmatpush1.bf16.msra.mxu1 %v6444_v49  ;;  %v266_v42 = vld [vmem:[#allocation5 + $0x3e8] sm:$0xff]  ;;  %v6260_v48 = vcombine.low %v142_v31, %v146_v32  ;;  %v6388_v49 = vcombine.low %v270_v33, %v274_v36 }
  0xe5   :  { %3429 = vmatprep.subr.bf16.mxu0 %v6309_v50  ;;  %3472 = vmatprep.subr.bf16.mxu1 %v6437_v53  ;;  %v390_v43 = vld [vmem:[#allocation5 + $0x7c8] sm:$0xff]  ;;  %v6381_v50 = vcombine.high %v262_v41, %v266_v42 }
  0xe6   :  { %3459 = vmatprep.mubr.bf16.mxu0 %v7798_v58  ;;  %3502 = vmatprep.mubr.bf16.mxu1 %v7800_v63  ;;  %v394_v45 = vld [vmem:[#allocation5 + $0x7e8] sm:$0xff] }
  0xe7   :  { %v254_v51 = vld [vmem:[#allocation5 + $0x388] sm:$0xff]  ;;  %v6509_v54 = vcombine.high %v390_v43, %v394_v45 }
  0xe8   :  { %3430 = vmatpush1.bf16.msra.mxu0 %v6308_v56  ;;  %3473 = vmatpush1.bf16.msra.mxu1 %v6436_v57  ;;  %v258_v52 = vld [vmem:[#allocation5 + $0x3a8] sm:$0xff]  ;;  %v6380_v56 = vcombine.low %v262_v41, %v266_v42  ;;  %v6508_v57 = vcombine.low %v390_v43, %v394_v45 }
  0xe9   :  { %3431 = vmatprep.subr.bf16.mxu0 %v6301_v59  ;;  %3474 = vmatprep.subr.bf16.mxu1 %v6429_v0  ;;  %v382_v53 = vld [vmem:[#allocation5 + $0x788] sm:$0xff]  ;;  %v6373_v59 = vcombine.high %v254_v51, %v258_v52 }
  0xea   :  { %v386_v55 = vld [vmem:[#allocation5 + $0x7a8] sm:$0xff] }
  0xeb   :  { %v246_v60 = vld [vmem:[#allocation5 + $0x348] sm:$0xff]  ;;  %v6501_v0 = vcombine.high %v382_v53, %v386_v55 }
  0xec   :  { %3432 = vmatpush1.bf16.msra.mxu0 %v6300_v2  ;;  %3475 = vmatpush1.bf16.msra.mxu1 %v6428_v3  ;;  %v250_v61 = vld [vmem:[#allocation5 + $0x368] sm:$0xff]  ;;  %v6372_v2 = vcombine.low %v254_v51, %v258_v52  ;;  %v6500_v3 = vcombine.low %v382_v53, %v386_v55 }
  0xed   :  { %3433 = vmatprep.subr.bf16.mxu0 %v6293_v4  ;;  %3476 = vmatprep.subr.bf16.mxu1 %v6421_v8  ;;  %v374_v62 = vld [vmem:[#allocation5 + $0x748] sm:$0xff]  ;;  %v6365_v4 = vcombine.high %v246_v60, %v250_v61 }
  0xee   :  { %v378_v1 = vld [vmem:[#allocation5 + $0x768] sm:$0xff] }
  0xef   :  { %v238_v5 = vld [vmem:[#allocation5 + $0x308] sm:$0xff]  ;;  %v6493_v8 = vcombine.high %v374_v62, %v378_v1 }
  0xf0   :  { %3434 = vmatpush1.bf16.msra.mxu0 %v6292_v10  ;;  %3477 = vmatpush1.bf16.msra.mxu1 %v6420_v11  ;;  %v242_v6 = vld [vmem:[#allocation5 + $0x328] sm:$0xff]  ;;  %v6364_v10 = vcombine.low %v246_v60, %v250_v61  ;;  %v6492_v11 = vcombine.low %v374_v62, %v378_v1 }
  0xf1   :  { %3435 = vmatprep.subr.bf16.mxu0 %v6285_v12  ;;  %3478 = vmatprep.subr.bf16.mxu1 %v6413_v16  ;;  %v366_v7 = vld [vmem:[#allocation5 + $0x708] sm:$0xff]  ;;  %v6357_v12 = vcombine.high %v238_v5, %v242_v6 }
  0xf2   :  { %v370_v9 = vld [vmem:[#allocation5 + $0x728] sm:$0xff] }
  0xf3   :  { %v230_v13 = vld [vmem:[#allocation5 + $0x2c8] sm:$0xff]  ;;  %v6485_v16 = vcombine.high %v366_v7, %v370_v9 }
  0xf4   :  { %3436 = vmatpush1.bf16.msra.mxu0 %v6284_v18  ;;  %3479 = vmatpush1.bf16.msra.mxu1 %v6412_v19  ;;  %v234_v14 = vld [vmem:[#allocation5 + $0x2e8] sm:$0xff]  ;;  %v6356_v18 = vcombine.low %v238_v5, %v242_v6  ;;  %v6484_v19 = vcombine.low %v366_v7, %v370_v9 }
  0xf5   :  { %3437 = vmatprep.subr.bf16.mxu0 %v6277_v20  ;;  %3480 = vmatprep.subr.bf16.mxu1 %v6405_v26  ;;  %v358_v15 = vld [vmem:[#allocation5 + $0x6c8] sm:$0xff]  ;;  %v6349_v20 = vcombine.high %v230_v13, %v234_v14 }
  0xf6   :  { %v362_v17 = vld [vmem:[#allocation5 + $0x6e8] sm:$0xff] }
  0xf7   :  { %v222_v22 = vld [vmem:[#allocation5 + $0x288] sm:$0xff]  ;;  %v6477_v26 = vcombine.high %v358_v15, %v362_v17 }
  0xf8   :  { %3438 = vmatpush1.bf16.msra.mxu0 %v6276_v28  ;;  %3481 = vmatpush1.bf16.msra.mxu1 %v6404_v29  ;;  %v226_v23 = vld [vmem:[#allocation5 + $0x2a8] sm:$0xff]  ;;  %v6348_v28 = vcombine.low %v230_v13, %v234_v14  ;;  %v6476_v29 = vcombine.low %v358_v15, %v362_v17 }
  0xf9   :  { %3439 = vmatprep.subr.bf16.mxu0 %v6269_v30  ;;  %3482 = vmatprep.subr.bf16.mxu1 %v6397_v35  ;;  %v350_v24 = vld [vmem:[#allocation5 + $0x688] sm:$0xff]  ;;  %v6341_v30 = vcombine.high %v222_v22, %v226_v23 }
  0xfa   :  { %v354_v27 = vld [vmem:[#allocation5 + $0x6a8] sm:$0xff] }
  0xfb   :  { %v214_v31 = vld [vmem:[#allocation5 + $0x248] sm:$0xff]  ;;  %v6469_v35 = vcombine.high %v350_v24, %v354_v27 }
  0xfc   :  { %3440 = vmatpush1.bf16.msra.mxu0 %v6268_v38  ;;  %3483 = vmatpush1.bf16.msra.mxu1 %v6396_v39  ;;  %v218_v32 = vld [vmem:[#allocation5 + $0x268] sm:$0xff]  ;;  %v6340_v38 = vcombine.low %v222_v22, %v226_v23  ;;  %v6468_v39 = vcombine.low %v350_v24, %v354_v27 }
  0xfd   :  { %3441 = vmatprep.subr.bf16.mxu0 %v6261_v40  ;;  %3484 = vmatprep.subr.bf16.mxu1 %v6389_v44  ;;  %v342_v33 = vld [vmem:[#allocation5 + $0x648] sm:$0xff]  ;;  %v6333_v40 = vcombine.high %v214_v31, %v218_v32 }
  0xfe   :  { %v346_v36 = vld [vmem:[#allocation5 + $0x668] sm:$0xff] }
  0xff   :  { %v206_v41 = vld [vmem:[#allocation5 + $0x208] sm:$0xff]  ;;  %v6461_v44 = vcombine.high %v342_v33, %v346_v36 }
 0x100   :  { %3442 = vmatpush1.bf16.msra.mxu0 %v6260_v48  ;;  %3485 = vmatpush1.bf16.msra.mxu1 %v6388_v49  ;;  %v210_v42 = vld [vmem:[#allocation5 + $0x228] sm:$0xff]  ;;  %v6332_v48 = vcombine.low %v214_v31, %v218_v32  ;;  %v6460_v49 = vcombine.low %v342_v33, %v346_v36 }
 0x101   :  { %3443 = vmatprep.subr.bf16.mxu0 %v6381_v50  ;;  %3486 = vmatprep.subr.bf16.mxu1 %v6509_v54  ;;  %v334_v43 = vld [vmem:[#allocation5 + $0x608] sm:$0xff]  ;;  %v6325_v50 = vcombine.high %v206_v41, %v210_v42 }
 0x102   :  { %v338_v45 = vld [vmem:[#allocation5 + $0x628] sm:$0xff] }
 0x103   :  { %v454_v51 = vld [vmem:[#allocation5 + $0x9c8] sm:$0xff]  ;;  %v6453_v54 = vcombine.high %v334_v43, %v338_v45 }
 0x104   :  { %3444 = vmatpush2.bf16.msra.mxu0 %v6380_v56  ;;  %3487 = vmatpush2.bf16.msra.mxu1 %v6508_v57  ;;  %v458_v52 = vld [vmem:[#allocation5 + $0x9e8] sm:$0xff]  ;;  %v6324_v56 = vcombine.low %v206_v41, %v210_v42  ;;  %v6452_v57 = vcombine.low %v334_v43, %v338_v45 }
 0x105   :  { %3445 = vmatprep.subr.bf16.mxu0 %v6373_v59  ;;  %3488 = vmatprep.subr.bf16.mxu1 %v6501_v0  ;;  %v582_v53 = vld [vmem:[#allocation5 + $0xdc8] sm:$0xff]  ;;  %v6573_v59 = vcombine.high %v454_v51, %v458_v52 }
 0x106   :  { %v586_v55 = vld [vmem:[#allocation5 + $0xde8] sm:$0xff] }
 0x107   :  { %v446_v60 = vld [vmem:[#allocation5 + $0x988] sm:$0xff]  ;;  %v6701_v0 = vcombine.high %v582_v53, %v586_v55 }
 0x108   :  { %3446 = vmatpush2.bf16.msra.mxu0 %v6372_v2  ;;  %3489 = vmatpush2.bf16.msra.mxu1 %v6500_v3  ;;  %v450_v61 = vld [vmem:[#allocation5 + $0x9a8] sm:$0xff]  ;;  %v6572_v2 = vcombine.low %v454_v51, %v458_v52  ;;  %v6700_v3 = vcombine.low %v582_v53, %v586_v55 }
 0x109   :  { %3447 = vmatprep.subr.bf16.mxu0 %v6365_v4  ;;  %3490 = vmatprep.subr.bf16.mxu1 %v6493_v8  ;;  %v574_v62 = vld [vmem:[#allocation5 + $0xd88] sm:$0xff]  ;;  %v6565_v4 = vcombine.high %v446_v60, %v450_v61 }
 0x10a   :  { %v578_v1 = vld [vmem:[#allocation5 + $0xda8] sm:$0xff] }
 0x10b   :  { %v438_v5 = vld [vmem:[#allocation5 + $0x948] sm:$0xff]  ;;  %v6693_v8 = vcombine.high %v574_v62, %v578_v1 }
 0x10c   :  { %3448 = vmatpush2.bf16.msra.mxu0 %v6364_v10  ;;  %3491 = vmatpush2.bf16.msra.mxu1 %v6492_v11  ;;  %v442_v6 = vld [vmem:[#allocation5 + $0x968] sm:$0xff]  ;;  %v6564_v10 = vcombine.low %v446_v60, %v450_v61  ;;  %v6692_v11 = vcombine.low %v574_v62, %v578_v1 }
 0x10d   :  { %3449 = vmatprep.subr.bf16.mxu0 %v6357_v12  ;;  %3492 = vmatprep.subr.bf16.mxu1 %v6485_v16  ;;  %v566_v7 = vld [vmem:[#allocation5 + $0xd48] sm:$0xff]  ;;  %v6557_v12 = vcombine.high %v438_v5, %v442_v6 }
 0x10e   :  { %v570_v9 = vld [vmem:[#allocation5 + $0xd68] sm:$0xff] }
 0x10f   :  { %v430_v13 = vld [vmem:[#allocation5 + $0x908] sm:$0xff]  ;;  %v6685_v16 = vcombine.high %v566_v7, %v570_v9 }
 0x110   :  { %3450 = vmatpush2.bf16.msra.mxu0 %v6356_v18  ;;  %3493 = vmatpush2.bf16.msra.mxu1 %v6484_v19  ;;  %v434_v14 = vld [vmem:[#allocation5 + $0x928] sm:$0xff]  ;;  %v6556_v18 = vcombine.low %v438_v5, %v442_v6  ;;  %v6684_v19 = vcombine.low %v566_v7, %v570_v9 }
 0x111   :  { %3451 = vmatprep.subr.bf16.mxu0 %v6349_v20  ;;  %3494 = vmatprep.subr.bf16.mxu1 %v6477_v26  ;;  %v558_v15 = vld [vmem:[#allocation5 + $0xd08] sm:$0xff]  ;;  %v6549_v20 = vcombine.high %v430_v13, %v434_v14 }
 0x112   :  { %v562_v17 = vld [vmem:[#allocation5 + $0xd28] sm:$0xff] }
 0x113   :  { %v422_v22 = vld [vmem:[#allocation5 + $0x8c8] sm:$0xff]  ;;  %v6677_v26 = vcombine.high %v558_v15, %v562_v17 }
 0x114   :  { %3452 = vmatpush2.bf16.msra.mxu0 %v6348_v28  ;;  %3495 = vmatpush2.bf16.msra.mxu1 %v6476_v29  ;;  %v426_v23 = vld [vmem:[#allocation5 + $0x8e8] sm:$0xff]  ;;  %v6548_v28 = vcombine.low %v430_v13, %v434_v14  ;;  %v6676_v29 = vcombine.low %v558_v15, %v562_v17 }
 0x115   :  { %3453 = vmatprep.subr.bf16.mxu0 %v6341_v30  ;;  %3496 = vmatprep.subr.bf16.mxu1 %v6469_v35  ;;  %v550_v24 = vld [vmem:[#allocation5 + $0xcc8] sm:$0xff]  ;;  %v6541_v30 = vcombine.high %v422_v22, %v426_v23 }
 0x116   :  { %v554_v27 = vld [vmem:[#allocation5 + $0xce8] sm:$0xff] }
 0x117   :  { %v414_v31 = vld [vmem:[#allocation5 + $0x888] sm:$0xff]  ;;  %v6669_v35 = vcombine.high %v550_v24, %v554_v27 }
 0x118   :  { %3454 = vmatpush2.bf16.msra.mxu0 %v6340_v38  ;;  %3497 = vmatpush2.bf16.msra.mxu1 %v6468_v39  ;;  %v418_v32 = vld [vmem:[#allocation5 + $0x8a8] sm:$0xff]  ;;  %v6540_v38 = vcombine.low %v422_v22, %v426_v23  ;;  %v6668_v39 = vcombine.low %v550_v24, %v554_v27 }
 0x119   :  { %3455 = vmatprep.subr.bf16.mxu0 %v6333_v40  ;;  %3498 = vmatprep.subr.bf16.mxu1 %v6461_v44  ;;  %v542_v33 = vld [vmem:[#allocation5 + $0xc88] sm:$0xff]  ;;  %v6533_v40 = vcombine.high %v414_v31, %v418_v32 }
 0x11a   :  { %v546_v36 = vld [vmem:[#allocation5 + $0xca8] sm:$0xff] }
 0x11b   :  { %v406_v41 = vld [vmem:[#allocation5 + $0x848] sm:$0xff]  ;;  %v6661_v44 = vcombine.high %v542_v33, %v546_v36 }
 0x11c   :  { %3456 = vmatpush2.bf16.msra.mxu0 %v6332_v48  ;;  %3499 = vmatpush2.bf16.msra.mxu1 %v6460_v49  ;;  %v410_v42 = vld [vmem:[#allocation5 + $0x868] sm:$0xff]  ;;  %v6532_v48 = vcombine.low %v414_v31, %v418_v32  ;;  %v6660_v49 = vcombine.low %v542_v33, %v546_v36 }
 0x11d   :  { %3457 = vmatprep.subr.bf16.mxu0 %v6325_v50  ;;  %3500 = vmatprep.subr.bf16.mxu1 %v6453_v54  ;;  %v534_v43 = vld [vmem:[#allocation5 + $0xc48] sm:$0xff]  ;;  %v6525_v50 = vcombine.high %v406_v41, %v410_v42 }
 0x11e   :  { %v538_v45 = vld [vmem:[#allocation5 + $0xc68] sm:$0xff] }
 0x11f   :  { %v398_v51 = vld [vmem:[#allocation5 + $0x808] sm:$0xff]  ;;  %v6653_v54 = vcombine.high %v534_v43, %v538_v45 }
 0x120   :  { %3458 = vmatpush2.bf16.msra.mxu0 %v6324_v56  ;;  %3501 = vmatpush2.bf16.msra.mxu1 %v6452_v57  ;;  %v402_v52 = vld [vmem:[#allocation5 + $0x828] sm:$0xff]  ;;  %v6524_v56 = vcombine.low %v406_v41, %v410_v42  ;;  %v6652_v57 = vcombine.low %v534_v43, %v538_v45 }
 0x121   :  { %3513 = vmatprep.subr.bf16.mxu0 %v6573_v59  ;;  %3556 = vmatprep.subr.bf16.mxu1 %v6701_v0  ;;  %v526_v53 = vld [vmem:[#allocation5 + $0xc08] sm:$0xff]  ;;  %v6517_v59 = vcombine.high %v398_v51, %v402_v52 }
 0x122   :  { %v530_v55 = vld [vmem:[#allocation5 + $0xc28] sm:$0xff] }
 0x123   :  { %3460 = vmatmul.mubr.bf16.vlgmr.msra.gmra.mxu0 %v7804_v21  ;;  %3503 = vmatmul.mubr.bf16.vlgmr.msra.gmra.mxu1 %v7806_v25  ;;  %v518_v60 = vld [vmem:[#allocation5 + $0xbc8] sm:$0xff]  ;;  %v6645_v0 = vcombine.high %v526_v53, %v530_v55 }
 0x124   :  { %3514 = vmatpush1.bf16.msra.mxu0 %v6572_v2  ;;  %3557 = vmatpush1.bf16.msra.mxu1 %v6700_v3  ;;  %v522_v61 = vld [vmem:[#allocation5 + $0xbe8] sm:$0xff]  ;;  %v6516_v2 = vcombine.low %v398_v51, %v402_v52  ;;  %v6644_v3 = vcombine.low %v526_v53, %v530_v55 }
 0x125   :  { %3515 = vmatprep.subr.bf16.mxu0 %v6565_v4  ;;  %3558 = vmatprep.subr.bf16.mxu1 %v6693_v8  ;;  %v646_v62 = vld [vmem:[#allocation5 + $0xfc8] sm:$0xff]  ;;  %v6637_v4 = vcombine.high %v518_v60, %v522_v61 }
 0x126   :  { %3545 = vmatprep.mubr.bf16.mxu0 %v7808_v34  ;;  %3588 = vmatprep.mubr.bf16.mxu1 %v7811_v37  ;;  %v650_v1 = vld [vmem:[#allocation5 + $0xfe8] sm:$0xff] }
 0x127   :  { %v510_v5 = vld [vmem:[#allocation5 + $0xb88] sm:$0xff]  ;;  %v6765_v8 = vcombine.high %v646_v62, %v650_v1 }
 0x128   :  { %3516 = vmatpush1.bf16.msra.mxu0 %v6564_v10  ;;  %3559 = vmatpush1.bf16.msra.mxu1 %v6692_v11  ;;  %v514_v6 = vld [vmem:[#allocation5 + $0xba8] sm:$0xff]  ;;  %v6636_v10 = vcombine.low %v518_v60, %v522_v61  ;;  %v6764_v11 = vcombine.low %v646_v62, %v650_v1 }
 0x129   :  { %3517 = vmatprep.subr.bf16.mxu0 %v6557_v12  ;;  %3560 = vmatprep.subr.bf16.mxu1 %v6685_v16  ;;  %v638_v7 = vld [vmem:[#allocation5 + $0xf88] sm:$0xff]  ;;  %v6629_v12 = vcombine.high %v510_v5, %v514_v6 }
 0x12a   :  { %v642_v9 = vld [vmem:[#allocation5 + $0xfa8] sm:$0xff] }
 0x12b   :  { %v502_v13 = vld [vmem:[#allocation5 + $0xb48] sm:$0xff]  ;;  %v6757_v16 = vcombine.high %v638_v7, %v642_v9 }
 0x12c   :  { %3518 = vmatpush1.bf16.msra.mxu0 %v6556_v18  ;;  %3561 = vmatpush1.bf16.msra.mxu1 %v6684_v19  ;;  %v506_v14 = vld [vmem:[#allocation5 + $0xb68] sm:$0xff]  ;;  %v6628_v18 = vcombine.low %v510_v5, %v514_v6  ;;  %v6756_v19 = vcombine.low %v638_v7, %v642_v9  ;;  %v203_v9 = vld [vmem:[#allocation5 + $0x1f0] sm:$0xff] }
 0x12d   :  { %3519 = vmatprep.subr.bf16.mxu0 %v6549_v20  ;;  %3562 = vmatprep.subr.bf16.mxu1 %v6677_v26  ;;  %v630_v15 = vld [vmem:[#allocation5 + $0xf48] sm:$0xff]  ;;  %v6621_v20 = vcombine.high %v502_v13, %v506_v14 }
 0x12e   :  { %v634_v17 = vld [vmem:[#allocation5 + $0xf68] sm:$0xff] }
 0x12f   :  { %v494_v22 = vld [vmem:[#allocation5 + $0xb08] sm:$0xff]  ;;  %v6749_v26 = vcombine.high %v630_v15, %v634_v17 }
 0x130   :  { %3520 = vmatpush1.bf16.msra.mxu0 %v6548_v28  ;;  %3563 = vmatpush1.bf16.msra.mxu1 %v6676_v29  ;;  %v498_v23 = vld [vmem:[#allocation5 + $0xb28] sm:$0xff]  ;;  %v6620_v28 = vcombine.low %v502_v13, %v506_v14  ;;  %v6748_v29 = vcombine.low %v630_v15, %v634_v17  ;;  %v7831_v15 = vld [vmem:[#allocation7] sm:$0xff] }
 0x131   :  { %3521 = vmatprep.subr.bf16.mxu0 %v6541_v30  ;;  %3564 = vmatprep.subr.bf16.mxu1 %v6669_v35  ;;  %v622_v24 = vld [vmem:[#allocation5 + $0xf08] sm:$0xff]  ;;  %v6613_v30 = vcombine.high %v494_v22, %v498_v23 }
 0x132   :  { %v626_v27 = vld [vmem:[#allocation5 + $0xf28] sm:$0xff] }
 0x133   :  { %v6741_v31 = vcombine.high %v622_v24, %v626_v27  ;;  %v486_v32 = vld [vmem:[#allocation5 + $0xac8] sm:$0xff] }
 0x134   :  { %3522 = vmatpush1.bf16.msra.mxu0 %v6540_v38  ;;  %3565 = vmatpush1.bf16.msra.mxu1 %v6668_v39  ;;  %v490_v33 = vld [vmem:[#allocation5 + $0xae8] sm:$0xff]  ;;  %v6612_v38 = vcombine.low %v494_v22, %v498_v23  ;;  %v6740_v39 = vcombine.low %v622_v24, %v626_v27  ;;  %v323_v22 = vld [vmem:[#allocation5 + $0x5b0] sm:$0xff] }
 0x135   :  { %3523 = vmatprep.subr.bf16.mxu0 %v6533_v40  ;;  %3566 = vmatprep.subr.bf16.mxu1 %v6661_v44  ;;  %v614_v35 = vld [vmem:[#allocation5 + $0xec8] sm:$0xff]  ;;  %v6605_v40 = vcombine.high %v486_v32, %v490_v33 }
 0x136   :  { %v618_v36 = vld [vmem:[#allocation5 + $0xee8] sm:$0xff] }
 0x137   :  { %v6733_v41 = vcombine.high %v614_v35, %v618_v36  ;;  %v478_v42 = vld [vmem:[#allocation5 + $0xa88] sm:$0xff] }
 0x138   :  { %3524 = vmatpush1.bf16.msra.mxu0 %v6532_v48  ;;  %3567 = vmatpush1.bf16.msra.mxu1 %v6660_v49  ;;  %v482_v43 = vld [vmem:[#allocation5 + $0xaa8] sm:$0xff]  ;;  %v6604_v48 = vcombine.low %v486_v32, %v490_v33  ;;  %v6732_v49 = vcombine.low %v614_v35, %v618_v36  ;;  %v311_v32 = vld [vmem:[#allocation5 + $0x550] sm:$0xff] }
 0x139   :  { %3525 = vmatprep.subr.bf16.mxu0 %v6525_v50  ;;  %3568 = vmatprep.subr.bf16.mxu1 %v6653_v54  ;;  %v606_v44 = vld [vmem:[#allocation5 + $0xe88] sm:$0xff]  ;;  %v6597_v50 = vcombine.high %v478_v42, %v482_v43  ;;  %v315_v33 = vld [vmem:[#allocation5 + $0x570] sm:$0xff] }
 0x13a   :  { %v610_v45 = vld [vmem:[#allocation5 + $0xea8] sm:$0xff] }
 0x13b   :  { %v6725_v51 = vcombine.high %v606_v44, %v610_v45  ;;  %v470_v52 = vld [vmem:[#allocation5 + $0xa48] sm:$0xff] }
 0x13c   :  { %3526 = vmatpush1.bf16.msra.mxu0 %v6524_v56  ;;  %3569 = vmatpush1.bf16.msra.mxu1 %v6652_v57  ;;  %v474_v53 = vld [vmem:[#allocation5 + $0xa68] sm:$0xff]  ;;  %v6596_v56 = vcombine.low %v478_v42, %v482_v43  ;;  %v655_v57 = vlaneseq }
 0x13d   :  { %3527 = vmatprep.subr.bf16.mxu0 %v6517_v59  ;;  %3570 = vmatprep.subr.bf16.mxu1 %v6645_v0  ;;  %v598_v54 = vld [vmem:[#allocation5 + $0xe48] sm:$0xff]  ;;  %v6724_v59 = vcombine.low %v606_v44, %v610_v45  ;;  %v6589_v60 = vcombine.high %v470_v52, %v474_v53  ;;  %v6431_v44 = vcombine.high %v311_v32, %v315_v33  ;;  %v175_v45 = vld [vmem:[#allocation5 + $0x110] sm:$0xff] }
 0x13e   :  { %v602_v55 = vld [vmem:[#allocation5 + $0xe68] sm:$0xff] }
 0x13f   :  { %v6717_v61 = vcombine.high %v598_v54, %v602_v55  ;;  %v462_v62 = vld [vmem:[#allocation5 + $0xa08] sm:$0xff]  ;;  %v6716_v5 = vcombine.low %v598_v54, %v602_v55  ;;  %v6430_v55 = vcombine.low %v311_v32, %v315_v33 }
 0x140   :  { %3528 = vmatpush1.bf16.msra.mxu0 %v6516_v2  ;;  %3571 = vmatpush1.bf16.msra.mxu1 %v6644_v3  ;;  %v466_v0 = vld [vmem:[#allocation5 + $0xa28] sm:$0xff]  ;;  %v6588_v3 = vcombine.low %v470_v52, %v474_v53 }
 0x141   :  { %3529 = vmatprep.subr.bf16.mxu0 %v6637_v4  ;;  %3572 = vmatprep.subr.bf16.mxu1 %v6765_v8  ;;  %v590_v1 = vld [vmem:[#allocation5 + $0xe08] sm:$0xff]  ;;  %v7828_v4 = vshrl.u32 %v655_v57, 7  ;;  %v6581_v6 = vcombine.high %v462_v62, %v466_v0  ;;  %v199_v8 = vld [vmem:[#allocation5 + $0x1d0] sm:$0xff] }
 0x142   :  { %v594_v2 = vld [vmem:[#allocation5 + $0xe28] sm:$0xff]  ;;  %v6318_v24 = vcombine.low %v199_v8, %v203_v9 }
 0x143   :  { %v6709_v7 = vcombine.high %v590_v1, %v594_v2  ;;  %v657_v13 = vsub.s32 0, %v7828_v4  ;;  %v6708_v14 = vcombine.low %v590_v1, %v594_v2 }
 0x144   :  { %3530 = vmatpush2.bf16.msra.mxu0 %v6636_v10  ;;  %3573 = vmatpush2.bf16.msra.mxu1 %v6764_v11  ;;  %v327_v10 = vld [vmem:[#allocation5 + $0x5d0] sm:$0xff] }
 0x145   :  { %3531 = vmatprep.subr.bf16.mxu0 %v6629_v12  ;;  %3574 = vmatprep.subr.bf16.mxu1 %v6757_v16  ;;  %v331_v11 = vld [vmem:[#allocation5 + $0x5f0] sm:$0xff]  ;;  %v6580_v12 = vcombine.low %v462_v62, %v466_v0  ;;  %v6319_v16 = vcombine.high %v199_v8, %v203_v9  ;;  %v658_v23 = vrot.slane %v7831_v15, %v657_v13 }
 0x146   :  { %v6447_v17 = vcombine.high %v327_v10, %v331_v11  ;;  %v295_v62 = vld [vmem:[#allocation5 + $0x4d0] sm:$0xff] }
 0x147   :  { %v299_v0 = vld [vmem:[#allocation5 + $0x4f0] sm:$0xff] }
 0x148   :  { %3532 = vmatpush2.bf16.msra.mxu0 %v6628_v18  ;;  %3575 = vmatpush2.bf16.msra.mxu1 %v6756_v19  ;;  %v191_v18 = vld [vmem:[#allocation5 + $0x190] sm:$0xff] }
 0x149   :  { %3533 = vmatprep.subr.bf16.mxu0 %v6621_v20  ;;  %3576 = vmatprep.subr.bf16.mxu1 %v6749_v26  ;;  %v195_v19 = vld [vmem:[#allocation5 + $0x1b0] sm:$0xff]  ;;  %v6446_v26 = vcombine.low %v327_v10, %v331_v11  ;;  %v6414_v11 = vcombine.low %v295_v62, %v299_v0 }
 0x14a   :  { %v319_v20 = vld [vmem:[#allocation5 + $0x590] sm:$0xff]  ;;  %v6311_v27 = vcombine.high %v191_v18, %v195_v19 }
 0x14b   :  { %v287_v8 = vld [vmem:[#allocation5 + $0x490] sm:$0xff] }
 0x14c   :  { %3534 = vmatpush2.bf16.msra.mxu0 %v6620_v28  ;;  %3577 = vmatpush2.bf16.msra.mxu1 %v6748_v29  ;;  %v6439_v28 = vcombine.high %v319_v20, %v323_v22  ;;  %v183_v29 = vld [vmem:[#allocation5 + $0x150] sm:$0xff] }
 0x14d   :  { %3535 = vmatprep.subr.bf16.mxu0 %v6613_v30  ;;  %3578 = vmatprep.subr.bf16.mxu1 %v6741_v31  ;;  %v187_v30 = vld [vmem:[#allocation5 + $0x170] sm:$0xff] }
 0x14e   :  { %v6302_v53 = vcombine.low %v183_v29, %v187_v30  ;;  %v291_v9 = vld [vmem:[#allocation5 + $0x4b0] sm:$0xff] }
 0x150   :  { %3536 = vmatpush2.bf16.msra.mxu0 %v6612_v38  ;;  %3579 = vmatpush2.bf16.msra.mxu1 %v6740_v39  ;;  %v6310_v38 = vcombine.low %v191_v18, %v195_v19  ;;  %v279_v18 = vld [vmem:[#allocation5 + $0x450] sm:$0xff] }
 0x151   :  { %3537 = vmatprep.subr.bf16.mxu0 %v6605_v40  ;;  %3580 = vmatprep.subr.bf16.mxu1 %v6733_v41  ;;  %v6438_v40 = vcombine.low %v319_v20, %v323_v22  ;;  %v6303_v41 = vcombine.high %v183_v29, %v187_v30  ;;  %v283_v19 = vld [vmem:[#allocation5 + $0x470] sm:$0xff]  ;;  %v6406_v22 = vcombine.low %v287_v8, %v291_v9 }
 0x152   :  { %v275_v29 = vld [vmem:[#allocation5 + $0x430] sm:$0xff] }
 0x154   :  { %3538 = vmatpush2.bf16.msra.mxu0 %v6604_v48  ;;  %3581 = vmatpush2.bf16.msra.mxu1 %v6732_v49  ;;  %v179_v48 = vld [vmem:[#allocation5 + $0x130] sm:$0xff] }
 0x155   :  { %3539 = vmatprep.subr.bf16.mxu0 %v6597_v50  ;;  %3582 = vmatprep.subr.bf16.mxu1 %v6725_v51  ;;  %v303_v50 = vld [vmem:[#allocation5 + $0x510] sm:$0xff]  ;;  %v6294_v1 = vcombine.low %v175_v45, %v179_v48 }
 0x156   :  { %v307_v51 = vld [vmem:[#allocation5 + $0x530] sm:$0xff] }
 0x157   :  { %v6422_v2 = vcombine.low %v303_v50, %v307_v51 }
 0x158   :  { %3540 = vmatpush2.bf16.msra.mxu0 %v6596_v56  ;;  %3583 = vmatpush2.bf16.msra.mxu1 %v6724_v59  ;;  %v6295_v56 = vcombine.high %v175_v45, %v179_v48  ;;  %v6423_v59 = vcombine.high %v303_v50, %v307_v51  ;;  %v259_v50 = vld [vmem:[#allocation5 + $0x3b0] sm:$0xff] }
 0x159   :  { %3541 = vmatprep.subr.bf16.mxu0 %v6589_v60  ;;  %3584 = vmatprep.subr.bf16.mxu1 %v6717_v61  ;;  %v167_v60 = vld [vmem:[#allocation5 + $0xd0] sm:$0xff] }
 0x15a   :  { %v171_v61 = vld [vmem:[#allocation5 + $0xf0] sm:$0xff] }
 0x15b   :  { %v6286_v10 = vcombine.low %v167_v60, %v171_v61  ;;  %v383_v51 = vld [vmem:[#allocation5 + $0x790] sm:$0xff] }
 0x15c   :  { %3542 = vmatpush2.bf16.msra.mxu0 %v6588_v3  ;;  %3585 = vmatpush2.bf16.msra.mxu1 %v6716_v5  ;;  %v6287_v3 = vcombine.high %v167_v60, %v171_v61  ;;  %v6415_v5 = vcombine.high %v295_v62, %v299_v0  ;;  %v251_v60 = vld [vmem:[#allocation5 + $0x370] sm:$0xff] }
 0x15d   :  { %3543 = vmatprep.subr.bf16.mxu0 %v6581_v6  ;;  %3586 = vmatprep.subr.bf16.mxu1 %v6709_v7  ;;  %v159_v6 = vld [vmem:[#allocation5 + $0x90] sm:$0xff] }
 0x15e   :  { %v163_v7 = vld [vmem:[#allocation5 + $0xb0] sm:$0xff] }
 0x15f   :  { %v6278_v20 = vcombine.low %v159_v6, %v163_v7  ;;  %v375_v61 = vld [vmem:[#allocation5 + $0x750] sm:$0xff] }
 0x160   :  { %3544 = vmatpush2.bf16.msra.mxu0 %v6580_v12  ;;  %3587 = vmatpush2.bf16.msra.mxu1 %v6708_v14  ;;  %v6279_v12 = vcombine.high %v159_v6, %v163_v7  ;;  %v6407_v14 = vcombine.high %v287_v8, %v291_v9  ;;  %v379_v62 = vld [vmem:[#allocation5 + $0x770] sm:$0xff] }
 0x161   :  { %3599 = vmatprep.subr.bf16.mxu0 %v6319_v16  ;;  %3642 = vmatprep.subr.bf16.mxu1 %v6447_v17  ;;  %v3332_v36 = vpop.f32.mrf.mxu1  ;;  %v151_v16 = vld [vmem:[#allocation5 + $0x50] sm:$0xff] }
 0x162   :  { %v155_v17 = vld [vmem:[#allocation5 + $0x70] sm:$0xff] }
 0x163   :  { %v3289_v31 = vpop.f32.mrf.mxu0  ;;  %3546 = vmatmul.mubr.bf16.vlgmr.msra.gmra.mxu0 %v7816_v46  ;;  %3589 = vmatmul.mubr.bf16.vlgmr.msra.gmra.mxu1 %v7818_v47  ;;  %v7842_v43 = vpop.f32.mrf.mxu1  ;;  %v6270_v30 = vcombine.low %v151_v16, %v155_v17  ;;  %v243_v6 = vld [vmem:[#allocation5 + $0x330] sm:$0xff] }
 0x164   :  { %v3290_v35 = vadd.f32 %v3289_v31, %v658_v23  ;;  %3600 = vmatpush1.bf16.msra.mxu0 %v6318_v24  ;;  %3643 = vmatpush1.bf16.msra.mxu1 %v6446_v26  ;;  %v6399_v24 = vcombine.high %v279_v18, %v283_v19  ;;  %v143_v26 = vld [vmem:[#allocation5 + $0x10] sm:$0xff]  ;;  %v6398_v31 = vcombine.low %v279_v18, %v283_v19 }
 0x165   :  { %v7838_v39 = vpop.f32.mrf.mxu0  ;;  %3601 = vmatprep.subr.bf16.mxu0 %v6311_v27  ;;  %3644 = vmatprep.subr.bf16.mxu1 %v6439_v28  ;;  %v3336_v54 = vpop.f32.mrf.mxu1  ;;  %v147_v27 = vld [vmem:[#allocation5 + $0x30] sm:$0xff] }
 0x166   :  { %v7840_v42 = vadd.f32 %v3332_v36, %v3290_v35  ;;  %3631 = vmatprep.mubr.bf16.mxu0 %v7798_v58  ;;  %3674 = vmatprep.mubr.bf16.mxu1 %v7800_v63  ;;  %v271_v28 = vld [vmem:[#allocation5 + $0x410] sm:$0xff]  ;;  %v6263_v32 = vcombine.high %v143_v26, %v147_v27 }
 0x167   :  { %v3293_v49 = vpop.f32.mrf.mxu0  ;;  %v6391_v33 = vcombine.high %v271_v28, %v275_v29  ;;  %v263_v35 = vld [vmem:[#allocation5 + $0x3d0] sm:$0xff] }
 0x168   :  { %v3294_v52 = vadd.f32 %v3293_v49, %v658_v23  ;;  %3602 = vmatpush1.bf16.msra.mxu0 %v6310_v38  ;;  %3645 = vmatpush1.bf16.msra.mxu1 %v6438_v40  ;;  %v6271_v23 = vcombine.high %v151_v16, %v155_v17  ;;  %v267_v36 = vld [vmem:[#allocation5 + $0x3f0] sm:$0xff] }
 0x169   :  { %3603 = vmatprep.subr.bf16.mxu0 %v6303_v41  ;;  %3646 = vmatprep.subr.bf16.mxu1 %v6431_v44  ;;  %v391_v38 = vld [vmem:[#allocation5 + $0x7d0] sm:$0xff]  ;;  %v6262_v41 = vcombine.low %v143_v26, %v147_v27  ;;  %v6390_v44 = vcombine.low %v271_v28, %v275_v29  ;;  %v6383_v45 = vcombine.high %v263_v35, %v267_v36 }
 0x16a   :  { %v7846_v57 = vadd.f32 %v3336_v54, %v3294_v52  ;;  %v395_v40 = vld [vmem:[#allocation5 + $0x7f0] sm:$0xff] }
 0x16b   :  { %v6511_v48 = vcombine.high %v391_v38, %v395_v40  ;;  %v255_v49 = vld [vmem:[#allocation5 + $0x390] sm:$0xff]  ;;  %v6510_v54 = vcombine.low %v391_v38, %v395_v40 }
 0x16c   :  { %3604 = vmatpush1.bf16.msra.mxu0 %v6302_v53  ;;  %3647 = vmatpush1.bf16.msra.mxu1 %v6430_v55  ;;  %v387_v52 = vld [vmem:[#allocation5 + $0x7b0] sm:$0xff]  ;;  %v6382_v53 = vcombine.low %v263_v35, %v267_v36  ;;  %v6375_v55 = vcombine.high %v255_v49, %v259_v50  ;;  %v6374_v0 = vcombine.low %v255_v49, %v259_v50 }
 0x16d   :  { %3605 = vmatprep.subr.bf16.mxu0 %v6295_v56  ;;  %3648 = vmatprep.subr.bf16.mxu1 %v6423_v59  ;;  %v6503_v56 = vcombine.high %v383_v51, %v387_v52  ;;  %v247_v59 = vld [vmem:[#allocation5 + $0x350] sm:$0xff] }
 0x16e   :  { %v367_v7 = vld [vmem:[#allocation5 + $0x710] sm:$0xff]  ;;  %v6366_v9 = vcombine.low %v247_v59, %v251_v60 }
 0x16f   :  { %v371_v8 = vld [vmem:[#allocation5 + $0x730] sm:$0xff] }
 0x170   :  { %3606 = vmatpush1.bf16.msra.mxu0 %v6294_v1  ;;  %3649 = vmatpush1.bf16.msra.mxu1 %v6422_v2  ;;  %v6502_v1 = vcombine.low %v383_v51, %v387_v52  ;;  %v6367_v2 = vcombine.high %v247_v59, %v251_v60  ;;  %v235_v16 = vld [vmem:[#allocation5 + $0x2f0] sm:$0xff] }
 0x171   :  { %3607 = vmatprep.subr.bf16.mxu0 %v6287_v3  ;;  %3650 = vmatprep.subr.bf16.mxu1 %v6415_v5  ;;  %v6495_v3 = vcombine.high %v375_v61, %v379_v62  ;;  %v239_v5 = vld [vmem:[#allocation5 + $0x310] sm:$0xff] }
 0x172   :  { %v359_v17 = vld [vmem:[#allocation5 + $0x6d0] sm:$0xff]  ;;  %v6358_v19 = vcombine.low %v239_v5, %v243_v6 }
 0x173   :  { %v363_v18 = vld [vmem:[#allocation5 + $0x6f0] sm:$0xff] }
 0x174   :  { %3608 = vmatpush1.bf16.msra.mxu0 %v6286_v10  ;;  %3651 = vmatpush1.bf16.msra.mxu1 %v6414_v11  ;;  %v6494_v10 = vcombine.low %v375_v61, %v379_v62  ;;  %v6359_v11 = vcombine.high %v239_v5, %v243_v6  ;;  %v227_v26 = vld [vmem:[#allocation5 + $0x2b0] sm:$0xff] }
 0x175   :  { %3609 = vmatprep.subr.bf16.mxu0 %v6279_v12  ;;  %3652 = vmatprep.subr.bf16.mxu1 %v6407_v14  ;;  %v6487_v12 = vcombine.high %v367_v7, %v371_v8  ;;  %v231_v14 = vld [vmem:[#allocation5 + $0x2d0] sm:$0xff] }
 0x176   :  { %v351_v27 = vld [vmem:[#allocation5 + $0x690] sm:$0xff]  ;;  %v6350_v29 = vcombine.low %v231_v14, %v235_v16 }
 0x177   :  { %v355_v28 = vld [vmem:[#allocation5 + $0x6b0] sm:$0xff] }
 0x178   :  { %3610 = vmatpush1.bf16.msra.mxu0 %v6278_v20  ;;  %3653 = vmatpush1.bf16.msra.mxu1 %v6406_v22  ;;  %v6486_v20 = vcombine.low %v367_v7, %v371_v8  ;;  %v6351_v22 = vcombine.high %v231_v14, %v235_v16  ;;  %v219_v35 = vld [vmem:[#allocation5 + $0x270] sm:$0xff] }
 0x179   :  { %3611 = vmatprep.subr.bf16.mxu0 %v6271_v23  ;;  %3654 = vmatprep.subr.bf16.mxu1 %v6399_v24  ;;  %v6479_v23 = vcombine.high %v359_v17, %v363_v18  ;;  %v223_v24 = vld [vmem:[#allocation5 + $0x290] sm:$0xff] }
 0x17a   :  { %v343_v36 = vld [vmem:[#allocation5 + $0x650] sm:$0xff]  ;;  %v6342_v40 = vcombine.low %v223_v24, %v227_v26 }
 0x17b   :  { %v347_v38 = vld [vmem:[#allocation5 + $0x670] sm:$0xff] }
 0x17c   :  { %3612 = vmatpush1.bf16.msra.mxu0 %v6270_v30  ;;  %3655 = vmatpush1.bf16.msra.mxu1 %v6398_v31  ;;  %v6478_v30 = vcombine.low %v359_v17, %v363_v18  ;;  %v6343_v31 = vcombine.high %v223_v24, %v227_v26  ;;  %v211_v49 = vld [vmem:[#allocation5 + $0x230] sm:$0xff] }
 0x17d   :  { %3613 = vmatprep.subr.bf16.mxu0 %v6263_v32  ;;  %3656 = vmatprep.subr.bf16.mxu1 %v6391_v33  ;;  %v6471_v32 = vcombine.high %v351_v27, %v355_v28  ;;  %v215_v33 = vld [vmem:[#allocation5 + $0x250] sm:$0xff] }
 0x17e   :  { %v335_v50 = vld [vmem:[#allocation5 + $0x610] sm:$0xff]  ;;  %v6334_v52 = vcombine.low %v215_v33, %v219_v35 }
 0x17f   :  { %v339_v51 = vld [vmem:[#allocation5 + $0x630] sm:$0xff] }
 0x180   :  { %3614 = vmatpush1.bf16.msra.mxu0 %v6262_v41  ;;  %3657 = vmatpush1.bf16.msra.mxu1 %v6390_v44  ;;  %v6470_v41 = vcombine.low %v351_v27, %v355_v28  ;;  %v6335_v44 = vcombine.high %v215_v33, %v219_v35  ;;  %v459_v59 = vld [vmem:[#allocation5 + $0x9f0] sm:$0xff] }
 0x181   :  { %3615 = vmatprep.subr.bf16.mxu0 %v6383_v45  ;;  %3658 = vmatprep.subr.bf16.mxu1 %v6511_v48  ;;  %v6463_v45 = vcombine.high %v343_v36, %v347_v38  ;;  %v207_v48 = vld [vmem:[#allocation5 + $0x210] sm:$0xff] }
 0x182   :  { %v583_v60 = vld [vmem:[#allocation5 + $0xdd0] sm:$0xff]  ;;  %v6326_v62 = vcombine.low %v207_v48, %v211_v49 }
 0x183   :  { %v587_v61 = vld [vmem:[#allocation5 + $0xdf0] sm:$0xff] }
 0x184   :  { %3616 = vmatpush2.bf16.msra.mxu0 %v6382_v53  ;;  %3659 = vmatpush2.bf16.msra.mxu1 %v6510_v54  ;;  %v6462_v53 = vcombine.low %v343_v36, %v347_v38  ;;  %v6327_v54 = vcombine.high %v207_v48, %v211_v49  ;;  %v451_v5 = vld [vmem:[#allocation5 + $0x9b0] sm:$0xff] }
 0x185   :  { %3617 = vmatprep.subr.bf16.mxu0 %v6375_v55  ;;  %3660 = vmatprep.subr.bf16.mxu1 %v6503_v56  ;;  %v6455_v55 = vcombine.high %v335_v50, %v339_v51  ;;  %v455_v56 = vld [vmem:[#allocation5 + $0x9d0] sm:$0xff] }
 0x186   :  { %v575_v6 = vld [vmem:[#allocation5 + $0xd90] sm:$0xff]  ;;  %v6574_v8 = vcombine.low %v455_v56, %v459_v59 }
 0x187   :  { %v579_v7 = vld [vmem:[#allocation5 + $0xdb0] sm:$0xff] }
 0x188   :  { %3618 = vmatpush2.bf16.msra.mxu0 %v6374_v0  ;;  %3661 = vmatpush2.bf16.msra.mxu1 %v6502_v1  ;;  %v6454_v0 = vcombine.low %v335_v50, %v339_v51  ;;  %v6575_v1 = vcombine.high %v455_v56, %v459_v59  ;;  %v6695_v14 = vcombine.high %v575_v6, %v579_v7  ;;  %v439_v16 = vld [vmem:[#allocation5 + $0x950] sm:$0xff] }
 0x189   :  { %3619 = vmatprep.subr.bf16.mxu0 %v6367_v2  ;;  %3662 = vmatprep.subr.bf16.mxu1 %v6495_v3  ;;  %v6703_v2 = vcombine.high %v583_v60, %v587_v61  ;;  %v447_v3 = vld [vmem:[#allocation5 + $0x990] sm:$0xff]  ;;  %v6694_v27 = vcombine.low %v575_v6, %v579_v7 }
 0x18a   :  { %v443_v17 = vld [vmem:[#allocation5 + $0x970] sm:$0xff]  ;;  %v6566_v24 = vcombine.low %v447_v3, %v451_v5 }
 0x18b   :  { %v6559_v28 = vcombine.high %v439_v16, %v443_v17  ;;  %v435_v33 = vld [vmem:[#allocation5 + $0x930] sm:$0xff] }
 0x18c   :  { %3620 = vmatpush2.bf16.msra.mxu0 %v6366_v9  ;;  %3663 = vmatpush2.bf16.msra.mxu1 %v6494_v10  ;;  %v7848_v9 = vpop.f32.mrf.mxu0  ;;  %v6702_v10 = vcombine.low %v583_v60, %v587_v61  ;;  %v559_v35 = vld [vmem:[#allocation5 + $0xd10] sm:$0xff] }
 0x18d   :  { %3621 = vmatprep.subr.bf16.mxu0 %v6359_v11  ;;  %3664 = vmatprep.subr.bf16.mxu1 %v6487_v12  ;;  %v6567_v11 = vcombine.high %v447_v3, %v451_v5  ;;  %v7850_v12 = vpop.f32.mrf.mxu1  ;;  %v563_v36 = vld [vmem:[#allocation5 + $0xd30] sm:$0xff] }
 0x18e   :  { %v6679_v49 = vcombine.high %v559_v35, %v563_v36  ;;  %v423_v50 = vld [vmem:[#allocation5 + $0x8d0] sm:$0xff] }
 0x18f   :  { %v427_v51 = vld [vmem:[#allocation5 + $0x8f0] sm:$0xff] }
 0x190   :  { %3622 = vmatpush2.bf16.msra.mxu0 %v6358_v19  ;;  %3665 = vmatpush2.bf16.msra.mxu1 %v6486_v20  ;;  %v567_v19 = vld [vmem:[#allocation5 + $0xd50] sm:$0xff]  ;;  %v6543_v59 = vcombine.high %v423_v50, %v427_v51  ;;  %v6542_v3 = vcombine.low %v423_v50, %v427_v51 }
 0x191   :  { %3623 = vmatprep.subr.bf16.mxu0 %v6351_v22  ;;  %3666 = vmatprep.subr.bf16.mxu1 %v6479_v23  ;;  %v571_v20 = vld [vmem:[#allocation5 + $0xd70] sm:$0xff] }
 0x194   :  { %3624 = vmatpush2.bf16.msra.mxu0 %v6350_v29  ;;  %3667 = vmatpush2.bf16.msra.mxu1 %v6478_v30 }
 0x195   :  { %3625 = vmatprep.subr.bf16.mxu0 %v6343_v31  ;;  %3668 = vmatprep.subr.bf16.mxu1 %v6471_v32  ;;  %v6687_v31 = vcombine.high %v567_v19, %v571_v20  ;;  %v431_v32 = vld [vmem:[#allocation5 + $0x910] sm:$0xff] }
 0x196   :  { %v6550_v56 = vcombine.low %v431_v32, %v435_v33 }
 0x198   :  { %3626 = vmatpush2.bf16.msra.mxu0 %v6342_v40  ;;  %3669 = vmatpush2.bf16.msra.mxu1 %v6470_v41  ;;  %v6558_v40 = vcombine.low %v439_v16, %v443_v17 }
 0x199   :  { %3627 = vmatprep.subr.bf16.mxu0 %v6335_v44  ;;  %3670 = vmatprep.subr.bf16.mxu1 %v6463_v45  ;;  %v6686_v44 = vcombine.low %v567_v19, %v571_v20  ;;  %v6551_v45 = vcombine.high %v431_v32, %v435_v33  ;;  %v399_v20 = vld [vmem:[#allocation5 + $0x810] sm:$0xff] }
 0x19a   :  { %v519_v32 = vld [vmem:[#allocation5 + $0xbd0] sm:$0xff] }
 0x19b   :  { %v523_v33 = vld [vmem:[#allocation5 + $0xbf0] sm:$0xff] }
 0x19c   :  { %3628 = vmatpush2.bf16.msra.mxu0 %v6334_v52  ;;  %3671 = vmatpush2.bf16.msra.mxu1 %v6462_v53  ;;  %v551_v52 = vld [vmem:[#allocation5 + $0xcd0] sm:$0xff]  ;;  %v6638_v50 = vcombine.low %v519_v32, %v523_v33 }
 0x19d   :  { %3629 = vmatprep.subr.bf16.mxu0 %v6327_v54  ;;  %3672 = vmatprep.subr.bf16.mxu1 %v6455_v55  ;;  %v555_v53 = vld [vmem:[#allocation5 + $0xcf0] sm:$0xff] }
 0x19e   :  { %v6671_v61 = vcombine.high %v551_v52, %v555_v53  ;;  %v6670_v5 = vcombine.low %v551_v52, %v555_v53 }
 0x1a0   :  { %3630 = vmatpush2.bf16.msra.mxu0 %v6326_v62  ;;  %3673 = vmatpush2.bf16.msra.mxu1 %v6454_v0  ;;  %v415_v62 = vld [vmem:[#allocation5 + $0x890] sm:$0xff] }
 0x1a1   :  { %3685 = vmatprep.subr.bf16.mxu0 %v6575_v1  ;;  %3728 = vmatprep.subr.bf16.mxu1 %v6703_v2  ;;  %v419_v0 = vld [vmem:[#allocation5 + $0x8b0] sm:$0xff] }
 0x1a2   :  { %v543_v1 = vld [vmem:[#allocation5 + $0xc90] sm:$0xff]  ;;  %v6535_v6 = vcombine.high %v415_v62, %v419_v0  ;;  %v6534_v16 = vcombine.low %v415_v62, %v419_v0 }
 0x1a3   :  { %v3375_v18 = vpop.f32.mrf.mxu0  ;;  %3632 = vmatmul.mubr.bf16.vlgmr.msra.gmra.mxu0 %v7804_v21  ;;  %v3418_v23 = vpop.f32.mrf.mxu1  ;;  %3675 = vmatmul.mubr.bf16.vlgmr.msra.gmra.mxu1 %v7806_v25  ;;  %v547_v2 = vld [vmem:[#allocation5 + $0xcb0] sm:$0xff] }
 0x1a4   :  { %v3376_v22 = vadd.f32 %v3375_v18, %v7840_v42  ;;  %3686 = vmatpush1.bf16.msra.mxu0 %v6574_v8  ;;  %3729 = vmatpush1.bf16.msra.mxu1 %v6702_v10  ;;  %v6663_v7 = vcombine.high %v543_v1, %v547_v2  ;;  %v407_v8 = vld [vmem:[#allocation5 + $0x850] sm:$0xff]  ;;  %v6662_v17 = vcombine.low %v543_v1, %v547_v2 }
 0x1a5   :  { %v7855_v26 = vpop.f32.mrf.mxu0  ;;  %3687 = vmatprep.subr.bf16.mxu0 %v6567_v11  ;;  %v7857_v30 = vpop.f32.mrf.mxu1  ;;  %3730 = vmatprep.subr.bf16.mxu1 %v6695_v14  ;;  %v411_v10 = vld [vmem:[#allocation5 + $0x870] sm:$0xff] }
 0x1a6   :  { %v3419_v29 = vadd.f32 %v3418_v23, %v3376_v22  ;;  %3717 = vmatprep.mubr.bf16.mxu0 %v7808_v34  ;;  %3760 = vmatprep.mubr.bf16.mxu1 %v7811_v37  ;;  %v535_v11 = vld [vmem:[#allocation5 + $0xc50] sm:$0xff]  ;;  %v6527_v18 = vcombine.high %v407_v8, %v411_v10 }
 0x1a7   :  { %v3379_v42 = vpop.f32.mrf.mxu0  ;;  %v3422_v41 = vpop.f32.mrf.mxu1  ;;  %v539_v14 = vld [vmem:[#allocation5 + $0xc70] sm:$0xff] }
 0x1a8   :  { %v3380_v38 = vadd.f32 %v3379_v42, %v7846_v57  ;;  %3688 = vmatpush1.bf16.msra.mxu0 %v6566_v24  ;;  %3731 = vmatpush1.bf16.msra.mxu1 %v6694_v27  ;;  %v3943_v54 = vmax.f32 %v3419_v29, 0.0  ;;  %v6678_v57 = vcombine.low %v559_v35, %v563_v36  ;;  %v6655_v19 = vcombine.high %v535_v11, %v539_v14  ;;  %v403_v22 = vld [vmem:[#allocation5 + $0x830] sm:$0xff] }
 0x1a9   :  { %3689 = vmatprep.subr.bf16.mxu0 %v6559_v28  ;;  %3732 = vmatprep.subr.bf16.mxu1 %v6687_v31  ;;  %v527_v23 = vld [vmem:[#allocation5 + $0xc10] sm:$0xff]  ;;  %v6526_v27 = vcombine.low %v407_v8, %v411_v10  ;;  %v6654_v28 = vcombine.low %v535_v11, %v539_v14  ;;  %v6519_v29 = vcombine.high %v399_v20, %v403_v22 }
 0x1aa   :  { %v3423_v48 = vadd.f32 %v3422_v41, %v3380_v38  ;;  %v531_v24 = vld [vmem:[#allocation5 + $0xc30] sm:$0xff]  ;;  %v6518_v36 = vcombine.low %v399_v20, %v403_v22 }
 0x1ab   :  { %v6647_v31 = vcombine.high %v527_v23, %v531_v24  ;;  %v647_v42 = vld [vmem:[#allocation5 + $0xfd0] sm:$0xff]  ;;  %v6646_v38 = vcombine.low %v527_v23, %v531_v24 }
 0x1ac   :  { %v3951_v55 = vmax.f32 %v3423_v48, 0.0  ;;  %3690 = vmatpush1.bf16.msra.mxu0 %v6558_v40  ;;  %3733 = vmatpush1.bf16.msra.mxu1 %v6686_v44  ;;  %v651_v35 = vld [vmem:[#allocation5 + $0xff0] sm:$0xff]  ;;  %v6639_v40 = vcombine.high %v519_v32, %v523_v33 }
 0x1ad   :  { %3691 = vmatprep.subr.bf16.mxu0 %v6551_v45  ;;  %3734 = vmatprep.subr.bf16.mxu1 %v6679_v49  ;;  %v6767_v41 = vcombine.high %v647_v42, %v651_v35  ;;  %v511_v44 = vld [vmem:[#allocation5 + $0xb90] sm:$0xff]  ;;  %v6766_v51 = vcombine.low %v647_v42, %v651_v35 }
 0x1ae   :  { %v7862_v60 = vpack.c.bf16 %v3951_v55, %v3943_v54  ;;  %v515_v45 = vld [vmem:[#allocation5 + $0xbb0] sm:$0xff] }
 0x1af   :  { %v639_v48 = vld [vmem:[#allocation5 + $0xf90] sm:$0xff]  ;;  %v6631_v52 = vcombine.high %v511_v44, %v515_v45 }
 0x1b0   :  { %3692 = vmatpush1.bf16.msra.mxu0 %v6550_v56  ;;  %3735 = vmatpush1.bf16.msra.mxu1 %v6678_v57  ;;  %v643_v49 = vld [vmem:[#allocation5 + $0xfb0] sm:$0xff] }
 0x1b1   :  { %3693 = vmatprep.subr.bf16.mxu0 %v6543_v59  ;;  %3736 = vmatprep.subr.bf16.mxu1 %v6671_v61  ;;  %v6759_v53 = vcombine.high %v639_v48, %v643_v49  ;;  %v503_v54 = vld [vmem:[#allocation5 + $0xb50] sm:$0xff]  ;;  %v6630_v59 = vcombine.low %v511_v44, %v515_v45  ;;  %v6758_v61 = vcombine.low %v639_v48, %v643_v49 }
 0x1b2   :  { %v507_v55 = vld [vmem:[#allocation5 + $0xb70] sm:$0xff] }
 0x1b3   :  { %v631_v56 = vld [vmem:[#allocation5 + $0xf50] sm:$0xff]  ;;  %v6623_v62 = vcombine.high %v503_v54, %v507_v55 }
 0x1b4   :  { %3694 = vmatpush1.bf16.msra.mxu0 %v6542_v3  ;;  %3737 = vmatpush1.bf16.msra.mxu1 %v6670_v5  ;;  %v635_v57 = vld [vmem:[#allocation5 + $0xf70] sm:$0xff] }
 0x1b5   :  { %3695 = vmatprep.subr.bf16.mxu0 %v6535_v6  ;;  %3738 = vmatprep.subr.bf16.mxu1 %v6663_v7  ;;  %v6751_v0 = vcombine.high %v631_v56, %v635_v57  ;;  %v495_v1 = vld [vmem:[#allocation5 + $0xb10] sm:$0xff]  ;;  %v6622_v6 = vcombine.low %v503_v54, %v507_v55  ;;  %v6750_v7 = vcombine.low %v631_v56, %v635_v57  ;;  %v200_v56 = vld [vmem:[#allocation5 + $0x1d8] sm:$0xff] }
 0x1b6   :  { %v499_v2 = vld [vmem:[#allocation5 + $0xb30] sm:$0xff]  ;;  %v204_v57 = vld [vmem:[#allocation5 + $0x1f8] sm:$0xff] }
 0x1b7   :  { %v623_v3 = vld [vmem:[#allocation5 + $0xf10] sm:$0xff]  ;;  %v6615_v8 = vcombine.high %v495_v1, %v499_v2 }
 0x1b8   :  { %3696 = vmatpush1.bf16.msra.mxu0 %v6534_v16  ;;  %3739 = vmatpush1.bf16.msra.mxu1 %v6662_v17  ;;  %v627_v5 = vld [vmem:[#allocation5 + $0xf30] sm:$0xff] }
 0x1b9   :  { %3697 = vmatprep.subr.bf16.mxu0 %v6527_v18  ;;  %3740 = vmatprep.subr.bf16.mxu1 %v6655_v19  ;;  %v6743_v10 = vcombine.high %v623_v3, %v627_v5  ;;  %v487_v11 = vld [vmem:[#allocation5 + $0xad0] sm:$0xff]  ;;  %v6614_v18 = vcombine.low %v495_v1, %v499_v2  ;;  %v6742_v19 = vcombine.low %v623_v3, %v627_v5  ;;  %v192_v5 = vld [vmem:[#allocation5 + $0x198] sm:$0xff] }
 0x1ba   :  { %v491_v14 = vld [vmem:[#allocation5 + $0xaf0] sm:$0xff]  ;;  %v6321_v2 = vcombine.high %v200_v56, %v204_v57 }
 0x1bb   :  { %v615_v16 = vld [vmem:[#allocation5 + $0xed0] sm:$0xff]  ;;  %v6607_v20 = vcombine.high %v487_v11, %v491_v14 }
 0x1bc   :  { %3698 = vmatpush1.bf16.msra.mxu0 %v6526_v27  ;;  %3741 = vmatpush1.bf16.msra.mxu1 %v6654_v28  ;;  %v619_v17 = vld [vmem:[#allocation5 + $0xef0] sm:$0xff] }
 0x1bd   :  { %3699 = vmatprep.subr.bf16.mxu0 %v6519_v29  ;;  %3742 = vmatprep.subr.bf16.mxu1 %v6647_v31  ;;  %v6735_v22 = vcombine.high %v615_v16, %v619_v17  ;;  %v479_v23 = vld [vmem:[#allocation5 + $0xa90] sm:$0xff]  ;;  %v6606_v29 = vcombine.low %v487_v11, %v491_v14  ;;  %v6734_v31 = vcombine.low %v615_v16, %v619_v17  ;;  %v7868_v14 = vpop.f32.mrf.mxu0 }
 0x1be   :  { %v483_v24 = vld [vmem:[#allocation5 + $0xab0] sm:$0xff]  ;;  %v6320_v11 = vcombine.low %v200_v56, %v204_v57  ;;  %v172_v56 = vld [vmem:[#allocation5 + $0xf8] sm:$0xff] }
 0x1bf   :  { %v607_v27 = vld [vmem:[#allocation5 + $0xe90] sm:$0xff]  ;;  %v6599_v32 = vcombine.high %v479_v23, %v483_v24  ;;  %v300_v57 = vld [vmem:[#allocation5 + $0x4f8] sm:$0xff] }
 0x1c0   :  { %3700 = vmatpush1.bf16.msra.mxu0 %v6518_v36  ;;  %3743 = vmatpush1.bf16.msra.mxu1 %v6646_v38  ;;  %v611_v28 = vld [vmem:[#allocation5 + $0xeb0] sm:$0xff] }
 0x1c1   :  { %3701 = vmatprep.subr.bf16.mxu0 %v6639_v40  ;;  %3744 = vmatprep.subr.bf16.mxu1 %v6767_v41  ;;  %v6727_v33 = vcombine.high %v607_v27, %v611_v28  ;;  %v471_v42 = vld [vmem:[#allocation5 + $0xa50] sm:$0xff]  ;;  %v6598_v40 = vcombine.low %v479_v23, %v483_v24  ;;  %v6726_v41 = vcombine.low %v607_v27, %v611_v28  ;;  %v312_v24 = vld [vmem:[#allocation5 + $0x558] sm:$0xff] }
 0x1c2   :  { %v475_v35 = vld [vmem:[#allocation5 + $0xa70] sm:$0xff]  ;;  %v316_v27 = vld [vmem:[#allocation5 + $0x578] sm:$0xff] }
 0x1c3   :  { %v599_v36 = vld [vmem:[#allocation5 + $0xe50] sm:$0xff]  ;;  %v6591_v44 = vcombine.high %v471_v42, %v475_v35 }
 0x1c4   :  { %3702 = vmatpush2.bf16.msra.mxu0 %v6638_v50  ;;  %3745 = vmatpush2.bf16.msra.mxu1 %v6766_v51  ;;  %v603_v38 = vld [vmem:[#allocation5 + $0xe70] sm:$0xff] }
 0x1c5   :  { %3703 = vmatprep.subr.bf16.mxu0 %v6631_v52  ;;  %3746 = vmatprep.subr.bf16.mxu1 %v6759_v53  ;;  %v6719_v45 = vcombine.high %v599_v36, %v603_v38  ;;  %v463_v48 = vld [vmem:[#allocation5 + $0xa10] sm:$0xff]  ;;  %v6590_v52 = vcombine.low %v471_v42, %v475_v35  ;;  %v6718_v53 = vcombine.low %v599_v36, %v603_v38  ;;  %v176_v38 = vld [vmem:[#allocation5 + $0x118] sm:$0xff] }
 0x1c6   :  { %v467_v49 = vld [vmem:[#allocation5 + $0xa30] sm:$0xff]  ;;  %v6433_v36 = vcombine.high %v312_v24, %v316_v27 }
 0x1c7   :  { %v591_v50 = vld [vmem:[#allocation5 + $0xe10] sm:$0xff]  ;;  %v6583_v54 = vcombine.high %v463_v48, %v467_v49 }
 0x1c8   :  { %3704 = vmatpush2.bf16.msra.mxu0 %v6630_v59  ;;  %3747 = vmatpush2.bf16.msra.mxu1 %v6758_v61  ;;  %v595_v51 = vld [vmem:[#allocation5 + $0xe30] sm:$0xff]  ;;  %v328_v59 = vld [vmem:[#allocation5 + $0x5d8] sm:$0xff] }
 0x1c9   :  { %3705 = vmatprep.subr.bf16.mxu0 %v6623_v62  ;;  %3748 = vmatprep.subr.bf16.mxu1 %v6751_v0  ;;  %v6711_v55 = vcombine.high %v591_v50, %v595_v51  ;;  %v332_v61 = vld [vmem:[#allocation5 + $0x5f8] sm:$0xff]  ;;  %v6582_v62 = vcombine.low %v463_v48, %v467_v49  ;;  %v665_v0 = vsub.s32 2, %v7828_v4  ;;  %v6710_v1 = vcombine.low %v591_v50, %v595_v51 }
 0x1ca   :  { %v6449_v3 = vcombine.high %v328_v59, %v332_v61  ;;  %v6448_v16 = vcombine.low %v328_v59, %v332_v61  ;;  %v6432_v51 = vcombine.low %v312_v24, %v316_v27  ;;  %v144_v27 = vld [vmem:[#allocation5 + $0x18] sm:$0xff] }
 0x1cc   :  { %3706 = vmatpush2.bf16.msra.mxu0 %v6622_v6  ;;  %3749 = vmatpush2.bf16.msra.mxu1 %v6750_v7  ;;  %v196_v6 = vld [vmem:[#allocation5 + $0x1b8] sm:$0xff] }
 0x1cd   :  { %3707 = vmatprep.subr.bf16.mxu0 %v6615_v8  ;;  %3750 = vmatprep.subr.bf16.mxu1 %v6743_v10  ;;  %v320_v7 = vld [vmem:[#allocation5 + $0x598] sm:$0xff]  ;;  %v666_v10 = vrot.slane %v7831_v15, %v665_v0  ;;  %v6313_v17 = vcombine.high %v192_v5, %v196_v6 }
 0x1ce   :  { %v324_v8 = vld [vmem:[#allocation5 + $0x5b8] sm:$0xff] }
 0x1d0   :  { %3708 = vmatpush2.bf16.msra.mxu0 %v6614_v18  ;;  %3751 = vmatpush2.bf16.msra.mxu1 %v6742_v19  ;;  %v7870_v18 = vpop.f32.mrf.mxu1  ;;  %v6441_v19 = vcombine.high %v320_v7, %v324_v8 }
 0x1d1   :  { %3709 = vmatprep.subr.bf16.mxu0 %v6607_v20  ;;  %3752 = vmatprep.subr.bf16.mxu1 %v6735_v22  ;;  %v184_v20 = vld [vmem:[#allocation5 + $0x158] sm:$0xff] }
 0x1d2   :  { %v188_v22 = vld [vmem:[#allocation5 + $0x178] sm:$0xff] }
 0x1d3   :  { %v6304_v49 = vcombine.low %v184_v20, %v188_v22 }
 0x1d4   :  { %3710 = vmatpush2.bf16.msra.mxu0 %v6606_v29  ;;  %3753 = vmatpush2.bf16.msra.mxu1 %v6734_v31  ;;  %v6312_v29 = vcombine.low %v192_v5, %v196_v6  ;;  %v292_v5 = vld [vmem:[#allocation5 + $0x4b8] sm:$0xff] }
 0x1d5   :  { %3711 = vmatprep.subr.bf16.mxu0 %v6599_v32  ;;  %3754 = vmatprep.subr.bf16.mxu1 %v6727_v33  ;;  %v6440_v32 = vcombine.low %v320_v7, %v324_v8  ;;  %v6305_v33 = vcombine.high %v184_v20, %v188_v22 }
 0x1d8   :  { %3712 = vmatpush2.bf16.msra.mxu0 %v6598_v40  ;;  %3755 = vmatpush2.bf16.msra.mxu1 %v6726_v41  ;;  %v180_v40 = vld [vmem:[#allocation5 + $0x138] sm:$0xff] }
 0x1d9   :  { %3713 = vmatprep.subr.bf16.mxu0 %v6591_v44  ;;  %3756 = vmatprep.subr.bf16.mxu1 %v6719_v45  ;;  %v304_v44 = vld [vmem:[#allocation5 + $0x518] sm:$0xff]  ;;  %v6296_v59 = vcombine.low %v176_v38, %v180_v40 }
 0x1da   :  { %v308_v45 = vld [vmem:[#allocation5 + $0x538] sm:$0xff] }
 0x1dc   :  { %3714 = vmatpush2.bf16.msra.mxu0 %v6590_v52  ;;  %3757 = vmatpush2.bf16.msra.mxu1 %v6718_v53  ;;  %v6297_v52 = vcombine.high %v176_v38, %v180_v40  ;;  %v264_v40 = vld [vmem:[#allocation5 + $0x3d8] sm:$0xff] }
 0x1dd   :  { %3715 = vmatprep.subr.bf16.mxu0 %v6583_v54  ;;  %3758 = vmatprep.subr.bf16.mxu1 %v6711_v55  ;;  %v6425_v54 = vcombine.high %v304_v44, %v308_v45  ;;  %v168_v55 = vld [vmem:[#allocation5 + $0xd8] sm:$0xff] }
 0x1de   :  { %v6289_v61 = vcombine.high %v168_v55, %v172_v56  ;;  %v6288_v6 = vcombine.low %v168_v55, %v172_v56  ;;  %v384_v55 = vld [vmem:[#allocation5 + $0x798] sm:$0xff] }
 0x1df   :  { %v388_v56 = vld [vmem:[#allocation5 + $0x7b8] sm:$0xff] }
 0x1e0   :  { %3716 = vmatpush2.bf16.msra.mxu0 %v6582_v62  ;;  %3759 = vmatpush2.bf16.msra.mxu1 %v6710_v1  ;;  %v160_v1 = vld [vmem:[#allocation5 + $0x98] sm:$0xff] }
 0x1e1   :  { %3771 = vmatprep.subr.bf16.mxu0 %v6321_v2  ;;  %3814 = vmatprep.subr.bf16.mxu1 %v6449_v3  ;;  %v164_v2 = vld [vmem:[#allocation5 + $0xb8] sm:$0xff] }
 0x1e2   :  { %v288_v3 = vld [vmem:[#allocation5 + $0x498] sm:$0xff]  ;;  %v6281_v8 = vcombine.high %v160_v1, %v164_v2  ;;  %v6280_v20 = vcombine.low %v160_v1, %v164_v2 }
 0x1e3   :  { %v3461_v23 = vpop.f32.mrf.mxu0  ;;  %3718 = vmatmul.mubr.bf16.vlgmr.msra.gmra.mxu0 %v7816_v46  ;;  %v3504_v15 = vpop.f32.mrf.mxu1  ;;  %3761 = vmatmul.mubr.bf16.vlgmr.msra.gmra.mxu1 %v7818_v47  ;;  %v6408_v22 = vcombine.low %v288_v3, %v292_v5  ;;  %v376_v1 = vld [vmem:[#allocation5 + $0x758] sm:$0xff] }
 0x1e4   :  { %v3462_v28 = vadd.f32 %v3461_v23, %v666_v10  ;;  %3772 = vmatpush1.bf16.msra.mxu0 %v6320_v11  ;;  %3815 = vmatpush1.bf16.msra.mxu1 %v6448_v16  ;;  %v152_v11 = vld [vmem:[#allocation5 + $0x58] sm:$0xff] }
 0x1e5   :  { %v7874_v31 = vpop.f32.mrf.mxu0  ;;  %3773 = vmatprep.subr.bf16.mxu0 %v6313_v17  ;;  %v7878_v35 = vpop.f32.mrf.mxu1  ;;  %3816 = vmatprep.subr.bf16.mxu1 %v6441_v19  ;;  %v156_v16 = vld [vmem:[#allocation5 + $0x78] sm:$0xff] }
 0x1e6   :  { %v7876_v42 = vadd.f32 %v3504_v15, %v3462_v28  ;;  %3803 = vmatprep.mubr.bf16.mxu0 %v7798_v58  ;;  %3846 = vmatprep.mubr.bf16.mxu1 %v7800_v63  ;;  %v296_v58 = vld [vmem:[#allocation5 + $0x4d8] sm:$0xff]  ;;  %v6424_v63 = vcombine.low %v304_v44, %v308_v45  ;;  %v6273_v23 = vcombine.high %v152_v11, %v156_v16 }
 0x1e7   :  { %v3465_v41 = vpop.f32.mrf.mxu0  ;;  %v3508_v50 = vpop.f32.mrf.mxu1  ;;  %v6417_v62 = vcombine.high %v296_v58, %v300_v57  ;;  %v6416_v7 = vcombine.low %v296_v58, %v300_v57  ;;  %v280_v17 = vld [vmem:[#allocation5 + $0x458] sm:$0xff] }
 0x1e8   :  { %v3466_v48 = vadd.f32 %v3465_v41, %v666_v10  ;;  %3774 = vmatpush1.bf16.msra.mxu0 %v6312_v29  ;;  %3817 = vmatpush1.bf16.msra.mxu1 %v6440_v32  ;;  %v6409_v10 = vcombine.high %v288_v3, %v292_v5  ;;  %v284_v19 = vld [vmem:[#allocation5 + $0x478] sm:$0xff]  ;;  %v6272_v32 = vcombine.low %v152_v11, %v156_v16 }
 0x1e9   :  { %3775 = vmatprep.subr.bf16.mxu0 %v6305_v33  ;;  %3818 = vmatprep.subr.bf16.mxu1 %v6433_v36  ;;  %v6401_v24 = vcombine.high %v280_v17, %v284_v19  ;;  %v148_v28 = vld [vmem:[#allocation5 + $0x38] sm:$0xff]  ;;  %v6400_v33 = vcombine.low %v280_v17, %v284_v19  ;;  %v6504_v5 = vcombine.low %v384_v55, %v388_v56 }
 0x1ea   :  { %v7882_v53 = vadd.f32 %v3508_v50, %v3466_v48  ;;  %v272_v15 = vld [vmem:[#allocation5 + $0x418] sm:$0xff]  ;;  %v6265_v36 = vcombine.high %v144_v27, %v148_v28  ;;  %v6264_v48 = vcombine.low %v144_v27, %v148_v28 }
 0x1eb   :  { %v276_v29 = vld [vmem:[#allocation5 + $0x438] sm:$0xff] }
 0x1ec   :  { %3776 = vmatpush1.bf16.msra.mxu0 %v6304_v49  ;;  %3819 = vmatpush1.bf16.msra.mxu1 %v6432_v51  ;;  %v6393_v38 = vcombine.high %v272_v15, %v276_v29  ;;  %v268_v41 = vld [vmem:[#allocation5 + $0x3f8] sm:$0xff]  ;;  %v6392_v49 = vcombine.low %v272_v15, %v276_v29 }
 0x1ed   :  { %3777 = vmatprep.subr.bf16.mxu0 %v6297_v52  ;;  %3820 = vmatprep.subr.bf16.mxu1 %v6425_v54  ;;  %v392_v44 = vld [vmem:[#allocation5 + $0x7d8] sm:$0xff]  ;;  %v6385_v50 = vcombine.high %v264_v40, %v268_v41  ;;  %v6384_v58 = vcombine.low %v264_v40, %v268_v41 }
 0x1ee   :  { %v396_v45 = vld [vmem:[#allocation5 + $0x7f8] sm:$0xff] }
 0x1ef   :  { %v6513_v51 = vcombine.high %v392_v44, %v396_v45  ;;  %v256_v52 = vld [vmem:[#allocation5 + $0x398] sm:$0xff]  ;;  %v6512_v57 = vcombine.low %v392_v44, %v396_v45 }
 0x1f0   :  { %3778 = vmatpush1.bf16.msra.mxu0 %v6296_v59  ;;  %3821 = vmatpush1.bf16.msra.mxu1 %v6424_v63  ;;  %v260_v54 = vld [vmem:[#allocation5 + $0x3b8] sm:$0xff]  ;;  %v6505_v63 = vcombine.high %v384_v55, %v388_v56 }
 0x1f1   :  { %3779 = vmatprep.subr.bf16.mxu0 %v6289_v61  ;;  %3822 = vmatprep.subr.bf16.mxu1 %v6417_v62  ;;  %v6377_v59 = vcombine.high %v256_v52, %v260_v54  ;;  %v248_v61 = vld [vmem:[#allocation5 + $0x358] sm:$0xff]  ;;  %v6376_v3 = vcombine.low %v256_v52, %v260_v54 }
 0x1f2   :  { %v252_v62 = vld [vmem:[#allocation5 + $0x378] sm:$0xff] }
 0x1f3   :  { %v380_v2 = vld [vmem:[#allocation5 + $0x778] sm:$0xff]  ;;  %v6368_v17 = vcombine.low %v248_v61, %v252_v62 }
 0x1f4   :  { %3780 = vmatpush1.bf16.msra.mxu0 %v6288_v6  ;;  %3823 = vmatpush1.bf16.msra.mxu1 %v6416_v7  ;;  %v6369_v6 = vcombine.high %v248_v61, %v252_v62  ;;  %v6497_v7 = vcombine.high %v376_v1, %v380_v2  ;;  %v368_v11 = vld [vmem:[#allocation5 + $0x718] sm:$0xff]  ;;  %v6496_v19 = vcombine.low %v376_v1, %v380_v2 }
 0x1f5   :  { %3781 = vmatprep.subr.bf16.mxu0 %v6281_v8  ;;  %3824 = vmatprep.subr.bf16.mxu1 %v6409_v10  ;;  %v240_v8 = vld [vmem:[#allocation5 + $0x318] sm:$0xff] }
 0x1f6   :  { %v244_v10 = vld [vmem:[#allocation5 + $0x338] sm:$0xff] }
 0x1f7   :  { %v372_v16 = vld [vmem:[#allocation5 + $0x738] sm:$0xff]  ;;  %v6360_v15 = vcombine.low %v240_v8, %v244_v10 }
 0x1f8   :  { %3782 = vmatpush1.bf16.msra.mxu0 %v6280_v20  ;;  %3825 = vmatpush1.bf16.msra.mxu1 %v6408_v22  ;;  %v6361_v20 = vcombine.high %v240_v8, %v244_v10  ;;  %v6489_v22 = vcombine.high %v368_v11, %v372_v16  ;;  %v360_v27 = vld [vmem:[#allocation5 + $0x6d8] sm:$0xff]  ;;  %v6488_v29 = vcombine.low %v368_v11, %v372_v16 }
 0x1f9   :  { %3783 = vmatprep.subr.bf16.mxu0 %v6273_v23  ;;  %3826 = vmatprep.subr.bf16.mxu1 %v6401_v24  ;;  %v232_v23 = vld [vmem:[#allocation5 + $0x2d8] sm:$0xff] }
 0x1fa   :  { %v236_v24 = vld [vmem:[#allocation5 + $0x2f8] sm:$0xff] }
 0x1fb   :  { %v364_v28 = vld [vmem:[#allocation5 + $0x6f8] sm:$0xff]  ;;  %v6352_v44 = vcombine.low %v232_v23, %v236_v24 }
 0x1fc   :  { %3784 = vmatpush1.bf16.msra.mxu0 %v6272_v32  ;;  %3827 = vmatpush1.bf16.msra.mxu1 %v6400_v33  ;;  %v6353_v32 = vcombine.high %v232_v23, %v236_v24  ;;  %v6481_v33 = vcombine.high %v360_v27, %v364_v28  ;;  %v352_v40 = vld [vmem:[#allocation5 + $0x698] sm:$0xff]  ;;  %v6480_v45 = vcombine.low %v360_v27, %v364_v28  ;;  %v7884_v28 = vpop.f32.mrf.mxu0 }
 0x1fd   :  { %3785 = vmatprep.subr.bf16.mxu0 %v6265_v36  ;;  %3828 = vmatprep.subr.bf16.mxu1 %v6393_v38  ;;  %v224_v36 = vld [vmem:[#allocation5 + $0x298] sm:$0xff] }
 0x1fe   :  { %v228_v38 = vld [vmem:[#allocation5 + $0x2b8] sm:$0xff] }
 0x1ff   :  { %v356_v41 = vld [vmem:[#allocation5 + $0x6b8] sm:$0xff]  ;;  %v6344_v55 = vcombine.low %v224_v36, %v228_v38 }
 0x200   :  { %3786 = vmatpush1.bf16.msra.mxu0 %v6264_v48  ;;  %3829 = vmatpush1.bf16.msra.mxu1 %v6392_v49  ;;  %v6345_v48 = vcombine.high %v224_v36, %v228_v38  ;;  %v6473_v49 = vcombine.high %v352_v40, %v356_v41  ;;  %v344_v52 = vld [vmem:[#allocation5 + $0x658] sm:$0xff]  ;;  %v6472_v56 = vcombine.low %v352_v40, %v356_v41 }
 0x201   :  { %3787 = vmatprep.subr.bf16.mxu0 %v6385_v50  ;;  %3830 = vmatprep.subr.bf16.mxu1 %v6513_v51  ;;  %v216_v50 = vld [vmem:[#allocation5 + $0x258] sm:$0xff] }
 0x202   :  { %v220_v51 = vld [vmem:[#allocation5 + $0x278] sm:$0xff] }
 0x203   :  { %v348_v54 = vld [vmem:[#allocation5 + $0x678] sm:$0xff]  ;;  %v6336_v1 = vcombine.low %v216_v50, %v220_v51 }
 0x204   :  { %3788 = vmatpush2.bf16.msra.mxu0 %v6384_v58  ;;  %3831 = vmatpush2.bf16.msra.mxu1 %v6512_v57  ;;  %v6337_v58 = vcombine.high %v216_v50, %v220_v51  ;;  %v6465_v57 = vcombine.high %v344_v52, %v348_v54  ;;  %v336_v61 = vld [vmem:[#allocation5 + $0x618] sm:$0xff]  ;;  %v6464_v2 = vcombine.low %v344_v52, %v348_v54 }
 0x205   :  { %3789 = vmatprep.subr.bf16.mxu0 %v6377_v59  ;;  %3832 = vmatprep.subr.bf16.mxu1 %v6505_v63  ;;  %v208_v59 = vld [vmem:[#allocation5 + $0x218] sm:$0xff] }
 0x206   :  { %v212_v63 = vld [vmem:[#allocation5 + $0x238] sm:$0xff] }
 0x207   :  { %v340_v62 = vld [vmem:[#allocation5 + $0x638] sm:$0xff]  ;;  %v6328_v11 = vcombine.low %v208_v59, %v212_v63 }
 0x208   :  { %3790 = vmatpush2.bf16.msra.mxu0 %v6376_v3  ;;  %3833 = vmatpush2.bf16.msra.mxu1 %v6504_v5  ;;  %v6329_v3 = vcombine.high %v208_v59, %v212_v63  ;;  %v6457_v5 = vcombine.high %v336_v61, %v340_v62  ;;  %v584_v8 = vld [vmem:[#allocation5 + $0xdd8] sm:$0xff]  ;;  %v6456_v16 = vcombine.low %v336_v61, %v340_v62 }
 0x209   :  { %3791 = vmatprep.subr.bf16.mxu0 %v6369_v6  ;;  %3834 = vmatprep.subr.bf16.mxu1 %v6497_v7  ;;  %v456_v6 = vld [vmem:[#allocation5 + $0x9d8] sm:$0xff] }
 0x20a   :  { %v460_v7 = vld [vmem:[#allocation5 + $0x9f8] sm:$0xff] }
 0x20b   :  { %v588_v10 = vld [vmem:[#allocation5 + $0xdf8] sm:$0xff]  ;;  %v6576_v27 = vcombine.low %v456_v6, %v460_v7 }
 0x20c   :  { %3792 = vmatpush2.bf16.msra.mxu0 %v6368_v17  ;;  %3835 = vmatpush2.bf16.msra.mxu1 %v6496_v19  ;;  %v6577_v17 = vcombine.high %v456_v6, %v460_v7  ;;  %v6705_v19 = vcombine.high %v584_v8, %v588_v10  ;;  %v576_v23 = vld [vmem:[#allocation5 + $0xd98] sm:$0xff] }
 0x20d   :  { %3793 = vmatprep.subr.bf16.mxu0 %v6361_v20  ;;  %3836 = vmatprep.subr.bf16.mxu1 %v6489_v22  ;;  %v448_v20 = vld [vmem:[#allocation5 + $0x998] sm:$0xff] }
 0x20e   :  { %v452_v22 = vld [vmem:[#allocation5 + $0x9b8] sm:$0xff] }
 0x20f   :  { %v580_v24 = vld [vmem:[#allocation5 + $0xdb8] sm:$0xff] }
 0x210   :  { %3794 = vmatpush2.bf16.msra.mxu0 %v6360_v15  ;;  %3837 = vmatpush2.bf16.msra.mxu1 %v6488_v29  ;;  %v6704_v15 = vcombine.low %v584_v8, %v588_v10  ;;  %v6569_v29 = vcombine.high %v448_v20, %v452_v22  ;;  %v440_v36 = vld [vmem:[#allocation5 + $0x958] sm:$0xff]  ;;  %v6696_v51 = vcombine.low %v576_v23, %v580_v24 }
 0x211   :  { %3795 = vmatprep.subr.bf16.mxu0 %v6353_v32  ;;  %3838 = vmatprep.subr.bf16.mxu1 %v6481_v33  ;;  %v7886_v32 = vpop.f32.mrf.mxu1  ;;  %v6697_v33 = vcombine.high %v576_v23, %v580_v24  ;;  %v444_v38 = vld [vmem:[#allocation5 + $0x978] sm:$0xff] }
 0x212   :  { %v568_v41 = vld [vmem:[#allocation5 + $0xd58] sm:$0xff]  ;;  %v6561_v52 = vcombine.high %v440_v36, %v444_v38  ;;  %v6560_v63 = vcombine.low %v440_v36, %v444_v38 }
 0x213   :  { %v428_v6 = vld [vmem:[#allocation5 + $0x8f8] sm:$0xff] }
 0x214   :  { %3796 = vmatpush2.bf16.msra.mxu0 %v6352_v44  ;;  %3839 = vmatpush2.bf16.msra.mxu1 %v6480_v45  ;;  %v572_v44 = vld [vmem:[#allocation5 + $0xd78] sm:$0xff] }
 0x215   :  { %3797 = vmatprep.subr.bf16.mxu0 %v6345_v48  ;;  %3840 = vmatprep.subr.bf16.mxu1 %v6473_v49  ;;  %v6568_v49 = vcombine.low %v448_v20, %v452_v22  ;;  %v6688_v62 = vcombine.low %v568_v41, %v572_v44  ;;  %v556_v7 = vld [vmem:[#allocation5 + $0xcf8] sm:$0xff] }
 0x216   :  { %v420_v20 = vld [vmem:[#allocation5 + $0x8b8] sm:$0xff] }
 0x217   :  { %v544_v22 = vld [vmem:[#allocation5 + $0xc98] sm:$0xff] }
 0x218   :  { %3798 = vmatpush2.bf16.msra.mxu0 %v6344_v55  ;;  %3841 = vmatpush2.bf16.msra.mxu1 %v6472_v56  ;;  %v432_v56 = vld [vmem:[#allocation5 + $0x918] sm:$0xff] }
 0x219   :  { %3799 = vmatprep.subr.bf16.mxu0 %v6337_v58  ;;  %3842 = vmatprep.subr.bf16.mxu1 %v6465_v57  ;;  %v436_v58 = vld [vmem:[#allocation5 + $0x938] sm:$0xff] }
 0x21a   :  { %v560_v57 = vld [vmem:[#allocation5 + $0xd18] sm:$0xff] }
 0x21b   :  { %v548_v23 = vld [vmem:[#allocation5 + $0xcb8] sm:$0xff] }
 0x21c   :  { %3800 = vmatpush2.bf16.msra.mxu0 %v6336_v1  ;;  %3843 = vmatpush2.bf16.msra.mxu1 %v6464_v2  ;;  %v6553_v1 = vcombine.high %v432_v56, %v436_v58  ;;  %v412_v36 = vld [vmem:[#allocation5 + $0x878] sm:$0xff] }
 0x21d   :  { %3801 = vmatprep.subr.bf16.mxu0 %v6329_v3  ;;  %3844 = vmatprep.subr.bf16.mxu1 %v6457_v5  ;;  %v424_v5 = vld [vmem:[#allocation5 + $0x8d8] sm:$0xff] }
 0x21e   :  { %v6544_v24 = vcombine.low %v424_v5, %v428_v6  ;;  %v536_v38 = vld [vmem:[#allocation5 + $0xc58] sm:$0xff] }
 0x220   :  { %3802 = vmatpush2.bf16.msra.mxu0 %v6328_v11  ;;  %3845 = vmatpush2.bf16.msra.mxu1 %v6456_v16  ;;  %v6545_v11 = vcombine.high %v424_v5, %v428_v6  ;;  %v516_v5 = vld [vmem:[#allocation5 + $0xbb8] sm:$0xff] }
 0x221   :  { %3857 = vmatprep.subr.bf16.mxu0 %v6577_v17  ;;  %3900 = vmatprep.subr.bf16.mxu1 %v6705_v19  ;;  %v416_v19 = vld [vmem:[#allocation5 + $0x898] sm:$0xff] }
 0x222   :  { %v640_v6 = vld [vmem:[#allocation5 + $0xf98] sm:$0xff] }
 0x223   :  { %v3547_v40 = vpop.f32.mrf.mxu0  ;;  %3804 = vmatmul.mubr.bf16.vlgmr.msra.gmra.mxu0 %v7804_v21  ;;  %v3590_v48 = vpop.f32.mrf.mxu1  ;;  %3847 = vmatmul.mubr.bf16.vlgmr.msra.gmra.mxu1 %v7806_v25  ;;  %v6689_v21 = vcombine.high %v568_v41, %v572_v44  ;;  %v564_v25 = vld [vmem:[#allocation5 + $0xd38] sm:$0xff]  ;;  %v6536_v41 = vcombine.low %v416_v19, %v420_v20  ;;  %v6664_v44 = vcombine.low %v544_v22, %v548_v23 }
 0x224   :  { %v3548_v45 = vadd.f32 %v3547_v40, %v7876_v42  ;;  %3858 = vmatpush1.bf16.msra.mxu0 %v6576_v27  ;;  %3901 = vmatpush1.bf16.msra.mxu1 %v6704_v15  ;;  %v6681_v3 = vcombine.high %v560_v57, %v564_v25  ;;  %v6537_v15 = vcombine.high %v416_v19, %v420_v20  ;;  %v540_v40 = vld [vmem:[#allocation5 + $0xc78] sm:$0xff] }
 0x225   :  { %v7891_v50 = vpop.f32.mrf.mxu0  ;;  %3859 = vmatprep.subr.bf16.mxu0 %v6569_v29  ;;  %v7893_v55 = vpop.f32.mrf.mxu1  ;;  %3902 = vmatprep.subr.bf16.mxu1 %v6697_v33  ;;  %v6665_v29 = vcombine.high %v544_v22, %v548_v23  ;;  %v408_v33 = vld [vmem:[#allocation5 + $0x858] sm:$0xff] }
 0x226   :  { %v3591_v54 = vadd.f32 %v3590_v48, %v3548_v45  ;;  %3889 = vmatprep.mubr.bf16.mxu0 %v7808_v34  ;;  %3932 = vmatprep.mubr.bf16.mxu1 %v7811_v37  ;;  %v552_v34 = vld [vmem:[#allocation5 + $0xcd8] sm:$0xff]  ;;  %v6552_v37 = vcombine.low %v432_v56, %v436_v58  ;;  %v6529_v45 = vcombine.high %v408_v33, %v412_v36 }
 0x227   :  { %v3551_v42 = vpop.f32.mrf.mxu0  ;;  %v3594_v61 = vpop.f32.mrf.mxu1  ;;  %v6673_v17 = vcombine.high %v552_v34, %v556_v7  ;;  %v6672_v27 = vcombine.low %v552_v34, %v556_v7  ;;  %v6657_v48 = vcombine.high %v536_v38, %v540_v40  ;;  %v6656_v56 = vcombine.low %v536_v38, %v540_v40  ;;  %v644_v34 = vld [vmem:[#allocation5 + $0xfb8] sm:$0xff] }
 0x228   :  { %v3552_v59 = vadd.f32 %v3551_v42, %v7882_v53  ;;  %3860 = vmatpush1.bf16.msra.mxu0 %v6568_v49  ;;  %3903 = vmatpush1.bf16.msra.mxu1 %v6696_v51  ;;  %v3945_v8 = vmax.f32 %v3591_v54, 0.0  ;;  %v6680_v53 = vcombine.low %v560_v57, %v564_v25  ;;  %v400_v49 = vld [vmem:[#allocation5 + $0x818] sm:$0xff]  ;;  %v6760_v22 = vcombine.low %v640_v6, %v644_v34 }
 0x229   :  { %3861 = vmatprep.subr.bf16.mxu0 %v6561_v52  ;;  %3904 = vmatprep.subr.bf16.mxu1 %v6689_v21  ;;  %v404_v51 = vld [vmem:[#allocation5 + $0x838] sm:$0xff]  ;;  %v6528_v21 = vcombine.low %v408_v33, %v412_v36 }
 0x22a   :  { %v3595_v2 = vadd.f32 %v3594_v61, %v3552_v59  ;;  %v528_v52 = vld [vmem:[#allocation5 + $0xc18] sm:$0xff]  ;;  %v6521_v58 = vcombine.high %v400_v49, %v404_v51  ;;  %v6520_v61 = vcombine.low %v400_v49, %v404_v51 }
 0x22b   :  { %v532_v54 = vld [vmem:[#allocation5 + $0xc38] sm:$0xff] }
 0x22c   :  { %v3953_v10 = vmax.f32 %v3595_v2, 0.0  ;;  %3862 = vmatpush1.bf16.msra.mxu0 %v6560_v63  ;;  %3905 = vmatpush1.bf16.msra.mxu1 %v6688_v62  ;;  %v6649_v42 = vcombine.high %v528_v52, %v532_v54  ;;  %v520_v57 = vld [vmem:[#allocation5 + $0xbd8] sm:$0xff]  ;;  %v6648_v62 = vcombine.low %v528_v52, %v532_v54  ;;  %v669_v52 = vsub.s32 3, %v7828_v4 }
 0x22d   :  { %3863 = vmatprep.subr.bf16.mxu0 %v6553_v1  ;;  %3906 = vmatprep.subr.bf16.mxu1 %v6681_v3  ;;  %v524_v25 = vld [vmem:[#allocation5 + $0xbf8] sm:$0xff] }
 0x22e   :  { %v7898_v16 = vpack.c.bf16 %v3953_v10, %v3945_v8  ;;  %v648_v59 = vld [vmem:[#allocation5 + $0xfd8] sm:$0xff]  ;;  %v6641_v1 = vcombine.high %v520_v57, %v524_v25  ;;  %v6640_v7 = vcombine.low %v520_v57, %v524_v25  ;;  %v7902_v25 = vld [vmem:[#allocation7] sm:$0xff] }
 0x22f   :  { %v652_v63 = vld [vmem:[#allocation5 + $0xff8] sm:$0xff] }
 0x230   :  { %3864 = vmatpush1.bf16.msra.mxu0 %v6552_v37  ;;  %3907 = vmatpush1.bf16.msra.mxu1 %v6680_v53  ;;  %v6769_v2 = vcombine.high %v648_v59, %v652_v63  ;;  %v512_v3 = vld [vmem:[#allocation5 + $0xb98] sm:$0xff]  ;;  %v6768_v8 = vcombine.low %v648_v59, %v652_v63  ;;  %v6761_v37 = vcombine.high %v640_v6, %v644_v34 }
 0x231   :  { %3865 = vmatprep.subr.bf16.mxu0 %v6545_v11  ;;  %3908 = vmatprep.subr.bf16.mxu1 %v6673_v17  ;;  %v6633_v10 = vcombine.high %v512_v3, %v516_v5  ;;  %v504_v53 = vld [vmem:[#allocation5 + $0xb58] sm:$0xff]  ;;  %v6632_v20 = vcombine.low %v512_v3, %v516_v5 }
 0x232   :  { %v508_v11 = vld [vmem:[#allocation5 + $0xb78] sm:$0xff] }
 0x233   :  { %v632_v17 = vld [vmem:[#allocation5 + $0xf58] sm:$0xff]  ;;  %v6625_v23 = vcombine.high %v504_v53, %v508_v11  ;;  %v6624_v36 = vcombine.low %v504_v53, %v508_v11 }
 0x234   :  { %3866 = vmatpush1.bf16.msra.mxu0 %v6544_v24  ;;  %3909 = vmatpush1.bf16.msra.mxu1 %v6672_v27  ;;  %v636_v19 = vld [vmem:[#allocation5 + $0xf78] sm:$0xff] }
 0x235   :  { %3867 = vmatprep.subr.bf16.mxu0 %v6537_v15  ;;  %3910 = vmatprep.subr.bf16.mxu1 %v6665_v29  ;;  %v6753_v24 = vcombine.high %v632_v17, %v636_v19  ;;  %v496_v27 = vld [vmem:[#allocation5 + $0xb18] sm:$0xff]  ;;  %v6752_v38 = vcombine.low %v632_v17, %v636_v19  ;;  %v3553_v19 = vpop.f32.mrf.mxu0 }
 0x236   :  { %v500_v15 = vld [vmem:[#allocation5 + $0xb38] sm:$0xff] }
 0x237   :  { %v624_v29 = vld [vmem:[#allocation5 + $0xf18] sm:$0xff]  ;;  %v6617_v40 = vcombine.high %v496_v27, %v500_v15  ;;  %v6616_v54 = vcombine.low %v496_v27, %v500_v15 }
 0x238   :  { %3868 = vmatpush1.bf16.msra.mxu0 %v6536_v41  ;;  %3911 = vmatpush1.bf16.msra.mxu1 %v6664_v44  ;;  %v628_v33 = vld [vmem:[#allocation5 + $0xf38] sm:$0xff] }
 0x239   :  { %3869 = vmatprep.subr.bf16.mxu0 %v6529_v45  ;;  %3912 = vmatprep.subr.bf16.mxu1 %v6657_v48  ;;  %v6745_v41 = vcombine.high %v624_v29, %v628_v33  ;;  %v488_v44 = vld [vmem:[#allocation5 + $0xad8] sm:$0xff]  ;;  %v661_v48 = vsub.s32 1, %v7828_v4 }
 0x23a   :  { %v492_v45 = vld [vmem:[#allocation5 + $0xaf8] sm:$0xff] }
 0x23b   :  { %v616_v49 = vld [vmem:[#allocation5 + $0xed8] sm:$0xff]  ;;  %v662_v59 = vrot.slane %v7902_v25, %v661_v48 }
 0x23c   :  { %3870 = vmatpush1.bf16.msra.mxu0 %v6528_v21  ;;  %3913 = vmatpush1.bf16.msra.mxu1 %v6656_v56  ;;  %v620_v51 = vld [vmem:[#allocation5 + $0xef8] sm:$0xff]  ;;  %v6744_v21 = vcombine.low %v624_v29, %v628_v33  ;;  %v6609_v56 = vcombine.high %v488_v44, %v492_v45 }
 0x23d   :  { %3871 = vmatprep.subr.bf16.mxu0 %v6521_v58  ;;  %3914 = vmatprep.subr.bf16.mxu1 %v6649_v42  ;;  %v6737_v58 = vcombine.high %v616_v49, %v620_v51  ;;  %v480_v42 = vld [vmem:[#allocation5 + $0xa98] sm:$0xff]  ;;  %v6736_v3 = vcombine.low %v616_v49, %v620_v51 }
 0x23e   :  { %v484_v57 = vld [vmem:[#allocation5 + $0xab8] sm:$0xff] }
 0x23f   :  { %v608_v63 = vld [vmem:[#allocation5 + $0xe98] sm:$0xff]  ;;  %v6601_v5 = vcombine.high %v480_v42, %v484_v57  ;;  %v6600_v17 = vcombine.low %v480_v42, %v484_v57 }
 0x240   :  { %3872 = vmatpush1.bf16.msra.mxu0 %v6520_v61  ;;  %3915 = vmatpush1.bf16.msra.mxu1 %v6648_v62  ;;  %v612_v61 = vld [vmem:[#allocation5 + $0xeb8] sm:$0xff]  ;;  %v670_v62 = vrot.slane %v7902_v25, %v669_v52 }
 0x241   :  { %3873 = vmatprep.subr.bf16.mxu0 %v6641_v1  ;;  %3916 = vmatprep.subr.bf16.mxu1 %v6769_v2  ;;  %v6608_v1 = vcombine.low %v488_v44, %v492_v45  ;;  %v3296_v2 = vadd.f32 %v7848_v9, %v662_v59  ;;  %v6729_v34 = vcombine.high %v608_v63, %v612_v61  ;;  %v604_v53 = vld [vmem:[#allocation5 + $0xe78] sm:$0xff] }
 0x242   :  { %v3468_v6 = vadd.f32 %v7884_v28, %v670_v62  ;;  %v3464_v11 = vadd.f32 %v7874_v31, %v670_v62  ;;  %v468_v27 = vld [vmem:[#allocation5 + $0xa38] sm:$0xff] }
 0x243   :  { %v3339_v9 = vadd.f32 %v7850_v12, %v3296_v2  ;;  %v592_v31 = vld [vmem:[#allocation5 + $0xe18] sm:$0xff] }
 0x244   :  { %3874 = vmatpush2.bf16.msra.mxu0 %v6640_v7  ;;  %3917 = vmatpush2.bf16.msra.mxu1 %v6768_v8  ;;  %v472_v7 = vld [vmem:[#allocation5 + $0xa58] sm:$0xff]  ;;  %v3511_v28 = vadd.f32 %v7886_v32, %v3468_v6  ;;  %v3507_v33 = vadd.f32 %v7878_v35, %v3464_v11 }
 0x245   :  { %3875 = vmatprep.subr.bf16.mxu0 %v6633_v10  ;;  %3918 = vmatprep.subr.bf16.mxu1 %v6761_v37  ;;  %v476_v8 = vld [vmem:[#allocation5 + $0xa78] sm:$0xff]  ;;  %v3292_v10 = vadd.f32 %v7838_v39, %v662_v59  ;;  %v3382_v15 = vadd.f32 %v7868_v14, %v3339_v9  ;;  %v3596_v14 = vpop.f32.mrf.mxu1 }
 0x246   :  { %v600_v37 = vld [vmem:[#allocation5 + $0xe58] sm:$0xff]  ;;  %v3554_v12 = vadd.f32 %v3553_v19, %v3511_v28 }
 0x247   :  { %v3335_v39 = vadd.f32 %v7842_v43, %v3292_v10  ;;  %v596_v29 = vld [vmem:[#allocation5 + $0xe38] sm:$0xff]  ;;  %v6720_v32 = vcombine.low %v600_v37, %v604_v53  ;;  %v3425_v43 = vadd.f32 %v7870_v18, %v3382_v15 }
 0x248   :  { %3876 = vmatpush2.bf16.msra.mxu0 %v6632_v20  ;;  %3919 = vmatpush2.bf16.msra.mxu1 %v6760_v22  ;;  %v6728_v20 = vcombine.low %v608_v63, %v612_v61  ;;  %v6593_v22 = vcombine.high %v472_v7, %v476_v8  ;;  %v6713_v44 = vcombine.high %v592_v31, %v596_v29  ;;  %v7130_v18 = vld [vmem:[#allocation8 + $0x2e0] ss:$16 sps:$4 sm:$0xff]   ;;  %v7135_v59 = vld [vmem:[#allocation8 + $0xc4] ss:$16 sps:$4 sm:$0xff]  }
 0x249   :  { %3877 = vmatprep.subr.bf16.mxu0 %v6625_v23  ;;  %3920 = vmatprep.subr.bf16.mxu1 %v6753_v24  ;;  %v6721_v23 = vcombine.high %v600_v37, %v604_v53  ;;  %v464_v24 = vld [vmem:[#allocation5 + $0xa18] sm:$0xff]  ;;  %v3597_v45 = vadd.f32 %v3596_v14, %v3554_v12  ;;  %v6712_v51 = vcombine.low %v592_v31, %v596_v29 }
 0x24a   :  { %v6584_v49 = vcombine.low %v464_v24, %v468_v27  ;;  %v7138_v63 = vld [vmem:[#allocation8 + $0x2c4] ss:$16 sps:$4 sm:$0xff]   ;;  %v7136_v62 = vld [vmem:[#allocation8 + $0x2c0] ss:$16 sps:$4 sm:$0xff]  }
 0x24b   :  { %v7144_v2 = vld [vmem:[#allocation8 + $0x2a4] ss:$16 sps:$4 sm:$0xff]   ;;  %v7145_v6 = vld [vmem:[#allocation8 + $0x80] ss:$16 sps:$4 sm:$0xff]  }
 0x24c   :  { %3878 = vmatpush2.bf16.msra.mxu0 %v6624_v36  ;;  %3921 = vmatpush2.bf16.msra.mxu1 %v6752_v38  ;;  %v6592_v36 = vcombine.low %v472_v7, %v476_v8  ;;  %v3378_v38 = vadd.f32 %v7855_v26, %v3335_v39  ;;  %v7129_v26 = vld [vmem:[#allocation8 + $0xe4] ss:$16 sps:$4 sm:$0xff]   ;;  %v7151_v10 = vld [vmem:[#allocation8 + $0x60] ss:$16 sps:$4 sm:$0xff]  }
 0x24d   :  { %3879 = vmatprep.subr.bf16.mxu0 %v6617_v40  ;;  %3922 = vmatprep.subr.bf16.mxu1 %v6745_v41  ;;  %v6585_v40 = vcombine.high %v464_v24, %v468_v27  ;;  %v3550_v41 = vadd.f32 %v7891_v50, %v3507_v33  ;;  %v3954_v50 = vmax.f32 %v3597_v45, 0.0  ;;  %v7153_v7 = vld [vmem:[#allocation8 + $0x64] ss:$16 sps:$4 sm:$0xff]   ;;  %v7154_v37 = vld [vmem:[#allocation8 + $0x260] ss:$16 sps:$4 sm:$0xff]  }
 0x24e   :  { %v3421_v35 = vadd.f32 %v7857_v30, %v3378_v38  ;;  %v7156_v8 = vld [vmem:[#allocation8 + $0x264] ss:$16 sps:$4 sm:$0xff]   ;;  %v7160_v9 = vld [vmem:[#allocation8 + $0x240] ss:$16 sps:$4 sm:$0xff]  }
 0x24f   :  { %v7159_v53 = vld [vmem:[#allocation8 + $0x44] ss:$16 sps:$4 sm:$0xff]   ;;  %v7166_v28 = vld [vmem:[#allocation8 + $0x220] ss:$16 sps:$4 sm:$0xff]  }
 0x250   :  { %3880 = vmatpush2.bf16.msra.mxu0 %v6616_v54  ;;  %3923 = vmatpush2.bf16.msra.mxu1 %v6744_v21  ;;  %v3593_v54 = vadd.f32 %v7893_v55, %v3550_v41  ;;  %v7132_v21 = vld [vmem:[#allocation8 + $0x2e4] ss:$16 sps:$4 sm:$0xff]   ;;  %v3944_v42 = vmax.f32 %v3421_v35, 0.0  ;;  %v7133_v55 = vld [vmem:[#allocation8 + $0xc0] ss:$16 sps:$4 sm:$0xff]  }
 0x251   :  { %3881 = vmatprep.subr.bf16.mxu0 %v6609_v56  ;;  %3924 = vmatprep.subr.bf16.mxu1 %v6737_v58  ;;  %v3952_v56 = vmax.f32 %v3425_v43, 0.0  ;;  %v7127_v58 = vld [vmem:[#allocation8 + $0xe0] ss:$16 sps:$4 sm:$0xff]   ;;  %v7162_v11 = vld [vmem:[#allocation8 + $0x244] ss:$16 sps:$4 sm:$0xff]  }
 0x252   :  { %v3946_v57 = vmax.f32 %v3593_v54, 0.0  ;;  %v7165_v19 = vld [vmem:[#allocation8 + $0x24] ss:$16 sps:$4 sm:$0xff]   ;;  %v7169_v27 = vld [vmem:[#allocation8] ss:$16 sps:$4 sm:$0xff]  }
 0x253   :  { %v7924_v30 = vpack.c.bf16 %v3952_v56, %v3944_v42  ;;  %v7174_v24 = vld [vmem:[#allocation8 + $0x204] ss:$16 sps:$4 sm:$0xff]   ;;  %v7172_v39 = vld [vmem:[#allocation8 + $0x200] ss:$16 sps:$4 sm:$0xff]  }
 0x254   :  { %3882 = vmatpush2.bf16.msra.mxu0 %v6608_v1  ;;  %3925 = vmatpush2.bf16.msra.mxu1 %v6736_v3  ;;  %v7927_v61 = vpack.c.bf16 %v3954_v50, %v3946_v57  ;;  %v7141_v1 = vld [vmem:[#allocation8 + $0xa4] ss:$16 sps:$4 sm:$0xff]   ;;  %v7139_v3 = vld [vmem:[#allocation8 + $0xa0] ss:$16 sps:$4 sm:$0xff]  }
 0x255   :  { %3883 = vmatprep.subr.bf16.mxu0 %v6601_v5  ;;  %3926 = vmatprep.subr.bf16.mxu1 %v6729_v34  ;;  %v7147_v5 = vld [vmem:[#allocation8 + $0x84] ss:$16 sps:$4 sm:$0xff]   ;;  %v7148_v34 = vld [vmem:[#allocation8 + $0x280] ss:$16 sps:$4 sm:$0xff]  }
 0x256   :  { %v7177_v15 = vld [vmem:[#allocation8 + $0x1e4] ss:$16 sps:$4 sm:$0xff]   ;;  %v7175_v29 = vld [vmem:[#allocation8 + $0x1e0] ss:$16 sps:$4 sm:$0xff]  }
 0x257   :  { %v7180_v31 = vld [vmem:[#allocation8 + $0x3e4] ss:$16 sps:$4 sm:$0xff]   ;;  %v7178_v33 = vld [vmem:[#allocation8 + $0x3e0] ss:$16 sps:$4 sm:$0xff]  }
 0x258   :  { %3884 = vmatpush2.bf16.msra.mxu0 %v6600_v17  ;;  %3927 = vmatpush2.bf16.msra.mxu1 %v6728_v20  ;;  %v7157_v17 = vld [vmem:[#allocation8 + $0x40] ss:$16 sps:$4 sm:$0xff]   ;;  %v7168_v20 = vld [vmem:[#allocation8 + $0x224] ss:$16 sps:$4 sm:$0xff]  }
 0x259   :  { %3885 = vmatprep.subr.bf16.mxu0 %v6593_v22  ;;  %3928 = vmatprep.subr.bf16.mxu1 %v6721_v23  ;;  %v7163_v22 = vld [vmem:[#allocation8 + $0x20] ss:$16 sps:$4 sm:$0xff]   ;;  %v7171_v23 = vld [vmem:[#allocation8 + $0x4] ss:$16 sps:$4 sm:$0xff]  }
 0x25a   :  { %v7183_v12 = vld [vmem:[#allocation8 + $0x1c4] ss:$16 sps:$4 sm:$0xff]   ;;  %v7181_v38 = vld [vmem:[#allocation8 + $0x1c0] ss:$16 sps:$4 sm:$0xff]  }
 0x25b   :  { %v7192_v41 = vld [vmem:[#allocation8 + $0x3a4] ss:$16 sps:$4 sm:$0xff]   ;;  %v7190_v43 = vld [vmem:[#allocation8 + $0x3a0] ss:$16 sps:$4 sm:$0xff]  }
 0x25c   :  { %3886 = vmatpush2.bf16.msra.mxu0 %v6592_v36  ;;  %3929 = vmatpush2.bf16.msra.mxu1 %v6720_v32  ;;  %v7186_v36 = vld [vmem:[#allocation8 + $0x3c4] ss:$16 sps:$4 sm:$0xff]   ;;  %v7184_v32 = vld [vmem:[#allocation8 + $0x3c0] ss:$16 sps:$4 sm:$0xff]  }
 0x25d   :  { %3887 = vmatprep.subr.bf16.mxu0 %v6585_v40  ;;  %3930 = vmatprep.subr.bf16.mxu1 %v6713_v44  ;;  %v7189_v40 = vld [vmem:[#allocation8 + $0x1a4] ss:$16 sps:$4 sm:$0xff]   ;;  %v7187_v44 = vld [vmem:[#allocation8 + $0x1a0] ss:$16 sps:$4 sm:$0xff]  }
 0x25e   :  { %v7195_v14 = vld [vmem:[#allocation8 + $0x184] ss:$16 sps:$4 sm:$0xff]   ;;  %v7196_v35 = vld [vmem:[#allocation8 + $0x380] ss:$16 sps:$4 sm:$0xff]  }
 0x25f   :  { %v7198_v45 = vld [vmem:[#allocation8 + $0x384] ss:$16 sps:$4 sm:$0xff]   ;;  %v7199_v54 = vld [vmem:[#allocation8 + $0x160] ss:$16 sps:$4 sm:$0xff]  }
 0x260   :  { %3888 = vmatpush2.bf16.msra.mxu0 %v6584_v49  ;;  %3931 = vmatpush2.bf16.msra.mxu1 %v6712_v51  ;;  %v7193_v49 = vld [vmem:[#allocation8 + $0x180] ss:$16 sps:$4 sm:$0xff]   ;;  %v7201_v51 = vld [vmem:[#allocation8 + $0x164] ss:$16 sps:$4 sm:$0xff]  }
 0x261   :  { %5525 = vmatprep.subr.bf16.mxu0 %v7129_v26  ;;  %5568 = vmatprep.subr.bf16.mxu1 %v7132_v21  ;;  %v7204_v26 = vld [vmem:[#allocation8 + $0x364] ss:$16 sps:$4 sm:$0xff]   ;;  %v7202_v21 = vld [vmem:[#allocation8 + $0x360] ss:$16 sps:$4 sm:$0xff]  }
 0x262   :  { %v7207_v56 = vld [vmem:[#allocation8 + $0x144] ss:$16 sps:$4 sm:$0xff]  }
 0x263   :  { %3890 = vmatmul.mubr.bf16.vlgmr.msra.gmra.mxu0 %v7816_v46  ;;  %3933 = vmatmul.mubr.bf16.vlgmr.msra.gmra.mxu1 %v7818_v47  ;;  %v7142_v46 = vld [vmem:[#allocation8 + $0x2a0] ss:$16 sps:$4 sm:$0xff]   ;;  %v7150_v47 = vld [vmem:[#allocation8 + $0x284] ss:$16 sps:$4 sm:$0xff]   ;;  %v7932_v42 = vpop.f32.mrf.mxu0 }
 0x264   :  { %5526 = vmatpush1.bf16.msra.mxu0 %v7127_v58  ;;  %5557 = vmatprep.mubr.bf16.mxu0 %v7924_v30  ;;  %v7210_v50 = vld [vmem:[#allocation8 + $0x344] ss:$16 sps:$4 sm:$0xff]   ;;  %v7205_v58 = vld [vmem:[#allocation8 + $0x140] ss:$16 sps:$4 sm:$0xff]  }
 0x265   :  { %5569 = vmatpush1.bf16.msra.mxu1 %v7130_v18  ;;  %5600 = vmatprep.mubr.bf16.mxu1 %v7927_v61  ;;  %v7208_v18 = vld [vmem:[#allocation8 + $0x340] ss:$16 sps:$4 sm:$0xff]   ;;  %v7213_v57 = vld [vmem:[#allocation8 + $0x124] ss:$16 sps:$4 sm:$0xff]  }
 0x266   :  { %5527 = vmatprep.subr.bf16.mxu0 %v7135_v59  ;;  %5570 = vmatprep.subr.bf16.mxu1 %v7138_v63  ;;  %v7934_v59 = vpop.f32.mrf.mxu1  ;;  %v7216_v63 = vld [vmem:[#allocation8 + $0x324] ss:$16 sps:$4 sm:$0xff]  }
 0x268   :  { %5528 = vmatpush1.bf16.msra.mxu0 %v7133_v55  ;;  %v677_v55 = vsub.s32 5, %v7828_v4 }
 0x269   :  { %5571 = vmatpush1.bf16.msra.mxu1 %v7136_v62  ;;  %5529 = vmatprep.subr.bf16.mxu0 %v7141_v1  ;;  %v7211_v62 = vld [vmem:[#allocation8 + $0x120] ss:$16 sps:$4 sm:$0xff]   ;;  %v3635_v1 = vpop.f32.mrf.mxu0 }
 0x26a   :  { %5572 = vmatprep.subr.bf16.mxu1 %v7144_v2  ;;  %v7214_v2 = vld [vmem:[#allocation8 + $0x320] ss:$16 sps:$4 sm:$0xff]  }
 0x26c   :  { %5530 = vmatpush1.bf16.msra.mxu0 %v7139_v3  ;;  %v7219_v3 = vld [vmem:[#allocation8 + $0x104] ss:$16 sps:$4 sm:$0xff]  }
 0x26d   :  { %5573 = vmatpush1.bf16.msra.mxu1 %v7142_v46  ;;  %5531 = vmatprep.subr.bf16.mxu0 %v7147_v5  ;;  %v3678_v46 = vpop.f32.mrf.mxu1  ;;  %v7222_v5 = vld [vmem:[#allocation8 + $0x304] ss:$16 sps:$4 sm:$0xff]  }
 0x26e   :  { %5574 = vmatprep.subr.bf16.mxu1 %v7150_v47  ;;  %v678_v47 = vrot.slane %v7902_v25, %v677_v55  ;;  %v7240_v55 = vld [vmem:[#allocation8 + $0x444] ss:$16 sps:$4 sm:$0xff]  }
 0x270   :  { %5532 = vmatpush1.bf16.msra.mxu0 %v7145_v6  ;;  %v7217_v6 = vld [vmem:[#allocation8 + $0x100] ss:$16 sps:$4 sm:$0xff]  }
 0x271   :  { %5575 = vmatpush1.bf16.msra.mxu1 %v7148_v34  ;;  %5533 = vmatprep.subr.bf16.mxu0 %v7153_v7  ;;  %v7938_v34 = vpop.f32.mrf.mxu0  ;;  %v7220_v7 = vld [vmem:[#allocation8 + $0x300] ss:$16 sps:$4 sm:$0xff]  }
 0x272   :  { %5576 = vmatprep.subr.bf16.mxu1 %v7156_v8  ;;  %v7225_v8 = vld [vmem:[#allocation8 + $0x4e4] ss:$16 sps:$4 sm:$0xff]  }
 0x274   :  { %5534 = vmatpush1.bf16.msra.mxu0 %v7151_v10  ;;  %v7940_v10 = vpop.f32.mrf.mxu1 }
 0x275   :  { %5577 = vmatpush1.bf16.msra.mxu1 %v7154_v37  ;;  %5535 = vmatprep.subr.bf16.mxu0 %v7159_v53  ;;  %v7285_v37 = vld [vmem:[#allocation8 + $0x6e4] ss:$16 sps:$4 sm:$0xff]   ;;  %v3636_v53 = vadd.f32 %v3635_v1, %v678_v47 }
 0x276   :  { %5578 = vmatprep.subr.bf16.mxu1 %v7162_v11  ;;  %v7223_v11 = vld [vmem:[#allocation8 + $0x4e0] ss:$16 sps:$4 sm:$0xff]   ;;  %v7315_v1 = vld [vmem:[#allocation8 + $0x644] ss:$16 sps:$4 sm:$0xff]  }
 0x278   :  { %5536 = vmatpush1.bf16.msra.mxu0 %v7157_v17  ;;  %v3639_v17 = vpop.f32.mrf.mxu0 }
 0x279   :  { %5579 = vmatpush1.bf16.msra.mxu1 %v7160_v9  ;;  %5537 = vmatprep.subr.bf16.mxu0 %v7165_v19  ;;  %v7228_v9 = vld [vmem:[#allocation8 + $0x4c4] ss:$16 sps:$4 sm:$0xff]   ;;  %v7283_v19 = vld [vmem:[#allocation8 + $0x6e0] ss:$16 sps:$4 sm:$0xff]  }
 0x27a   :  { %5580 = vmatprep.subr.bf16.mxu1 %v7168_v20  ;;  %v3682_v20 = vpop.f32.mrf.mxu1 }
 0x27c   :  { %5538 = vmatpush1.bf16.msra.mxu0 %v7163_v22  ;;  %v7291_v22 = vld [vmem:[#allocation8 + $0x6c4] ss:$16 sps:$4 sm:$0xff]  }
 0x27d   :  { %5581 = vmatpush1.bf16.msra.mxu1 %v7166_v28  ;;  %5539 = vmatprep.subr.bf16.mxu0 %v7171_v23  ;;  %v3679_v23 = vadd.f32 %v3678_v46, %v3636_v53  ;;  %v7313_v46 = vld [vmem:[#allocation8 + $0x640] ss:$16 sps:$4 sm:$0xff]   ;;  %v7249_v53 = vld [vmem:[#allocation8 + $0x5e4] ss:$16 sps:$4 sm:$0xff]  }
 0x27e   :  { %5582 = vmatprep.subr.bf16.mxu1 %v7174_v24  ;;  %v3640_v24 = vadd.f32 %v3639_v17, %v678_v47  ;;  %v7241_v47 = vld [vmem:[#allocation8 + $0x420] ss:$16 sps:$4 sm:$0xff]   ;;  %v7333_v17 = vld [vmem:[#allocation8 + $0x7e4] ss:$16 sps:$4 sm:$0xff]  }
 0x280   :  { %5540 = vmatpush1.bf16.msra.mxu0 %v7169_v27 }
 0x281   :  { %5583 = vmatpush1.bf16.msra.mxu1 %v7172_v39  ;;  %5541 = vmatprep.subr.bf16.mxu0 %v7177_v15  ;;  %v7226_v39 = vld [vmem:[#allocation8 + $0x4c0] ss:$16 sps:$4 sm:$0xff]  }
 0x282   :  { %5584 = vmatprep.subr.bf16.mxu1 %v7180_v31  ;;  %v7231_v31 = vld [vmem:[#allocation8 + $0x4a4] ss:$16 sps:$4 sm:$0xff]  }
 0x284   :  { %5542 = vmatpush2.bf16.msra.mxu0 %v7175_v29  ;;  %v7289_v29 = vld [vmem:[#allocation8 + $0x6c0] ss:$16 sps:$4 sm:$0xff]  }
 0x285   :  { %5585 = vmatpush2.bf16.msra.mxu1 %v7178_v33  ;;  %5543 = vmatprep.subr.bf16.mxu0 %v7183_v12 }
 0x286   :  { %5586 = vmatprep.subr.bf16.mxu1 %v7186_v36  ;;  %v7297_v36 = vld [vmem:[#allocation8 + $0x6a4] ss:$16 sps:$4 sm:$0xff]  }
 0x288   :  { %5544 = vmatpush2.bf16.msra.mxu0 %v7181_v38 }
 0x289   :  { %5587 = vmatpush2.bf16.msra.mxu1 %v7184_v32  ;;  %5545 = vmatprep.subr.bf16.mxu0 %v7189_v40  ;;  %v3683_v32 = vadd.f32 %v3682_v20, %v3640_v24  ;;  %v7331_v20 = vld [vmem:[#allocation8 + $0x7e0] ss:$16 sps:$4 sm:$0xff]   ;;  %v7255_v24 = vld [vmem:[#allocation8 + $0x5a4] ss:$16 sps:$4 sm:$0xff]  }
 0x28a   :  { %5588 = vmatprep.subr.bf16.mxu1 %v7192_v41  ;;  %v7229_v41 = vld [vmem:[#allocation8 + $0x4a0] ss:$16 sps:$4 sm:$0xff]  }
 0x28c   :  { %5546 = vmatpush2.bf16.msra.mxu0 %v7187_v44 }
 0x28d   :  { %5589 = vmatpush2.bf16.msra.mxu1 %v7190_v43  ;;  %5547 = vmatprep.subr.bf16.mxu0 %v7195_v14  ;;  %v7234_v43 = vld [vmem:[#allocation8 + $0x484] ss:$16 sps:$4 sm:$0xff]   ;;  %v7295_v14 = vld [vmem:[#allocation8 + $0x6a0] ss:$16 sps:$4 sm:$0xff]  }
 0x28e   :  { %5590 = vmatprep.subr.bf16.mxu1 %v7198_v45 }
 0x290   :  { %5548 = vmatpush2.bf16.msra.mxu0 %v7193_v49 }
 0x291   :  { %5591 = vmatpush2.bf16.msra.mxu1 %v7196_v35  ;;  %5549 = vmatprep.subr.bf16.mxu0 %v7201_v51  ;;  %v7303_v35 = vld [vmem:[#allocation8 + $0x684] ss:$16 sps:$4 sm:$0xff]  }
 0x292   :  { %5592 = vmatprep.subr.bf16.mxu1 %v7204_v26 }
 0x294   :  { %5550 = vmatpush2.bf16.msra.mxu0 %v7199_v54  ;;  %v7232_v54 = vld [vmem:[#allocation8 + $0x480] ss:$16 sps:$4 sm:$0xff]  }
 0x295   :  { %5593 = vmatpush2.bf16.msra.mxu1 %v7202_v21  ;;  %5551 = vmatprep.subr.bf16.mxu0 %v7207_v56  ;;  %v7237_v21 = vld [vmem:[#allocation8 + $0x464] ss:$16 sps:$4 sm:$0xff]   ;;  %v7301_v56 = vld [vmem:[#allocation8 + $0x680] ss:$16 sps:$4 sm:$0xff]  }
 0x296   :  { %5594 = vmatprep.subr.bf16.mxu1 %v7210_v50 }
 0x298   :  { %5552 = vmatpush2.bf16.msra.mxu0 %v7205_v58 }
 0x299   :  { %5595 = vmatpush2.bf16.msra.mxu1 %v7208_v18  ;;  %5553 = vmatprep.subr.bf16.mxu0 %v7213_v57  ;;  %v7309_v18 = vld [vmem:[#allocation8 + $0x664] ss:$16 sps:$4 sm:$0xff]  }
 0x29a   :  { %5596 = vmatprep.subr.bf16.mxu1 %v7216_v63  ;;  %v7235_v63 = vld [vmem:[#allocation8 + $0x460] ss:$16 sps:$4 sm:$0xff]  }
 0x29c   :  { %5554 = vmatpush2.bf16.msra.mxu0 %v7211_v62  ;;  %v7307_v62 = vld [vmem:[#allocation8 + $0x660] ss:$16 sps:$4 sm:$0xff]  }
 0x29d   :  { %5597 = vmatpush2.bf16.msra.mxu1 %v7214_v2  ;;  %5555 = vmatprep.subr.bf16.mxu0 %v7219_v3  ;;  %v7238_v2 = vld [vmem:[#allocation8 + $0x440] ss:$16 sps:$4 sm:$0xff]   ;;  %v7243_v3 = vld [vmem:[#allocation8 + $0x424] ss:$16 sps:$4 sm:$0xff]  }
 0x29e   :  { %5598 = vmatprep.subr.bf16.mxu1 %v7222_v5  ;;  %v7321_v5 = vld [vmem:[#allocation8 + $0x624] ss:$16 sps:$4 sm:$0xff]  }
 0x2a0   :  { %5556 = vmatpush2.bf16.msra.mxu0 %v7217_v6  ;;  %v7246_v6 = vld [vmem:[#allocation8 + $0x404] ss:$16 sps:$4 sm:$0xff]  }
 0x2a1   :  { %5599 = vmatpush2.bf16.msra.mxu1 %v7220_v7  ;;  %5611 = vmatprep.subr.bf16.mxu0 %v7225_v8  ;;  %v7319_v7 = vld [vmem:[#allocation8 + $0x620] ss:$16 sps:$4 sm:$0xff]   ;;  %v7327_v8 = vld [vmem:[#allocation8 + $0x604] ss:$16 sps:$4 sm:$0xff]  }
 0x2a2   :  { %5654 = vmatprep.subr.bf16.mxu1 %v7285_v37  ;;  %v7244_v37 = vld [vmem:[#allocation8 + $0x400] ss:$16 sps:$4 sm:$0xff]  }
 0x2a3   :  { %v7942_v28 = vpop.f32.mrf.mxu0  ;;  %5558 = vmatmul.mubr.bf16.vlgmr.msra.gmra.mxu0 %v7862_v60  ;;  %v7945_v27 = vpop.f32.mrf.mxu1 }
 0x2a4   :  { %5601 = vmatmul.mubr.bf16.vlgmr.msra.gmra.mxu1 %v7898_v16  ;;  %5612 = vmatpush1.bf16.msra.mxu0 %v7223_v11  ;;  %v7325_v11 = vld [vmem:[#allocation8 + $0x600] ss:$16 sps:$4 sm:$0xff]  }
 0x2a5   :  { %v3721_v15 = vpop.f32.mrf.mxu0  ;;  %5613 = vmatprep.subr.bf16.mxu0 %v7228_v9  ;;  %5655 = vmatpush1.bf16.msra.mxu1 %v7283_v19  ;;  %v3764_v12 = vpop.f32.mrf.mxu1  ;;  %v7247_v9 = vld [vmem:[#allocation8 + $0x5e0] ss:$16 sps:$4 sm:$0xff]   ;;  %v7252_v19 = vld [vmem:[#allocation8 + $0x5c4] ss:$16 sps:$4 sm:$0xff]  }
 0x2a6   :  { %v3722_v33 = vadd.f32 %v3721_v15, %v3679_v23  ;;  %5656 = vmatprep.subr.bf16.mxu1 %v7291_v22  ;;  %v7339_v22 = vld [vmem:[#allocation8 + $0x7c4] ss:$16 sps:$4 sm:$0xff]   ;;  %v7250_v23 = vld [vmem:[#allocation8 + $0x5c0] ss:$16 sps:$4 sm:$0xff]  }
 0x2a7   :  { %v7948_v38 = vpop.f32.mrf.mxu0  ;;  %v7950_v40 = vpop.f32.mrf.mxu1  ;;  %v7345_v15 = vld [vmem:[#allocation8 + $0x7a4] ss:$16 sps:$4 sm:$0xff]  }
 0x2a8   :  { %5614 = vmatpush1.bf16.msra.mxu0 %v7226_v39  ;;  %v3765_v45 = vadd.f32 %v3764_v12, %v3722_v33  ;;  %v7337_v39 = vld [vmem:[#allocation8 + $0x7c0] ss:$16 sps:$4 sm:$0xff]   ;;  %v7258_v33 = vld [vmem:[#allocation8 + $0x584] ss:$16 sps:$4 sm:$0xff]  }
 0x2a9   :  { %v3725_v44 = vpop.f32.mrf.mxu0  ;;  %5615 = vmatprep.subr.bf16.mxu0 %v7231_v31  ;;  %5657 = vmatpush1.bf16.msra.mxu1 %v7289_v29  ;;  %v3768_v51 = vpop.f32.mrf.mxu1  ;;  %v7253_v31 = vld [vmem:[#allocation8 + $0x5a0] ss:$16 sps:$4 sm:$0xff]   ;;  %v673_v29 = vsub.s32 4, %v7828_v4 }
 0x2aa   :  { %v3726_v49 = vadd.f32 %v3725_v44, %v3683_v32  ;;  %5658 = vmatprep.subr.bf16.mxu1 %v7297_v36  ;;  %v3948_v50 = vmax.f32 %v3765_v45, 0.0  ;;  %v7343_v12 = vld [vmem:[#allocation8 + $0x7a0] ss:$16 sps:$4 sm:$0xff]   ;;  %v7351_v36 = vld [vmem:[#allocation8 + $0x784] ss:$16 sps:$4 sm:$0xff]  }
 0x2ab   :  { %v7256_v32 = vld [vmem:[#allocation8 + $0x580] ss:$16 sps:$4 sm:$0xff]   ;;  %v7261_v44 = vld [vmem:[#allocation8 + $0x564] ss:$16 sps:$4 sm:$0xff]  }
 0x2ac   :  { %v3769_v26 = vadd.f32 %v3768_v51, %v3726_v49  ;;  %5616 = vmatpush1.bf16.msra.mxu0 %v7229_v41  ;;  %v674_v41 = vrot.slane %v7902_v25, %v673_v29  ;;  %v7259_v49 = vld [vmem:[#allocation8 + $0x560] ss:$16 sps:$4 sm:$0xff]   ;;  %v7264_v51 = vld [vmem:[#allocation8 + $0x544] ss:$16 sps:$4 sm:$0xff]   ;;  %v7316_v29 = vld [vmem:[#allocation8 + $0x1c8] ss:$16 sps:$4 sm:$0xff]  }
 0x2ad   :  { %5617 = vmatprep.subr.bf16.mxu0 %v7234_v43  ;;  %5659 = vmatpush1.bf16.msra.mxu1 %v7295_v14  ;;  %v7349_v43 = vld [vmem:[#allocation8 + $0x780] ss:$16 sps:$4 sm:$0xff]   ;;  %v7357_v14 = vld [vmem:[#allocation8 + $0x764] ss:$16 sps:$4 sm:$0xff]  }
 0x2ae   :  { %v3956_v58 = vmax.f32 %v3769_v26, 0.0  ;;  %5660 = vmatprep.subr.bf16.mxu1 %v7303_v35  ;;  %v3638_v45 = vadd.f32 %v7938_v34, %v674_v41  ;;  %v3634_v35 = vadd.f32 %v7932_v42, %v674_v41  ;;  %v7355_v26 = vld [vmem:[#allocation8 + $0x760] ss:$16 sps:$4 sm:$0xff]   ;;  %v7267_v34 = vld [vmem:[#allocation8 + $0x524] ss:$16 sps:$4 sm:$0xff]  }
 0x2af   :  { %v7369_v42 = vld [vmem:[#allocation8 + $0x724] ss:$16 sps:$4 sm:$0xff]   ;;  %v7336_v41 = vld [vmem:[#allocation8 + $0x16c] ss:$16 sps:$4 sm:$0xff]  }
 0x2b0   :  { %v7952_v57 = vpack.c.bf16 %v3956_v58, %v3948_v50  ;;  %5618 = vmatpush1.bf16.msra.mxu0 %v7232_v54  ;;  %v7363_v54 = vld [vmem:[#allocation8 + $0x744] ss:$16 sps:$4 sm:$0xff]   ;;  %v3677_v50 = vadd.f32 %v7934_v59, %v3634_v35 }
 0x2b1   :  { %5619 = vmatprep.subr.bf16.mxu0 %v7237_v21  ;;  %5661 = vmatpush1.bf16.msra.mxu1 %v7301_v56  ;;  %v3681_v21 = vadd.f32 %v7940_v10, %v3638_v45  ;;  %v7262_v56 = vld [vmem:[#allocation8 + $0x540] ss:$16 sps:$4 sm:$0xff]   ;;  %v7270_v10 = vld [vmem:[#allocation8 + $0x504] ss:$16 sps:$4 sm:$0xff]  }
 0x2b2   :  { %5643 = vmatprep.mubr.bf16.mxu0 %v7952_v57  ;;  %5662 = vmatprep.subr.bf16.mxu1 %v7309_v18  ;;  %v7361_v18 = vld [vmem:[#allocation8 + $0x740] ss:$16 sps:$4 sm:$0xff]   ;;  %v7375_v59 = vld [vmem:[#allocation8 + $0x704] ss:$16 sps:$4 sm:$0xff]  }
 0x2b3   :  { %v3724_v58 = vadd.f32 %v7948_v38, %v3681_v21 }
 0x2b4   :  { %5620 = vmatpush1.bf16.msra.mxu0 %v7235_v63  ;;  %v3720_v63 = vadd.f32 %v7942_v28, %v3677_v50  ;;  %v7381_v28 = vld [vmem:[#allocation8 + $0x2ec] ss:$16 sps:$4 sm:$0xff]  }
 0x2b5   :  { %5621 = vmatprep.subr.bf16.mxu0 %v7240_v55  ;;  %5663 = vmatpush1.bf16.msra.mxu1 %v7307_v62  ;;  %v7265_v55 = vld [vmem:[#allocation8 + $0x520] ss:$16 sps:$4 sm:$0xff]   ;;  %v3767_v62 = vadd.f32 %v7950_v40, %v3724_v58  ;;  %v7271_v40 = vld [vmem:[#allocation8 + $0xe8] ss:$16 sps:$4 sm:$0xff]  }
 0x2b6   :  { %5664 = vmatprep.subr.bf16.mxu1 %v7315_v1  ;;  %v7367_v1 = vld [vmem:[#allocation8 + $0x720] ss:$16 sps:$4 sm:$0xff]   ;;  %v3763_v38 = vadd.f32 %v7945_v27, %v3720_v63  ;;  %v7274_v27 = vld [vmem:[#allocation8 + $0xc8] ss:$16 sps:$4 sm:$0xff]   ;;  %v7360_v63 = vld [vmem:[#allocation8 + $0x4ec] ss:$16 sps:$4 sm:$0xff]  }
 0x2b8   :  { %5622 = vmatpush1.bf16.msra.mxu0 %v7238_v2  ;;  %v7268_v2 = vld [vmem:[#allocation8 + $0x500] ss:$16 sps:$4 sm:$0xff]  }
 0x2b9   :  { %5623 = vmatprep.subr.bf16.mxu0 %v7243_v3  ;;  %5665 = vmatpush1.bf16.msra.mxu1 %v7313_v46  ;;  %v3955_v3 = vmax.f32 %v3767_v62, 0.0  ;;  %v7273_v46 = vld [vmem:[#allocation8 + $0xec] ss:$16 sps:$4 sm:$0xff]  }
 0x2ba   :  { %5666 = vmatprep.subr.bf16.mxu1 %v7321_v5  ;;  %v7373_v5 = vld [vmem:[#allocation8 + $0x700] ss:$16 sps:$4 sm:$0xff]  }
 0x2bc   :  { %5624 = vmatpush1.bf16.msra.mxu0 %v7241_v47  ;;  %v3947_v47 = vmax.f32 %v3763_v38, 0.0  ;;  %v7366_v38 = vld [vmem:[#allocation8 + $0x4cc] ss:$16 sps:$4 sm:$0xff]  }
 0x2bd   :  { %5625 = vmatprep.subr.bf16.mxu0 %v7246_v6  ;;  %5667 = vmatpush1.bf16.msra.mxu1 %v7319_v7  ;;  %v7276_v7 = vld [vmem:[#allocation8 + $0xcc] ss:$16 sps:$4 sm:$0xff]  }
 0x2be   :  { %5668 = vmatprep.subr.bf16.mxu1 %v7327_v8  ;;  %v7965_v6 = vpack.c.bf16 %v3955_v3, %v3947_v47  ;;  %v7279_v8 = vld [vmem:[#allocation8 + $0xac] ss:$16 sps:$4 sm:$0xff]  }
 0x2c0   :  { %5626 = vmatpush1.bf16.msra.mxu0 %v7244_v37  ;;  %v7277_v37 = vld [vmem:[#allocation8 + $0xa8] ss:$16 sps:$4 sm:$0xff]  }
 0x2c1   :  { %5627 = vmatprep.subr.bf16.mxu0 %v7249_v53  ;;  %5669 = vmatpush1.bf16.msra.mxu1 %v7325_v11  ;;  %v7282_v53 = vld [vmem:[#allocation8 + $0x8c] ss:$16 sps:$4 sm:$0xff]   ;;  %v7280_v11 = vld [vmem:[#allocation8 + $0x88] ss:$16 sps:$4 sm:$0xff]  }
 0x2c2   :  { %5670 = vmatprep.subr.bf16.mxu1 %v7333_v17  ;;  %v7288_v17 = vld [vmem:[#allocation8 + $0x6c] ss:$16 sps:$4 sm:$0xff]  }
 0x2c4   :  { %5628 = vmatpush2.bf16.msra.mxu0 %v7247_v9  ;;  %v7286_v9 = vld [vmem:[#allocation8 + $0x68] ss:$16 sps:$4 sm:$0xff]  }
 0x2c5   :  { %5629 = vmatprep.subr.bf16.mxu0 %v7252_v19  ;;  %5671 = vmatpush2.bf16.msra.mxu1 %v7331_v20  ;;  %v7294_v19 = vld [vmem:[#allocation8 + $0x4c] ss:$16 sps:$4 sm:$0xff]   ;;  %v7292_v20 = vld [vmem:[#allocation8 + $0x48] ss:$16 sps:$4 sm:$0xff]  }
 0x2c6   :  { %5672 = vmatprep.subr.bf16.mxu1 %v7339_v22  ;;  %v7300_v22 = vld [vmem:[#allocation8 + $0x2c] ss:$16 sps:$4 sm:$0xff]  }
 0x2c8   :  { %5630 = vmatpush2.bf16.msra.mxu0 %v7250_v23  ;;  %v7306_v23 = vld [vmem:[#allocation8 + $0xc] ss:$16 sps:$4 sm:$0xff]  }
 0x2c9   :  { %5631 = vmatprep.subr.bf16.mxu0 %v7255_v24  ;;  %5673 = vmatpush2.bf16.msra.mxu1 %v7337_v39  ;;  %v7304_v24 = vld [vmem:[#allocation8 + $0x8] ss:$16 sps:$4 sm:$0xff]   ;;  %v7312_v39 = vld [vmem:[#allocation8 + $0x1ec] ss:$16 sps:$4 sm:$0xff]  }
 0x2ca   :  { %5674 = vmatprep.subr.bf16.mxu1 %v7345_v15  ;;  %v7310_v15 = vld [vmem:[#allocation8 + $0x1e8] ss:$16 sps:$4 sm:$0xff]  }
 0x2cc   :  { %5632 = vmatpush2.bf16.msra.mxu0 %v7253_v31  ;;  %v7318_v31 = vld [vmem:[#allocation8 + $0x1cc] ss:$16 sps:$4 sm:$0xff]  }
 0x2cd   :  { %5633 = vmatprep.subr.bf16.mxu0 %v7258_v33  ;;  %5675 = vmatpush2.bf16.msra.mxu1 %v7343_v12  ;;  %v7324_v33 = vld [vmem:[#allocation8 + $0x1ac] ss:$16 sps:$4 sm:$0xff]   ;;  %v7322_v12 = vld [vmem:[#allocation8 + $0x1a8] ss:$16 sps:$4 sm:$0xff]  }
 0x2ce   :  { %5676 = vmatprep.subr.bf16.mxu1 %v7351_v36  ;;  %v7330_v36 = vld [vmem:[#allocation8 + $0x18c] ss:$16 sps:$4 sm:$0xff]  }
 0x2d0   :  { %5634 = vmatpush2.bf16.msra.mxu0 %v7256_v32  ;;  %v7328_v32 = vld [vmem:[#allocation8 + $0x188] ss:$16 sps:$4 sm:$0xff]  }
 0x2d1   :  { %5635 = vmatprep.subr.bf16.mxu0 %v7261_v44  ;;  %5677 = vmatpush2.bf16.msra.mxu1 %v7349_v43  ;;  %v7334_v44 = vld [vmem:[#allocation8 + $0x168] ss:$16 sps:$4 sm:$0xff]   ;;  %v7342_v43 = vld [vmem:[#allocation8 + $0x14c] ss:$16 sps:$4 sm:$0xff]  }
 0x2d2   :  { %5678 = vmatprep.subr.bf16.mxu1 %v7357_v14  ;;  %v7340_v14 = vld [vmem:[#allocation8 + $0x148] ss:$16 sps:$4 sm:$0xff]  }
 0x2d4   :  { %5636 = vmatpush2.bf16.msra.mxu0 %v7259_v49  ;;  %v7348_v49 = vld [vmem:[#allocation8 + $0x12c] ss:$16 sps:$4 sm:$0xff]  }
 0x2d5   :  { %5637 = vmatprep.subr.bf16.mxu0 %v7264_v51  ;;  %5679 = vmatpush2.bf16.msra.mxu1 %v7355_v26  ;;  %v685_v51 = vsub.s32 7, %v7828_v4  ;;  %v7346_v26 = vld [vmem:[#allocation8 + $0x128] ss:$16 sps:$4 sm:$0xff]  }
 0x2d6   :  { %5680 = vmatprep.subr.bf16.mxu1 %v7363_v54  ;;  %v681_v54 = vsub.s32 6, %v7828_v4 }
 0x2d7   :  { %v686_v58 = vrot.slane %v7902_v25, %v685_v51  ;;  %v7385_v51 = vld [vmem:[#allocation8 + $0x2c8] ss:$16 sps:$4 sm:$0xff]  }
 0x2d8   :  { %5638 = vmatpush2.bf16.msra.mxu0 %v7262_v56  ;;  %v7354_v56 = vld [vmem:[#allocation8 + $0x10c] ss:$16 sps:$4 sm:$0xff]  }
 0x2d9   :  { %5639 = vmatprep.subr.bf16.mxu0 %v7267_v34  ;;  %5681 = vmatpush2.bf16.msra.mxu1 %v7361_v18  ;;  %v7352_v34 = vld [vmem:[#allocation8 + $0x108] ss:$16 sps:$4 sm:$0xff]   ;;  %v682_v18 = vrot.slane %v7902_v25, %v681_v54  ;;  %v7393_v54 = vld [vmem:[#allocation8 + $0x2ac] ss:$16 sps:$4 sm:$0xff]  }
 0x2da   :  { %5682 = vmatprep.subr.bf16.mxu1 %v7369_v42  ;;  %v7364_v25 = vld [vmem:[#allocation8 + $0x4c8] ss:$16 sps:$4 sm:$0xff]  }
 0x2dc   :  { %5640 = vmatpush2.bf16.msra.mxu0 %v7265_v55 }
 0x2dd   :  { %5641 = vmatprep.subr.bf16.mxu0 %v7270_v10  ;;  %5683 = vmatpush2.bf16.msra.mxu1 %v7367_v1  ;;  %v7358_v10 = vld [vmem:[#allocation8 + $0x4e8] ss:$16 sps:$4 sm:$0xff]  }
 0x2de   :  { %5684 = vmatprep.subr.bf16.mxu1 %v7375_v59 }
 0x2e0   :  { %5642 = vmatpush2.bf16.msra.mxu0 %v7268_v2 }
 0x2e1   :  { %5697 = vmatprep.subr.bf16.mxu0 %v7273_v46  ;;  %5685 = vmatpush2.bf16.msra.mxu1 %v7373_v5 }
 0x2e2   :  { %5740 = vmatprep.subr.bf16.mxu1 %v7381_v28 }
 0x2e3   :  { %5644 = vmatmul.mubr.bf16.vlgmr.msra.gmra.mxu0 %v7965_v6  ;;  %v3805_v45 = vpop.f32.mrf.mxu0  ;;  %v3848_v35 = vpop.f32.mrf.mxu1 }
 0x2e4   :  { %5698 = vmatpush1.bf16.msra.mxu0 %v7271_v40  ;;  %5729 = vmatprep.mubr.bf16.mxu0 %v7924_v30  ;;  %v7298_v30 = vld [vmem:[#allocation8 + $0x28] ss:$16 sps:$4 sm:$0xff]   ;;  %v3806_v1 = vadd.f32 %v3805_v45, %v682_v18 }
 0x2e5   :  { %5699 = vmatprep.subr.bf16.mxu0 %v7276_v7  ;;  %v3807_v21 = vpop.f32.mrf.mxu0  ;;  %v3850_v50 = vpop.f32.mrf.mxu1  ;;  %v7382_v45 = vld [vmem:[#allocation8 + $0x468] ss:$16 sps:$4 sm:$0xff]  }
 0x2e6   :  { %v3808_v62 = vadd.f32 %v3807_v21, %v686_v58  ;;  %v3849_v40 = vadd.f32 %v3848_v35, %v3806_v1  ;;  %v7390_v35 = vld [vmem:[#allocation8 + $0x44c] ss:$16 sps:$4 sm:$0xff]  }
 0x2e7   :  { %v3809_v42 = vpop.f32.mrf.mxu0  ;;  %v3852_v55 = vpop.f32.mrf.mxu1  ;;  %v7396_v21 = vld [vmem:[#allocation8 + $0x42c] ss:$16 sps:$4 sm:$0xff]  }
 0x2e8   :  { %5700 = vmatpush1.bf16.msra.mxu0 %v7274_v27  ;;  %v3810_v2 = vadd.f32 %v3809_v42, %v682_v18  ;;  %v3851_v5 = vadd.f32 %v3850_v50, %v3808_v62  ;;  %v7372_v27 = vld [vmem:[#allocation8 + $0x4ac] ss:$16 sps:$4 sm:$0xff]   ;;  %v7394_v50 = vld [vmem:[#allocation8 + $0x428] ss:$16 sps:$4 sm:$0xff]  }
 0x2e9   :  { %5701 = vmatprep.subr.bf16.mxu0 %v7279_v8  ;;  %v3811_v59 = vpop.f32.mrf.mxu0  ;;  %v3854_v3 = vpop.f32.mrf.mxu1  ;;  %v7397_v18 = vld [vmem:[#allocation8 + $0x288] ss:$16 sps:$4 sm:$0xff]   ;;  %v7405_v42 = vld [vmem:[#allocation8 + $0x26c] ss:$16 sps:$4 sm:$0xff]  }
 0x2ea   :  { %v3812_v28 = vadd.f32 %v3811_v59, %v686_v58  ;;  %v3853_v8 = vadd.f32 %v3852_v55, %v3810_v2  ;;  %v7399_v58 = vld [vmem:[#allocation8 + $0x28c] ss:$16 sps:$4 sm:$0xff]   ;;  %v7403_v55 = vld [vmem:[#allocation8 + $0x268] ss:$16 sps:$4 sm:$0xff]  }
 0x2eb   :  { %v7406_v62 = vld [vmem:[#allocation8 + $0x5e8] ss:$16 sps:$4 sm:$0xff]   ;;  %v7414_v1 = vld [vmem:[#allocation8 + $0x5cc] ss:$16 sps:$4 sm:$0xff]  }
 0x2ec   :  { %5702 = vmatpush1.bf16.msra.mxu0 %v7277_v37  ;;  %v7409_v59 = vld [vmem:[#allocation8 + $0x248] ss:$16 sps:$4 sm:$0xff]   ;;  %v7417_v2 = vld [vmem:[#allocation8 + $0x22c] ss:$16 sps:$4 sm:$0xff]  }
 0x2ed   :  { %5703 = vmatprep.subr.bf16.mxu0 %v7282_v53 }
 0x2f0   :  { %5704 = vmatpush1.bf16.msra.mxu0 %v7280_v11 }
 0x2f1   :  { %5705 = vmatprep.subr.bf16.mxu0 %v7288_v17 }
 0x2f4   :  { %5706 = vmatpush1.bf16.msra.mxu0 %v7286_v9  ;;  %v3855_v9 = vadd.f32 %v3854_v3, %v3812_v28  ;;  %v7420_v3 = vld [vmem:[#allocation8 + $0x5ac] ss:$16 sps:$4 sm:$0xff]  }
 0x2f5   :  { %5707 = vmatprep.subr.bf16.mxu0 %v7294_v19  ;;  %v7423_v28 = vld [vmem:[#allocation8 + $0x20c] ss:$16 sps:$4 sm:$0xff]  }
 0x2f8   :  { %5708 = vmatpush1.bf16.msra.mxu0 %v7292_v20 }
 0x2f9   :  { %5709 = vmatprep.subr.bf16.mxu0 %v7300_v22 }
 0x2fc   :  { %5710 = vmatpush1.bf16.msra.mxu0 %v7298_v30  ;;  %v7378_v30 = vld [vmem:[#allocation8 + $0x48c] ss:$16 sps:$4 sm:$0xff]  }
 0x2fd   :  { %5711 = vmatprep.subr.bf16.mxu0 %v7306_v23 }
 0x300   :  { %5712 = vmatpush1.bf16.msra.mxu0 %v7304_v24 }
 0x301   :  { %5713 = vmatprep.subr.bf16.mxu0 %v7312_v39 }
 0x304   :  { %5714 = vmatpush2.bf16.msra.mxu0 %v7310_v15 }
 0x305   :  { %5715 = vmatprep.subr.bf16.mxu0 %v7318_v31 }
 0x308   :  { %5716 = vmatpush2.bf16.msra.mxu0 %v7316_v29  ;;  %v7376_v29 = vld [vmem:[#allocation8 + $0x488] ss:$16 sps:$4 sm:$0xff]  }
 0x309   :  { %5717 = vmatprep.subr.bf16.mxu0 %v7324_v33 }
 0x30c   :  { %5718 = vmatpush2.bf16.msra.mxu0 %v7322_v12  ;;  %v7384_v12 = vld [vmem:[#allocation8 + $0x46c] ss:$16 sps:$4 sm:$0xff]  }
 0x30d   :  { %5719 = vmatprep.subr.bf16.mxu0 %v7330_v36 }
 0x310   :  { %5720 = vmatpush2.bf16.msra.mxu0 %v7328_v32 }
 0x311   :  { %5721 = vmatprep.subr.bf16.mxu0 %v7336_v41 }
 0x314   :  { %5722 = vmatpush2.bf16.msra.mxu0 %v7334_v44 }
 0x315   :  { %5723 = vmatprep.subr.bf16.mxu0 %v7342_v43  ;;  %v7379_v43 = vld [vmem:[#allocation8 + $0x2e8] ss:$16 sps:$4 sm:$0xff]  }
 0x318   :  { %5724 = vmatpush2.bf16.msra.mxu0 %v7340_v14 }
 0x319   :  { %5725 = vmatprep.subr.bf16.mxu0 %v7348_v49  ;;  %v7387_v49 = vld [vmem:[#allocation8 + $0x2cc] ss:$16 sps:$4 sm:$0xff]  }
 0x31c   :  { %5726 = vmatpush2.bf16.msra.mxu0 %v7346_v26  ;;  %v7388_v26 = vld [vmem:[#allocation8 + $0x448] ss:$16 sps:$4 sm:$0xff]  }
 0x31d   :  { %5727 = vmatprep.subr.bf16.mxu0 %v7354_v56  ;;  %v7391_v56 = vld [vmem:[#allocation8 + $0x2a8] ss:$16 sps:$4 sm:$0xff]  }
 0x320   :  { %5728 = vmatpush2.bf16.msra.mxu0 %v7352_v34  ;;  %v7402_v34 = vld [vmem:[#allocation8 + $0x40c] ss:$16 sps:$4 sm:$0xff]  }
 0x321   :  { %5783 = vmatprep.subr.bf16.mxu0 %v7360_v63  ;;  %v7408_v63 = vld [vmem:[#allocation8 + $0x5ec] ss:$16 sps:$4 sm:$0xff]  }
 0x323   :  { %v3891_v46 = vpop.f32.mrf.mxu0  ;;  %5730 = vmatmul.mubr.bf16.vlgmr.msra.gmra.mxu0 %v7862_v60  ;;  %v3934_v47 = vpop.f32.mrf.mxu1  ;;  %v7370_v60 = vld [vmem:[#allocation8 + $0x4a8] ss:$16 sps:$4 sm:$0xff]  }
 0x324   :  { %5784 = vmatpush1.bf16.msra.mxu0 %v7358_v10  ;;  %5815 = vmatprep.mubr.bf16.mxu0 %v7952_v57  ;;  %v3892_v11 = vadd.f32 %v3891_v46, %v3849_v40  ;;  %v7411_v10 = vld [vmem:[#allocation8 + $0x24c] ss:$16 sps:$4 sm:$0xff]   ;;  %v7415_v46 = vld [vmem:[#allocation8 + $0x228] ss:$16 sps:$4 sm:$0xff]  }
 0x325   :  { %v3893_v7 = vpop.f32.mrf.mxu0  ;;  %5785 = vmatprep.subr.bf16.mxu0 %v7366_v38  ;;  %v3936_v53 = vpop.f32.mrf.mxu1  ;;  %v7412_v38 = vld [vmem:[#allocation8 + $0x5c8] ss:$16 sps:$4 sm:$0xff]  }
 0x326   :  { %v3894_v37 = vadd.f32 %v3893_v7, %v3851_v5  ;;  %v3935_v39 = vadd.f32 %v3934_v47, %v3892_v11  ;;  %v7418_v5 = vld [vmem:[#allocation8 + $0x5a8] ss:$16 sps:$4 sm:$0xff]   ;;  %v7426_v47 = vld [vmem:[#allocation8 + $0x58c] ss:$16 sps:$4 sm:$0xff]  }
 0x327   :  { %v3895_v17 = vpop.f32.mrf.mxu0  ;;  %v3938_v20 = vpop.f32.mrf.mxu1  ;;  %v7424_v40 = vld [vmem:[#allocation8 + $0x588] ss:$16 sps:$4 sm:$0xff]   ;;  %v7429_v7 = vld [vmem:[#allocation8 + $0x3ec] ss:$16 sps:$4 sm:$0xff]  }
 0x328   :  { %v3896_v19 = vadd.f32 %v3895_v17, %v3853_v8  ;;  %5786 = vmatpush1.bf16.msra.mxu0 %v7364_v25  ;;  %v3937_v23 = vadd.f32 %v3936_v53, %v3894_v37  ;;  %v3949_v41 = vmax.f32 %v3935_v39, 0.0  ;;  %v7421_v25 = vld [vmem:[#allocation8 + $0x208] ss:$16 sps:$4 sm:$0xff]   ;;  %v7435_v53 = vld [vmem:[#allocation8 + $0x3cc] ss:$16 sps:$4 sm:$0xff]  }
 0x329   :  { %v3897_v22 = vpop.f32.mrf.mxu0  ;;  %5787 = vmatprep.subr.bf16.mxu0 %v7372_v27  ;;  %v3940_v15 = vpop.f32.mrf.mxu1  ;;  %v7432_v27 = vld [vmem:[#allocation8 + $0x56c] ss:$16 sps:$4 sm:$0xff]   ;;  %v7427_v8 = vld [vmem:[#allocation8 + $0x3e8] ss:$16 sps:$4 sm:$0xff]  }
 0x32a   :  { %v3939_v57 = vadd.f32 %v3938_v20, %v3896_v19  ;;  %v3898_v24 = vadd.f32 %v3897_v22, %v3855_v9  ;;  %v3950_v36 = vmax.f32 %v3937_v23, 0.0  ;;  %v7430_v37 = vld [vmem:[#allocation8 + $0x568] ss:$16 sps:$4 sm:$0xff]   ;;  %v7438_v11 = vld [vmem:[#allocation8 + $0x54c] ss:$16 sps:$4 sm:$0xff]  }
 0x32b   :  { %v7433_v17 = vld [vmem:[#allocation8 + $0x3c8] ss:$16 sps:$4 sm:$0xff]   ;;  %v7441_v19 = vld [vmem:[#allocation8 + $0x3ac] ss:$16 sps:$4 sm:$0xff]  }
 0x32c   :  { %v3941_v31 = vadd.f32 %v3940_v15, %v3898_v24  ;;  %5788 = vmatpush1.bf16.msra.mxu0 %v7370_v60  ;;  %v3957_v33 = vmax.f32 %v3939_v57, 0.0  ;;  %v7436_v9 = vld [vmem:[#allocation8 + $0x548] ss:$16 sps:$4 sm:$0xff]   ;;  %v7444_v20 = vld [vmem:[#allocation8 + $0x52c] ss:$16 sps:$4 sm:$0xff]  }
 0x32d   :  { %5789 = vmatprep.subr.bf16.mxu0 %v7378_v30  ;;  %v7439_v60 = vld [vmem:[#allocation8 + $0x3a8] ss:$16 sps:$4 sm:$0xff]   ;;  %v7447_v30 = vld [vmem:[#allocation8 + $0x38c] ss:$16 sps:$4 sm:$0xff]  }
 0x32e   :  { %v3958_v32 = vmax.f32 %v3941_v31, 0.0  ;;  %v7977_v14 = vpack.c.bf16 %v3957_v33, %v3949_v41  ;;  %v7442_v22 = vld [vmem:[#allocation8 + $0x528] ss:$16 sps:$4 sm:$0xff]   ;;  %v7450_v23 = vld [vmem:[#allocation8 + $0x50c] ss:$16 sps:$4 sm:$0xff]  }
 0x32f   :  { %v7445_v57 = vld [vmem:[#allocation8 + $0x388] ss:$16 sps:$4 sm:$0xff]   ;;  %v7453_v39 = vld [vmem:[#allocation8 + $0x36c] ss:$16 sps:$4 sm:$0xff]  }
 0x330   :  { %v7975_v44 = vpack.c.bf16 %v3958_v32, %v3950_v36  ;;  %5790 = vmatpush1.bf16.msra.mxu0 %v7376_v29  ;;  %v7448_v24 = vld [vmem:[#allocation8 + $0x508] ss:$16 sps:$4 sm:$0xff]   ;;  %v7511_v15 = vld [vmem:[#allocation11 + $0x78] sm:$0xff]  }
 0x331   :  { %5791 = vmatprep.subr.bf16.mxu0 %v7384_v12  ;;  %v7451_v31 = vld [vmem:[#allocation8 + $0x368] ss:$16 sps:$4 sm:$0xff]   ;;  %v7456_v29 = vld [vmem:[#allocation8 + $0x34c] ss:$16 sps:$4 sm:$0xff]  }
 0x332   :  { %5686 = vmatprep.mubr.bf16.mxu1 %v7975_v44  ;;  %v7512_v33 = vld [vmem:[#allocation11 + $0x38] sm:$0xff]   ;;  %v7454_v12 = vld [vmem:[#allocation8 + $0x348] ss:$16 sps:$4 sm:$0xff]  }
 0x333   :  { %5687 = vmatmul.mubr.bf16.vlgmr.msra.gmra.mxu1 %v7977_v14  ;;  %v7459_v36 = vld [vmem:[#allocation8 + $0x32c] ss:$16 sps:$4 sm:$0xff]   ;;  %v7513_v32 = vld [vmem:[#allocation11 + $0x70] sm:$0xff]  }
 0x334   :  { %5741 = vmatpush1.bf16.msra.mxu1 %v7379_v43  ;;  %5772 = vmatprep.mubr.bf16.mxu1 %v7927_v61  ;;  %v7400_v61 = vld [vmem:[#allocation8 + $0x408] ss:$16 sps:$4 sm:$0xff]  }
 0x335   :  { %5792 = vmatpush1.bf16.msra.mxu0 %v7382_v45  ;;  %5742 = vmatprep.subr.bf16.mxu1 %v7387_v49  ;;  %v7514_v41 = vld [vmem:[#allocation11 + $0x30] sm:$0xff]   ;;  %v7462_v45 = vld [vmem:[#allocation8 + $0x30c] ss:$16 sps:$4 sm:$0xff]  }
 0x336   :  { %5793 = vmatprep.subr.bf16.mxu0 %v7390_v35  ;;  %v7457_v43 = vld [vmem:[#allocation8 + $0x328] ss:$16 sps:$4 sm:$0xff]   ;;  %v7515_v49 = vld [vmem:[#allocation11 + $0x68] sm:$0xff]  }
 0x337   :  { %v7516_v35 = vld [vmem:[#allocation11 + $0x28] sm:$0xff]  }
 0x338   :  { %5743 = vmatpush1.bf16.msra.mxu1 %v7385_v51  ;;  %v7517_v51 = vld [vmem:[#allocation11 + $0x60] sm:$0xff]  }
 0x339   :  { %5794 = vmatpush1.bf16.msra.mxu0 %v7388_v26  ;;  %5744 = vmatprep.subr.bf16.mxu1 %v7393_v54  ;;  %v7460_v26 = vld [vmem:[#allocation8 + $0x308] ss:$16 sps:$4 sm:$0xff]  }
 0x33a   :  { %5795 = vmatprep.subr.bf16.mxu0 %v7396_v21  ;;  %v7518_v54 = vld [vmem:[#allocation11 + $0x20] sm:$0xff]   ;;  %v7519_v21 = vld [vmem:[#allocation11 + $0x58] sm:$0xff]  }
 0x33c   :  { %5745 = vmatpush1.bf16.msra.mxu1 %v7391_v56  ;;  %v7463_v56 = vld [vmem:[#allocation8 + $0x6e8] ss:$16 sps:$4 sm:$0xff]  }
 0x33d   :  { %5796 = vmatpush1.bf16.msra.mxu0 %v7394_v50  ;;  %5746 = vmatprep.subr.bf16.mxu1 %v7399_v58  ;;  %v7468_v50 = vld [vmem:[#allocation8 + $0x6cc] ss:$16 sps:$4 sm:$0xff]  }
 0x33e   :  { %5797 = vmatprep.subr.bf16.mxu0 %v7402_v34  ;;  %v7520_v58 = vld [vmem:[#allocation11 + $0x18] sm:$0xff]   ;;  %v7466_v34 = vld [vmem:[#allocation8 + $0x6c8] ss:$16 sps:$4 sm:$0xff]  }
 0x340   :  { %5747 = vmatpush1.bf16.msra.mxu1 %v7397_v18  ;;  %v7471_v18 = vld [vmem:[#allocation8 + $0x6ac] ss:$16 sps:$4 sm:$0xff]  }
 0x341   :  { %5798 = vmatpush1.bf16.msra.mxu0 %v7400_v61  ;;  %5748 = vmatprep.subr.bf16.mxu1 %v7405_v42  ;;  %v7521_v61 = vld [vmem:[#allocation11 + $0x50] sm:$0xff]  }
 0x342   :  { %5799 = vmatprep.subr.bf16.mxu0 %v7408_v63  ;;  %v7522_v42 = vld [vmem:[#allocation11 + $0x10] sm:$0xff]  }
 0x343   :  { %v7469_v63 = vld [vmem:[#allocation8 + $0x6a8] ss:$16 sps:$4 sm:$0xff]  }
 0x344   :  { %5749 = vmatpush1.bf16.msra.mxu1 %v7403_v55  ;;  %v7474_v55 = vld [vmem:[#allocation8 + $0x68c] ss:$16 sps:$4 sm:$0xff]  }
 0x345   :  { %5800 = vmatpush2.bf16.msra.mxu0 %v7406_v62  ;;  %5750 = vmatprep.subr.bf16.mxu1 %v7411_v10  ;;  %v7523_v62 = vld [vmem:[#allocation11 + $0x48] sm:$0xff]  }
 0x346   :  { %5801 = vmatprep.subr.bf16.mxu0 %v7414_v1  ;;  %v7524_v10 = vld [vmem:[#allocation11 + $0x8] sm:$0xff]  }
 0x347   :  { %v7477_v1 = vld [vmem:[#allocation8 + $0x66c] ss:$16 sps:$4 sm:$0xff]  }
 0x348   :  { %5751 = vmatpush1.bf16.msra.mxu1 %v7409_v59  ;;  %v7526_v59 = vld [vmem:[#allocation11] sm:$0xff]  }
 0x349   :  { %5802 = vmatpush2.bf16.msra.mxu0 %v7412_v38  ;;  %5752 = vmatprep.subr.bf16.mxu1 %v7417_v2  ;;  %v7475_v38 = vld [vmem:[#allocation8 + $0x668] ss:$16 sps:$4 sm:$0xff]   ;;  %v7480_v2 = vld [vmem:[#allocation8 + $0x64c] ss:$16 sps:$4 sm:$0xff]  }
 0x34a   :  { %5803 = vmatprep.subr.bf16.mxu0 %v7420_v3  ;;  %v7478_v3 = vld [vmem:[#allocation8 + $0x648] ss:$16 sps:$4 sm:$0xff]  }
 0x34c   :  { %5753 = vmatpush1.bf16.msra.mxu1 %v7415_v46  ;;  %v7483_v46 = vld [vmem:[#allocation8 + $0x62c] ss:$16 sps:$4 sm:$0xff]  }
 0x34d   :  { %5804 = vmatpush2.bf16.msra.mxu0 %v7418_v5  ;;  %5754 = vmatprep.subr.bf16.mxu1 %v7423_v28  ;;  %v7481_v5 = vld [vmem:[#allocation8 + $0x628] ss:$16 sps:$4 sm:$0xff]   ;;  %v7486_v28 = vld [vmem:[#allocation8 + $0x60c] ss:$16 sps:$4 sm:$0xff]  }
 0x34e   :  { %5805 = vmatprep.subr.bf16.mxu0 %v7426_v47  ;;  %v7484_v47 = vld [vmem:[#allocation8 + $0x608] ss:$16 sps:$4 sm:$0xff]  }
 0x350   :  { %5755 = vmatpush1.bf16.msra.mxu1 %v7421_v25  ;;  %v7489_v25 = vld [vmem:[#allocation8 + $0x7ec] ss:$16 sps:$4 sm:$0xff]  }
 0x351   :  { %5806 = vmatpush2.bf16.msra.mxu0 %v7424_v40  ;;  %5756 = vmatprep.subr.bf16.mxu1 %v7429_v7  ;;  %v7487_v40 = vld [vmem:[#allocation8 + $0x7e8] ss:$16 sps:$4 sm:$0xff]   ;;  %v7492_v7 = vld [vmem:[#allocation8 + $0x7cc] ss:$16 sps:$4 sm:$0xff]  }
 0x352   :  { %5807 = vmatprep.subr.bf16.mxu0 %v7432_v27  ;;  %v7490_v27 = vld [vmem:[#allocation8 + $0x7c8] ss:$16 sps:$4 sm:$0xff]  }
 0x354   :  { %5757 = vmatpush2.bf16.msra.mxu1 %v7427_v8  ;;  %v7495_v8 = vld [vmem:[#allocation8 + $0x7ac] ss:$16 sps:$4 sm:$0xff]  }
 0x355   :  { %5808 = vmatpush2.bf16.msra.mxu0 %v7430_v37  ;;  %5758 = vmatprep.subr.bf16.mxu1 %v7435_v53  ;;  %v7493_v37 = vld [vmem:[#allocation8 + $0x7a8] ss:$16 sps:$4 sm:$0xff]   ;;  %v7498_v53 = vld [vmem:[#allocation8 + $0x78c] ss:$16 sps:$4 sm:$0xff]  }
 0x356   :  { %5809 = vmatprep.subr.bf16.mxu0 %v7438_v11  ;;  %v7496_v11 = vld [vmem:[#allocation8 + $0x788] ss:$16 sps:$4 sm:$0xff]  }
 0x358   :  { %5759 = vmatpush2.bf16.msra.mxu1 %v7433_v17  ;;  %v7501_v17 = vld [vmem:[#allocation8 + $0x76c] ss:$16 sps:$4 sm:$0xff]  }
 0x359   :  { %5810 = vmatpush2.bf16.msra.mxu0 %v7436_v9  ;;  %5760 = vmatprep.subr.bf16.mxu1 %v7441_v19  ;;  %v7499_v9 = vld [vmem:[#allocation8 + $0x768] ss:$16 sps:$4 sm:$0xff]   ;;  %v7504_v19 = vld [vmem:[#allocation8 + $0x74c] ss:$16 sps:$4 sm:$0xff]  }
 0x35a   :  { %5811 = vmatprep.subr.bf16.mxu0 %v7444_v20  ;;  %v7502_v20 = vld [vmem:[#allocation8 + $0x748] ss:$16 sps:$4 sm:$0xff]  }
 0x35c   :  { %5761 = vmatpush2.bf16.msra.mxu1 %v7439_v60  ;;  %v7507_v60 = vld [vmem:[#allocation8 + $0x72c] ss:$16 sps:$4 sm:$0xff]  }
 0x35d   :  { %5812 = vmatpush2.bf16.msra.mxu0 %v7442_v22  ;;  %5762 = vmatprep.subr.bf16.mxu1 %v7447_v30  ;;  %v7505_v22 = vld [vmem:[#allocation8 + $0x728] ss:$16 sps:$4 sm:$0xff]   ;;  %v7510_v30 = vld [vmem:[#allocation8 + $0x70c] ss:$16 sps:$4 sm:$0xff]  }
 0x35e   :  { %5813 = vmatprep.subr.bf16.mxu0 %v7450_v23  ;;  %v7508_v23 = vld [vmem:[#allocation8 + $0x708] ss:$16 sps:$4 sm:$0xff]  }
 0x360   :  { %5763 = vmatpush2.bf16.msra.mxu1 %v7445_v57  ;;  %v7527_v57 = vld [vmem:[#allocation11 + $0xf8] sm:$0xff]  }
 0x361   :  { %5814 = vmatpush2.bf16.msra.mxu0 %v7448_v24  ;;  %5764 = vmatprep.subr.bf16.mxu1 %v7453_v39  ;;  %v7528_v24 = vld [vmem:[#allocation11 + $0xb8] sm:$0xff]   ;;  %v7529_v39 = vld [vmem:[#allocation11 + $0xf0] sm:$0xff]  }
 0x362   :  { %7068 = vmatprep.subr.bf16.mxu0 %v7511_v15  ;;  %v7530_v15 = vld [vmem:[#allocation11 + $0xb0] sm:$0xff]  }
 0x364   :  { %5765 = vmatpush2.bf16.msra.mxu1 %v7451_v31  ;;  %5816 = vmatmul.mubr.bf16.vlgmr.msra.gmra.mxu0 %v7965_v6  ;;  %v7465_v6 = vld [vmem:[#allocation8 + $0x6ec] ss:$16 sps:$4 sm:$0xff]  }
 0x365   :  { %5766 = vmatprep.subr.bf16.mxu1 %v7456_v29  ;;  %7069 = vmatpush3.bf16.msra.mxu0 %v7512_v33  ;;  %v7531_v31 = vld [vmem:[#allocation11 + $0xe8] sm:$0xff]   ;;  %v7533_v33 = vld [vmem:[#allocation11 + $0xe0] sm:$0xff]  }
 0x366   :  { %7070 = vmatprep.subr.bf16.mxu0 %v7513_v32  ;;  %v7532_v29 = vld [vmem:[#allocation11 + $0xa8] sm:$0xff]   ;;  %v7536_v32 = vld [vmem:[#allocation11 + $0x98] sm:$0xff]  }
 0x368   :  { %5767 = vmatpush2.bf16.msra.mxu1 %v7454_v12  ;;  %v7534_v12 = vld [vmem:[#allocation11 + $0xa0] sm:$0xff]  }
 0x369   :  { %5768 = vmatprep.subr.bf16.mxu1 %v7459_v36  ;;  %7071 = vmatpush3.bf16.msra.mxu0 %v7514_v41  ;;  %v7535_v36 = vld [vmem:[#allocation11 + $0xd8] sm:$0xff]  }
 0x36a   :  { %7072 = vmatprep.subr.bf16.mxu0 %v7515_v49 }
 0x36c   :  { %5769 = vmatpush2.bf16.msra.mxu1 %v7457_v43 }
 0x36d   :  { %5770 = vmatprep.subr.bf16.mxu1 %v7462_v45  ;;  %7073 = vmatpush3.bf16.msra.mxu0 %v7516_v35  ;;  %v5602_v45 = vpop.f32.mrf.mxu1 }
 0x36e   :  { %7074 = vmatprep.subr.bf16.mxu0 %v7517_v51 }
 0x36f   :  { %v5604_v35 = vpop.f32.mrf.mxu1 }
 0x370   :  { %5771 = vmatpush2.bf16.msra.mxu1 %v7460_v26  ;;  %v4223_v26 = vld [vmem:[#allocation10] sm:$0xf] }
 0x371   :  { %5826 = vmatprep.subr.bf16.mxu1 %v7465_v6  ;;  %7075 = vmatpush3.bf16.msra.mxu0 %v7518_v54  ;;  %v4232_v6 = vrot.slane %v4223_v26, %v661_v48  ;;  %v4228_v54 = vrot.slane %v4223_v26, %v657_v13 }
 0x372   :  { %7076 = vmatprep.subr.bf16.mxu0 %v7519_v21  ;;  %v5606_v21 = vpop.f32.mrf.mxu1 }
 0x373   :  { %5773 = vmatmul.mubr.bf16.vlgmr.msra.gmra.mxu1 %v7898_v16  ;;  %v7472_v16 = vld [vmem:[#allocation8 + $0x688] ss:$16 sps:$4 sm:$0xff]  }
 0x374   :  { %5827 = vmatpush1.bf16.msra.mxu1 %v7463_v56  ;;  %5858 = vmatprep.mubr.bf16.mxu1 %v7975_v44  ;;  %v7525_v44 = vld [vmem:[#allocation11 + $0x40] sm:$0xff]  }
 0x375   :  { %5828 = vmatprep.subr.bf16.mxu1 %v7468_v50  ;;  %7077 = vmatpush3.bf16.msra.mxu0 %v7520_v58 }
 0x376   :  { %7078 = vmatprep.subr.bf16.mxu0 %v7521_v61 }
 0x378   :  { %5829 = vmatpush1.bf16.msra.mxu1 %v7466_v34 }
 0x379   :  { %5830 = vmatprep.subr.bf16.mxu1 %v7471_v18  ;;  %7079 = vmatpush3.bf16.msra.mxu0 %v7522_v42  ;;  %v5608_v18 = vpop.f32.mrf.mxu1 }
 0x37a   :  { %7080 = vmatprep.subr.bf16.mxu0 %v7523_v62 }
 0x37c   :  { %5831 = vmatpush1.bf16.msra.mxu1 %v7469_v63 }
 0x37d   :  { %5832 = vmatprep.subr.bf16.mxu1 %v7474_v55  ;;  %7081 = vmatpush3.bf16.msra.mxu0 %v7524_v10  ;;  %v7537_v10 = vld [vmem:[#allocation11 + $0xd0] sm:$0xff]  }
 0x37e   :  { %7082 = vmatprep.subr.bf16.mxu0 %v7525_v44 }
 0x380   :  { %5833 = vmatpush1.bf16.msra.mxu1 %v7472_v16 }
 0x381   :  { %5834 = vmatprep.subr.bf16.mxu1 %v7477_v1  ;;  %7083 = vmatpush3.bf16.msra.mxu0 %v7526_v59  ;;  %v7538_v59 = vld [vmem:[#allocation11 + $0x90] sm:$0xff]  }
 0x384   :  { %5835 = vmatpush1.bf16.msra.mxu1 %v7475_v38 }
 0x385   :  { %5836 = vmatprep.subr.bf16.mxu1 %v7480_v2 }
 0x388   :  { %5837 = vmatpush1.bf16.msra.mxu1 %v7478_v3 }
 0x389   :  { %5838 = vmatprep.subr.bf16.mxu1 %v7483_v46 }
 0x38c   :  { %5839 = vmatpush1.bf16.msra.mxu1 %v7481_v5 }
 0x38d   :  { %5840 = vmatprep.subr.bf16.mxu1 %v7486_v28 }
 0x390   :  { %5841 = vmatpush1.bf16.msra.mxu1 %v7484_v47  ;;  %v7539_v47 = vld [vmem:[#allocation11 + $0xc8] sm:$0xff]  }
 0x391   :  { %5842 = vmatprep.subr.bf16.mxu1 %v7489_v25 }
 0x394   :  { %5843 = vmatpush2.bf16.msra.mxu1 %v7487_v40 }
 0x395   :  { %5844 = vmatprep.subr.bf16.mxu1 %v7492_v7  ;;  %v7540_v7 = vld [vmem:[#allocation11 + $0x88] sm:$0xff]  }
 0x398   :  { %5845 = vmatpush2.bf16.msra.mxu1 %v7490_v27 }
 0x399   :  { %5846 = vmatprep.subr.bf16.mxu1 %v7495_v8 }
 0x39c   :  { %5847 = vmatpush2.bf16.msra.mxu1 %v7493_v37 }
 0x39d   :  { %5848 = vmatprep.subr.bf16.mxu1 %v7498_v53 }
 0x3a0   :  { %5849 = vmatpush2.bf16.msra.mxu1 %v7496_v11  ;;  %v7541_v11 = vld [vmem:[#allocation11 + $0xc0] sm:$0xff]  }
 0x3a1   :  { %5850 = vmatprep.subr.bf16.mxu1 %v7501_v17 }
 0x3a4   :  { %5851 = vmatpush2.bf16.msra.mxu1 %v7499_v9  ;;  %v7542_v9 = vld [vmem:[#allocation11 + $0x80] sm:$0xff]  }
 0x3a5   :  { %5852 = vmatprep.subr.bf16.mxu1 %v7504_v19 }
 0x3a8   :  { %5853 = vmatpush2.bf16.msra.mxu1 %v7502_v20 }
 0x3a9   :  { %5854 = vmatprep.subr.bf16.mxu1 %v7507_v60 }
 0x3ac   :  { %5855 = vmatpush2.bf16.msra.mxu1 %v7505_v22 }
 0x3ad   :  { %5856 = vmatprep.subr.bf16.mxu1 %v7510_v30 }
 0x3b0   :  { %5857 = vmatpush2.bf16.msra.mxu1 %v7508_v23 }
 0x3b1   :  { %7090 = vmatprep.subr.bf16.mxu1 %v7527_v57 }
 0x3b3   :  { %5859 = vmatmul.mubr.bf16.vlgmr.msra.gmra.mxu1 %v7977_v14  ;;  %v5559_v14 = vpop.f32.mrf.mxu0 }
 0x3b4   :  { %7091 = vmatpush3.bf16.msra.mxu1 %v7528_v24  ;;  %v5560_v34 = vadd.f32 %v5559_v14, %v4228_v54 }
 0x3b5   :  { %7092 = vmatprep.subr.bf16.mxu1 %v7529_v39  ;;  %v5561_v41 = vpop.f32.mrf.mxu0 }
 0x3b6   :  { %v5562_v50 = vadd.f32 %v5561_v41, %v4232_v6  ;;  %v5603_v16 = vadd.f32 %v5602_v45, %v5560_v34 }
 0x3b7   :  { %v5563_v43 = vpop.f32.mrf.mxu0 }
 0x3b8   :  { %7093 = vmatpush3.bf16.msra.mxu1 %v7530_v15  ;;  %v5564_v58 = vadd.f32 %v5563_v43, %v4228_v54  ;;  %v5605_v55 = vadd.f32 %v5604_v35, %v5562_v50  ;;  %v4240_v15 = vrot.slane %v4223_v26, %v669_v52 }
 0x3b9   :  { %7094 = vmatprep.subr.bf16.mxu1 %v7531_v31  ;;  %v5565_v49 = vpop.f32.mrf.mxu0  ;;  %v4236_v31 = vrot.slane %v4223_v26, %v665_v0 }
 0x3ba   :  { %v5566_v42 = vadd.f32 %v5565_v49, %v4232_v6  ;;  %v5607_v62 = vadd.f32 %v5606_v21, %v5564_v58 }
 0x3bb   :  { %v5645_v51 = vpop.f32.mrf.mxu0 }
 0x3bc   :  { %7095 = vmatpush3.bf16.msra.mxu1 %v7532_v29  ;;  %v5609_v48 = vadd.f32 %v5608_v18, %v5566_v42  ;;  %v5646_v13 = vadd.f32 %v5645_v51, %v5603_v16 }
 0x3bd   :  { %7096 = vmatprep.subr.bf16.mxu1 %v7533_v33  ;;  %v5647_v56 = vpop.f32.mrf.mxu0 }
 0x3be   :  { %v5648_v38 = vadd.f32 %v5647_v56, %v5605_v55 }
 0x3bf   :  { %v5649_v61 = vpop.f32.mrf.mxu0 }
 0x3c0   :  { %7097 = vmatpush3.bf16.msra.mxu1 %v7534_v12  ;;  %v5650_v2 = vadd.f32 %v5649_v61, %v5607_v62 }
 0x3c1   :  { %7098 = vmatprep.subr.bf16.mxu1 %v7535_v36  ;;  %v5651_v1 = vpop.f32.mrf.mxu0 }
 0x3c2   :  { %v5652_v46 = vadd.f32 %v5651_v1, %v5609_v48 }
 0x3c4   :  { %7099 = vmatpush3.bf16.msra.mxu1 %v7536_v32 }
 0x3c5   :  { %7100 = vmatprep.subr.bf16.mxu1 %v7537_v10 }
 0x3c8   :  { %7101 = vmatpush3.bf16.msra.mxu1 %v7538_v59 }
 0x3c9   :  { %7102 = vmatprep.subr.bf16.mxu1 %v7539_v47 }
 0x3cc   :  { %7103 = vmatpush3.bf16.msra.mxu1 %v7540_v7 }
 0x3cd   :  { %7104 = vmatprep.subr.bf16.mxu1 %v7541_v11 }
 0x3d0   :  { %7105 = vmatpush3.bf16.msra.mxu1 %v7542_v9 }
 0x3e3   :  { %v5731_v60 = vpop.f32.mrf.mxu0 }
 0x3e4   :  { %v5732_v32 = vadd.f32 %v5731_v60, %v4236_v31 }
 0x3e5   :  { %v5733_v22 = vpop.f32.mrf.mxu0 }
 0x3e6   :  { %v5734_v12 = vadd.f32 %v5733_v22, %v4240_v15 }
 0x3e7   :  { %v5735_v30 = vpop.f32.mrf.mxu0 }
 0x3e8   :  { %v5736_v36 = vadd.f32 %v5735_v30, %v4236_v31 }
 0x3e9   :  { %v5737_v57 = vpop.f32.mrf.mxu0 }
 0x3ea   :  { %v5738_v41 = vadd.f32 %v5737_v57, %v4240_v15 }
 0x3f3   :  { %v5688_v63 = vpop.f32.mrf.mxu1 }
 0x3f4   :  { %v5689_v25 = vadd.f32 %v5688_v63, %v5646_v13  ;;  %v7026_v13 = vld [vmem:[#allocation13] ss:$0 sm:$0xff] }
 0x3f5   :  { %v5690_v44 = vpop.f32.mrf.mxu1 }
 0x3f6   :  { %v5691_v5 = vadd.f32 %v5690_v44, %v5648_v38  ;;  %v5869_v17 = vmax.f32 %v5689_v25, 0.0 }
 0x3f7   :  { %v5692_v3 = vpop.f32.mrf.mxu1 }
 0x3f8   :  { %v5693_v28 = vadd.f32 %v5692_v3, %v5650_v2  ;;  %v5870_v37 = vmax.f32 %v5691_v5, 0.0 }
 0x3f9   :  { %v5694_v40 = vpop.f32.mrf.mxu1 }
 0x3fa   :  { %v5695_v27 = vadd.f32 %v5694_v40, %v5652_v46  ;;  %v5873_v8 = vmax.f32 %v5693_v28, 0.0 }
 0x3fc   :  { %v5874_v53 = vmax.f32 %v5695_v27, 0.0  ;;  %v5877_v20 = vpack.c.bf16 %v5873_v8, %v5869_v17 }
 0x3fe   :  { %v5878_v19 = vpack.c.bf16 %v5874_v53, %v5870_v37 }
 0x400   :  { %6176 = vmatprep.mubr.bf16.mxu0 %v5878_v19 }
 0x401   :  { %6177 = vmatmul.mubr.bf16.vlgmr.msra.gmra.mxu0 %v5877_v20 }
 0x424   :  { %v5817_v39 = vpop.f32.mrf.mxu0 }
 0x426   :  { %v5819_v33 = vpop.f32.mrf.mxu0 }
 0x428   :  { %v5821_v49 = vpop.f32.mrf.mxu0 }
 0x42a   :  { %v5823_v52 = vpop.f32.mrf.mxu0 }
 0x433   :  { %v5774_v23 = vpop.f32.mrf.mxu1 }
 0x434   :  { %v5775_v35 = vadd.f32 %v5774_v23, %v5732_v32 }
 0x435   :  { %v5776_v24 = vpop.f32.mrf.mxu1 }
 0x436   :  { %v5777_v43 = vadd.f32 %v5776_v24, %v5734_v12  ;;  %v5818_v50 = vadd.f32 %v5817_v39, %v5775_v35 }
 0x437   :  { %v5778_v29 = vpop.f32.mrf.mxu1 }
 0x438   :  { %v5779_v45 = vadd.f32 %v5778_v29, %v5736_v36  ;;  %v5820_v21 = vadd.f32 %v5819_v33, %v5777_v43 }
 0x439   :  { %v5780_v14 = vpop.f32.mrf.mxu1 }
 0x43a   :  { %v5781_v6 = vadd.f32 %v5780_v14, %v5738_v41  ;;  %v5822_v56 = vadd.f32 %v5821_v49, %v5779_v45 }
 0x43c   :  { %v5824_v58 = vadd.f32 %v5823_v52, %v5781_v6 }
 0x473   :  { %v5860_v51 = vpop.f32.mrf.mxu1 }
 0x474   :  { %v5861_v34 = vadd.f32 %v5860_v51, %v5818_v50 }
 0x475   :  { %v5862_v54 = vpop.f32.mrf.mxu1 }
 0x476   :  { %v5863_v0 = vadd.f32 %v5862_v54, %v5820_v21  ;;  %v5871_v62 = vmax.f32 %v5861_v34, 0.0 }
 0x477   :  { %v5864_v4 = vpop.f32.mrf.mxu1 }
 0x478   :  { %v5865_v26 = vadd.f32 %v5864_v4, %v5822_v56  ;;  %v5872_v63 = vmax.f32 %v5863_v0, 0.0 }
 0x479   :  { %v5866_v18 = vpop.f32.mrf.mxu1 }
 0x47a   :  { %v5867_v61 = vadd.f32 %v5866_v18, %v5824_v58  ;;  %v5875_v42 = vmax.f32 %v5865_v26, 0.0 }
 0x47c   :  { %v5876_v55 = vmax.f32 %v5867_v61, 0.0  ;;  %v5879_v16 = vpack.c.bf16 %v5875_v42, %v5871_v62 }
 0x47e   :  { %v5880_v10 = vpack.c.bf16 %v5876_v55, %v5872_v63 }
 0x480   :  { %6217 = vmatprep.mubr.bf16.mxu1 %v5880_v10 }
 0x481   :  { %6218 = vmatmul.mubr.bf16.vlgmr.msra.gmra.mxu1 %v5879_v16 }
 0x4c1   :  { %v7084_v1 = vpop.f32.mrf.mxu0 }
 0x4c3   :  { %v7085_v44 = vpop.f32.mrf.mxu0 }
 0x4c4   :  { %v7086_v48 = vadd.f32 %v7085_v44, %v7084_v1 }
 0x4c5   :  { %v7087_v59 = vpop.f32.mrf.mxu0 }
 0x4c6   :  { %v6179_v28 = vadd.f32 %v7086_v48, %v7026_v13 }
 0x4c7   :  { %v7088_v38 = vpop.f32.mrf.mxu0 }
 0x4c8   :  { %v7089_v46 = vadd.f32 %v7088_v38, %v7087_v59 }
 0x4ca   :  { %v6182_v7 = vadd.f32 %v7089_v46, %v7026_v13 }
 0x541   :  { %v7106_v2 = vpop.f32.mrf.mxu1 }
 0x543   :  { %v7107_v3 = vpop.f32.mrf.mxu1 }
 0x544   :  { %v7108_v5 = vadd.f32 %v7107_v3, %v7106_v2 }
 0x545   :  { %v7109_v47 = vpop.f32.mrf.mxu1 }
 0x546   :  { %v6220_v25 = vadd.f32 %v7108_v5, %v6179_v28 }
 0x547   :  { %v7110_v40 = vpop.f32.mrf.mxu1 }
 0x548   :  { %v7111_v27 = vadd.f32 %v7110_v40, %v7109_v47  ;;  %7543 = vtanh.f32 %v6220_v25 }
 0x54a   :  { %v6223_v8 = vadd.f32 %v7111_v27, %v6182_v7 }
 0x54c   :  { %7545 = vtanh.f32 %v6223_v8 }
 0x555   :  { %v7544_v37 = vpop.eup %7543 }
 0x559   :  { %v7546_v53 = vpop.eup %7545 }
 0x55a   :  { %v7066_v11 = vpack.c.bf16 %v7546_v53, %v7544_v37 }
 0x55c   :  { %7067 = vst [vmem:[#allocation14] sm:$0xff] %v7066_v11  }
 0x55d   :  { %7699 = shalt.err (!%p7696_p11)
}
 0x55e   :  { %6249 = dma.vmem_to_hbm [thread:$0]  %s6244_s6, 128, %s8007_s7, [#allocation4], %s7725_s17, %s7725_s17, %s7726_s18  }
 0x55f   :  { %7716 = dma.done.wait [#allocation4], 128  }
 0x560   :  { %7717 = vsyncadd [#allocation4], 4294967168 }
 0x561   :  { %6253 = vsyncpa [#allocation3], 1 }
 0x562   :  { %6254 = vsyncpa [#allocation6], 1 }
 0x563   :  { %6255 = vsyncpa [#allocation9], 1 }
 0x564   :  { %6256 = vsyncpa [#allocation12], 1 }
 0x565   :  { %6257 = vsyncpa [#allocation4], 1 }

</bundles_post_ra>
